<compile_context>
chip_gen: v6e
topology: v6e:2x2x1
jax: 0.10.0
libtpu: 0.0.40
codegen_flags: <defaults>
</compile_context>

<pallas_src>
import math
import jax
import jax.numpy as jnp
from jax.experimental import pallas as pl
from jax.experimental.pallas import tpu as pltpu

D = 32                      # hidden_dim
N_HEAD = 2
HEAD_DIM = D // N_HEAD
D_FF = 4 * D                # 128 (lane-aligned)
N_LQ = 4                    # n_latent_query
N_LAYERS = 2                # n_encoder_layers (depth of tf_latent_self)
N_TOTAL_LAYERS = 1 + N_LAYERS   # tf_latent_cross (1) + tf_latent_self (N_LAYERS)
NEG_INF = -1e30
LN_EPS = 1e-5
SCALE = 1.0 / math.sqrt(HEAD_DIM)

# rows of the packed per-layer vector slab ([8, 128]):
_R_BQKV, _R_BO, _R_G1, _R_BE1, _R_BF1, _R_BF2, _R_G2, _R_BE2 = range(8)


def _layernorm(x, gamma, beta):
    mu = jnp.mean(x, axis=-1, keepdims=True)
    var = jnp.mean((x - mu) ** 2, axis=-1, keepdims=True)
    return (x - mu) * jax.lax.rsqrt(var + LN_EPS) * gamma + beta


def _proj(x, w):
    """[B, N, Din] @ [Din, Dout] with (batch, token) flattened -> one MXU matmul."""
    B, N, Din = x.shape
    y = jnp.dot(x.reshape(B * N, Din), w, preferred_element_type=jnp.float32)
    return y.reshape(B, N, w.shape[-1])


def _attention(x_src, x_mem, bias, wqkv, bqkv, wo, bo):
    """Batched multi-head attention.

    x_src: [B, Lq, D]; x_mem: [B, Lk, D] or None (self-attention: reuse src projection);
    bias : [B, 1, Lk] additive key-padding bias or None.
    """
    src_p = _proj(x_src, wqkv) + bqkv                                   # [B, Lq, 3D]
    mem_p = src_p if x_mem is None else _proj(x_mem, wqkv) + bqkv       # [B, Lk, 3D]

    out = None
    for h in range(N_HEAD):                      # static unroll (N_HEAD == 2)
        qh = src_p[..., h * HEAD_DIM:(h + 1) * HEAD_DIM]                # [B, Lq, Dh]
        kh = mem_p[..., D + h * HEAD_DIM:D + (h + 1) * HEAD_DIM]        # [B, Lk, Dh]
        vh = mem_p[..., 2 * D + h * HEAD_DIM:2 * D + (h + 1) * HEAD_DIM]

        s = jnp.einsum('bqd,bkd->bqk', qh, kh,
                       preferred_element_type=jnp.float32) * SCALE      # [B, Lq, Lk]
        if bias is not None:
            s = s + bias
        s = s - jnp.max(s, axis=-1, keepdims=True)
        p = jnp.exp(s)
        p = p * pl.reciprocal(jnp.sum(p, axis=-1, keepdims=True), approx=True)

        oh = jnp.einsum('bqk,bkd->bqd', p, vh,
                        preferred_element_type=jnp.float32)             # [B, Lq, Dh]
        # fold the output projection into the head loop:
        #   concat_h(o_h) @ Wo == sum_h o_h @ Wo[h*Dh:(h+1)*Dh, :]
        contrib = _proj(oh, wo[h * HEAD_DIM:(h + 1) * HEAD_DIM, :])     # [B, Lq, D]
        out = contrib if out is None else out + contrib
    return out + bo


def _transformer_layer(x, mem, bias, wqkv, wo, w1, w2, vec):
    """Post-norm block: MHA + residual + LN, FFN(4x, ReLU) + residual + LN.

    mem=None -> self-attention over x (no key-padding mask).
    """
    bqkv = vec[_R_BQKV:_R_BQKV + 1, :3 * D].reshape(1, 1, 3 * D)
    bo = vec[_R_BO:_R_BO + 1, :D].reshape(1, 1, D)
    g1 = vec[_R_G1:_R_G1 + 1, :D].reshape(1, 1, D)
    be1 = vec[_R_BE1:_R_BE1 + 1, :D].reshape(1, 1, D)
    bf1 = vec[_R_BF1:_R_BF1 + 1, :D_FF].reshape(1, 1, D_FF)
    bf2 = vec[_R_BF2:_R_BF2 + 1, :D].reshape(1, 1, D)
    g2 = vec[_R_G2:_R_G2 + 1, :D].reshape(1, 1, D)
    be2 = vec[_R_BE2:_R_BE2 + 1, :D].reshape(1, 1, D)

    attn = _attention(x, mem, bias, wqkv, bqkv, wo, bo)
    x1 = _layernorm(x + attn, g1, be1)

    h1 = jnp.maximum(_proj(x1, w1) + bf1, 0.0)          # [B, N, D_FF], ReLU
    ff = _proj(h1, w2) + bf2                             # [B, N, D]
    return _layernorm(x1 + ff, g2, be2)


def encoder_kernel(lq_ref, kv_ref, bias_ref,
                   wqkv_ref, wo_ref, w1_ref, w2_ref, vec_ref,
                   out_ref):
    """Fused latent-query encoder: cross-attn over fused tokens + self-attn stack."""
    x = lq_ref[...].astype(jnp.float32)        # [B, N_LQ, D]
    mem = kv_ref[...].astype(jnp.float32)      # [B, Lk, D]
    bias = bias_ref[...]                       # [B, 1, Lk] additive key-padding bias

    # layer 0: tf_latent_cross — latent queries attend to the fused token set
    x = _transformer_layer(x, mem, bias,
                           wqkv_ref[0], wo_ref[0], w1_ref[0], w2_ref[0], vec_ref[0])
    # layers 1..: tf_latent_self — self-attention over latents, no padding mask
    for l in range(1, N_TOTAL_LAYERS):
        x = _transformer_layer(x, None, None,
                               wqkv_ref[l], wo_ref[l], w1_ref[l], w2_ref[l], vec_ref[l])

    out_ref[...] = x.astype(out_ref.dtype)


def run_encoder(lq_emb, emb, bias, params):
    """lq_emb: [B, N_LQ, D]; emb: [B, Lk, D]; bias: [B, 1, Lk] (0 valid / -1e30 invalid)."""
    B = lq_emb.shape[0]
    args = (lq_emb, emb, bias,
            params["wqkv"], params["wo"], params["w1"], params["w2"], params["vec"])
    vmem_spec = lambda: pl.BlockSpec(memory_space=pltpu.MemorySpace.VMEM)
    return pl.pallas_call(
        encoder_kernel,
        out_shape=jax.ShapeDtypeStruct((B, N_LQ, D), jnp.float32),
        in_specs=[vmem_spec() for _ in args],
        out_specs=vmem_spec(),
    )(*args)


def init_params(key):
    keys = jax.random.split(key, 1 + N_TOTAL_LAYERS)
    s = 0.05
    wqkv_l, wo_l, w1_l, w2_l, vec_l = [], [], [], [], []
    for l in range(N_TOTAL_LAYERS):
        ks = jax.random.split(keys[1 + l], 6)
        wq = jax.random.normal(ks[0], (D, D), jnp.float32) * s
        wk = jax.random.normal(ks[1], (D, D), jnp.float32) * s
        wv = jax.random.normal(ks[2], (D, D), jnp.float32) * s
        wqkv_l.append(jnp.concatenate([wq, wk, wv], axis=1))            # [D, 3D] fused QKV
        wo_l.append(jax.random.normal(ks[3], (D, D), jnp.float32) * s)
        w1_l.append(jax.random.normal(ks[4], (D, D_FF), jnp.float32) * s)
        w2_l.append(jax.random.normal(ks[5], (D_FF, D), jnp.float32) * s)
        # packed per-layer vector slab [8, 128]: biases zero, LN gammas one, betas zero
        v = jnp.zeros((8, 128), jnp.float32)
        v = v.at[_R_G1, :D].set(1.0)
        v = v.at[_R_G2, :D].set(1.0)
        vec_l.append(v)
    return {
        # MultiModalAnchors: learned, agent-type-conditioned anchors [3, n_latent_query, D]
        "anchors": jax.random.normal(keys[0], (3, N_LQ, D), jnp.float32) * 0.1,
        "wqkv": jnp.stack(wqkv_l),   # [L, D, 3D]
        "wo":   jnp.stack(wo_l),     # [L, D, D]
        "w1":   jnp.stack(w1_l),     # [L, D, D_FF]
        "w2":   jnp.stack(w2_l),     # [L, D_FF, D]
        "vec":  jnp.stack(vec_l),    # [L, 8, 128] packed biases + LN params
    }


def early_fusion_encoder(params,
                         target_emb, target_valid,
                         other_emb, other_valid,
                         tl_emb, tl_valid,
                         map_emb, map_valid,
                         target_type, valid):
    # glue: early fusion of token streams (matches torch.cat along dim=1)
    emb = jnp.concatenate([target_emb, other_emb, tl_emb, map_emb], axis=1)
    emb_valid = jnp.concatenate([target_valid, other_valid, tl_valid, map_valid], axis=1)
    # key_padding_mask -> additive bias: 0 for valid keys, -1e30 for invalid keys
    bias = jnp.where(emb_valid, 0.0, NEG_INF).astype(jnp.float32)[:, None, :]   # [B, 1, Lk]

    # MultiModalAnchors(valid, None, target_type): type-conditioned learned anchors.
    # TODO(synk): exact MultiModalAnchors projection depends on its DictConfig (mode_emb etc.);
    #             here the emb arg is None so we use the type-selected anchor table directly.
    tt = target_type.reshape(-1, 3).astype(jnp.float32)                  # [B, 3] one-hot
    lq_emb = (tt @ params["anchors"].reshape(3, N_LQ * D)).reshape(-1, N_LQ, D)

    # fused cross-attn + self-attn stack in a single Pallas kernel
    x = run_encoder(lq_emb, emb, bias, params)

    # emb_invalid = (~valid).flatten(0,1).unsqueeze(-1).expand(-1, n_latent_query)
    emb_invalid_out = jnp.broadcast_to((~valid).reshape(-1, 1), (x.shape[0], N_LQ))
    return x, emb_invalid_out


if __name__ == "__main__":
    key = jax.random.PRNGKey(0)
    n_scene, n_target = 2, 2
    B = n_scene * n_target
    n_step_hist, n_other, n_tl, n_map = 1, 6, 5, 8

    ks = jax.random.split(key, 10)
    target_emb = jax.random.normal(ks[0], (B, n_step_hist, D), jnp.float32)
    other_emb = jax.random.normal(ks[1], (B, n_other, D), jnp.float32)
    tl_emb = jax.random.normal(ks[2], (B, n_tl, D), jnp.float32)
    map_emb = jax.random.normal(ks[3], (B, n_map, D), jnp.float32)

    target_valid = jnp.ones((B, n_step_hist), jnp.bool_)   # target token always valid
    other_valid = jax.random.bernoulli(ks[4], 0.8, (B, n_other))
    tl_valid = jax.random.bernoulli(ks[5], 0.8, (B, n_tl))
    map_valid = jax.random.bernoulli(ks[6], 0.8, (B, n_map))

    type_idx = jax.random.randint(ks[7], (n_scene, n_target), 0, 3)
    target_type = (jnp.arange(3) == type_idx[..., None])    # bool one-hot [n_scene, n_target, 3]
    valid = jnp.ones((n_scene, n_target), jnp.bool_)

    params = init_params(jax.random.PRNGKey(42))

    emb_out, emb_invalid_out = early_fusion_encoder(
        params,
        target_emb, target_valid,
        other_emb, other_valid,
        tl_emb, tl_valid,
        map_emb, map_valid,
        target_type, valid,
    )
    jax.block_until_ready(emb_out)
    jax.block_until_ready(emb_invalid_out)

    assert emb_out.shape == (B, N_LQ, D)
    assert emb_invalid_out.shape == (B, N_LQ)
    assert emb_out.dtype == jnp.float32
    assert bool(jnp.all(jnp.isfinite(emb_out)))
    print("KERNEL_OK")
</pallas_src>

<mosaic_0001>
module attributes {stable_mosaic.version = 11 : i64} {
  func.func @encoder_kernel(%arg0: memref<4x4x32xf32, #tpu.memory_space<vmem>>, %arg1: memref<4x20x32xf32, #tpu.memory_space<vmem>>, %arg2: memref<4x1x20xf32, #tpu.memory_space<vmem>>, %arg3: memref<3x32x96xf32, #tpu.memory_space<vmem>>, %arg4: memref<3x32x32xf32, #tpu.memory_space<vmem>>, %arg5: memref<3x32x128xf32, #tpu.memory_space<vmem>>, %arg6: memref<3x128x32xf32, #tpu.memory_space<vmem>>, %arg7: memref<3x8x128xf32, #tpu.memory_space<vmem>>, %arg8: memref<4x4x32xf32, #tpu.memory_space<vmem>>) attributes {dimension_semantics = [], scalar_prefetch = 0 : i64, scratch_operands = 0 : i64, tpu.core_type = #tpu.core_type<tc>} {
    %c0 = arith.constant 0 : index
    %c0_0 = arith.constant 0 : index
    %c0_1 = arith.constant 0 : index
    %0 = vector.load %arg0[%c0, %c0_0, %c0_1] : memref<4x4x32xf32, #tpu.memory_space<vmem>>, vector<4x4x32xf32>
    %c0_2 = arith.constant 0 : index
    %c0_3 = arith.constant 0 : index
    %c0_4 = arith.constant 0 : index
    %1 = vector.load %arg1[%c0_2, %c0_3, %c0_4] : memref<4x20x32xf32, #tpu.memory_space<vmem>>, vector<4x20x32xf32>
    %c0_5 = arith.constant 0 : index
    %c0_6 = arith.constant 0 : index
    %c0_7 = arith.constant 0 : index
    %2 = vector.load %arg2[%c0_5, %c0_6, %c0_7] : memref<4x1x20xf32, #tpu.memory_space<vmem>>, vector<4x1x20xf32>
    %c0_8 = arith.constant 0 : index
    %c0_9 = arith.constant 0 : index
    %c0_10 = arith.constant 0 : index
    %3 = vector.load %arg3[%c0_8, %c0_9, %c0_10] : memref<3x32x96xf32, #tpu.memory_space<vmem>>, vector<1x32x96xf32>
    %4 = vector.shape_cast %3 : vector<1x32x96xf32> to vector<32x96xf32>
    %c0_11 = arith.constant 0 : index
    %c0_12 = arith.constant 0 : index
    %c0_13 = arith.constant 0 : index
    %5 = vector.load %arg4[%c0_11, %c0_12, %c0_13] : memref<3x32x32xf32, #tpu.memory_space<vmem>>, vector<1x32x32xf32>
    %6 = vector.shape_cast %5 : vector<1x32x32xf32> to vector<32x32xf32>
    %c0_14 = arith.constant 0 : index
    %c0_15 = arith.constant 0 : index
    %c0_16 = arith.constant 0 : index
    %7 = vector.load %arg5[%c0_14, %c0_15, %c0_16] : memref<3x32x128xf32, #tpu.memory_space<vmem>>, vector<1x32x128xf32>
    %8 = vector.shape_cast %7 : vector<1x32x128xf32> to vector<32x128xf32>
    %c0_17 = arith.constant 0 : index
    %c0_18 = arith.constant 0 : index
    %c0_19 = arith.constant 0 : index
    %9 = vector.load %arg6[%c0_17, %c0_18, %c0_19] : memref<3x128x32xf32, #tpu.memory_space<vmem>>, vector<1x128x32xf32>
    %10 = vector.shape_cast %9 : vector<1x128x32xf32> to vector<128x32xf32>
    %c0_20 = arith.constant 0 : index
    %c0_21 = arith.constant 0 : index
    %c0_22 = arith.constant 0 : index
    %11 = vector.load %arg7[%c0_20, %c0_21, %c0_22] : memref<3x8x128xf32, #tpu.memory_space<vmem>>, vector<1x8x128xf32>
    %12 = vector.shape_cast %11 : vector<1x8x128xf32> to vector<8x128xf32>
    %13 = vector.extract_strided_slice %12 {offsets = [0, 0], sizes = [1, 96], strides = [1, 1]} : vector<8x128xf32> to vector<1x96xf32>
    %14 = vector.shape_cast %13 : vector<1x96xf32> to vector<1x1x96xf32>
    %15 = vector.extract_strided_slice %12 {offsets = [1, 0], sizes = [1, 32], strides = [1, 1]} : vector<8x128xf32> to vector<1x32xf32>
    %16 = vector.shape_cast %15 : vector<1x32xf32> to vector<1x1x32xf32>
    %17 = vector.extract_strided_slice %12 {offsets = [2, 0], sizes = [1, 32], strides = [1, 1]} : vector<8x128xf32> to vector<1x32xf32>
    %18 = vector.shape_cast %17 : vector<1x32xf32> to vector<1x1x32xf32>
    %19 = vector.extract_strided_slice %12 {offsets = [3, 0], sizes = [1, 32], strides = [1, 1]} : vector<8x128xf32> to vector<1x32xf32>
    %20 = vector.shape_cast %19 : vector<1x32xf32> to vector<1x1x32xf32>
    %21 = vector.extract_strided_slice %12 {offsets = [4, 0], sizes = [1, 128], strides = [1, 1]} : vector<8x128xf32> to vector<1x128xf32>
    %22 = vector.shape_cast %21 : vector<1x128xf32> to vector<1x1x128xf32>
    %23 = vector.extract_strided_slice %12 {offsets = [5, 0], sizes = [1, 32], strides = [1, 1]} : vector<8x128xf32> to vector<1x32xf32>
    %24 = vector.shape_cast %23 : vector<1x32xf32> to vector<1x1x32xf32>
    %25 = vector.extract_strided_slice %12 {offsets = [6, 0], sizes = [1, 32], strides = [1, 1]} : vector<8x128xf32> to vector<1x32xf32>
    %26 = vector.shape_cast %25 : vector<1x32xf32> to vector<1x1x32xf32>
    %27 = vector.extract_strided_slice %12 {offsets = [7, 0], sizes = [1, 32], strides = [1, 1]} : vector<8x128xf32> to vector<1x32xf32>
    %28 = vector.shape_cast %27 : vector<1x32xf32> to vector<1x1x32xf32>
    %29 = vector.shape_cast %0 : vector<4x4x32xf32> to vector<16x32xf32>
    %cst = arith.constant dense<0.000000e+00> : vector<16x96xf32>
    %30 = tpu.matmul %29, %4, %cst {dimension_numbers = #tpu.dot_dimension_numbers<[1], [0], [0], [1], [0, 0, 1, 1], [], []>} : vector<16x32xf32>, vector<32x96xf32>, vector<16x96xf32> -> vector<16x96xf32>
    %31 = vector.shape_cast %30 : vector<16x96xf32> to vector<4x4x96xf32>
    %32 = vector.broadcast %14 : vector<1x1x96xf32> to vector<4x4x96xf32>
    %33 = arith.addf %31, %32 : vector<4x4x96xf32>
    %34 = vector.shape_cast %1 : vector<4x20x32xf32> to vector<80x32xf32>
    %cst_23 = arith.constant dense<0.000000e+00> : vector<80x96xf32>
    %35 = tpu.matmul %34, %4, %cst_23 {dimension_numbers = #tpu.dot_dimension_numbers<[1], [0], [0], [1], [0, 0, 1, 1], [], []>} : vector<80x32xf32>, vector<32x96xf32>, vector<80x96xf32> -> vector<80x96xf32>
    %36 = vector.shape_cast %35 : vector<80x96xf32> to vector<4x20x96xf32>
    %37 = vector.broadcast %14 : vector<1x1x96xf32> to vector<4x20x96xf32>
    %38 = arith.addf %36, %37 : vector<4x20x96xf32>
    %39 = vector.extract_strided_slice %33 {offsets = [0, 0, 0], sizes = [4, 4, 16], strides = [1, 1, 1]} : vector<4x4x96xf32> to vector<4x4x16xf32>
    %40 = vector.extract_strided_slice %38 {offsets = [0, 0, 32], sizes = [4, 20, 16], strides = [1, 1, 1]} : vector<4x20x96xf32> to vector<4x20x16xf32>
    %41 = vector.extract_strided_slice %38 {offsets = [0, 0, 64], sizes = [4, 20, 16], strides = [1, 1, 1]} : vector<4x20x96xf32> to vector<4x20x16xf32>
    "tpu.trace_start"() <{level = 10 : i32, message = "bqd,bkd->bqk"}> : () -> ()
    %cst_24 = arith.constant dense<0.000000e+00> : vector<4x4x20xf32>
    %42 = tpu.matmul %39, %40, %cst_24 {dimension_numbers = #tpu.dot_dimension_numbers<[2], [2], [1], [1], [0, 0, 0, 1, 1, 1], [0], [0]>} : vector<4x4x16xf32>, vector<4x20x16xf32>, vector<4x4x20xf32> -> vector<4x4x20xf32>
    "tpu.trace_stop"() : () -> ()
    %cst_25 = arith.constant 2.500000e-01 : f32
    %43 = vector.broadcast %cst_25 : f32 to vector<4x4x20xf32>
    %44 = arith.mulf %42, %43 : vector<4x4x20xf32>
    %45 = vector.broadcast %2 : vector<4x1x20xf32> to vector<4x4x20xf32>
    %46 = arith.addf %44, %45 : vector<4x4x20xf32>
    %cst_26 = arith.constant dense<0xFF800000> : vector<4x4xf32>
    %47 = vector.multi_reduction <maximumf>, %46, %cst_26 [2] : vector<4x4x20xf32> to vector<4x4xf32>
    %48 = vector.shape_cast %47 : vector<4x4xf32> to vector<4x4x1xf32>
    %49 = vector.broadcast %48 : vector<4x4x1xf32> to vector<4x4x20xf32>
    %50 = arith.subf %46, %49 : vector<4x4x20xf32>
    %51 = math.exp %50 : vector<4x4x20xf32>
    %cst_27 = arith.constant dense<0.000000e+00> : vector<4x4xf32>
    %52 = vector.multi_reduction <add>, %51, %cst_27 [2] : vector<4x4x20xf32> to vector<4x4xf32>
    %53 = vector.shape_cast %52 : vector<4x4xf32> to vector<4x4x1xf32>
    %54 = tpu.reciprocal %53 {approx = true} : vector<4x4x1xf32> -> vector<4x4x1xf32>
    %55 = vector.broadcast %54 : vector<4x4x1xf32> to vector<4x4x20xf32>
    %56 = arith.mulf %51, %55 : vector<4x4x20xf32>
    "tpu.trace_start"() <{level = 10 : i32, message = "bqk,bkd->bqd"}> : () -> ()
    %cst_28 = arith.constant dense<0.000000e+00> : vector<4x4x16xf32>
    %57 = tpu.matmul %56, %41, %cst_28 {dimension_numbers = #tpu.dot_dimension_numbers<[2], [1], [1], [2], [0, 0, 0, 1, 1, 2], [0], [0]>} : vector<4x4x20xf32>, vector<4x20x16xf32>, vector<4x4x16xf32> -> vector<4x4x16xf32>
    "tpu.trace_stop"() : () -> ()
    %58 = vector.extract_strided_slice %6 {offsets = [0, 0], sizes = [16, 32], strides = [1, 1]} : vector<32x32xf32> to vector<16x32xf32>
    %59 = vector.shape_cast %57 : vector<4x4x16xf32> to vector<16x16xf32>
    %cst_29 = arith.constant dense<0.000000e+00> : vector<16x32xf32>
    %60 = tpu.matmul %59, %58, %cst_29 {dimension_numbers = #tpu.dot_dimension_numbers<[1], [0], [0], [1], [0, 0, 1, 1], [], []>} : vector<16x16xf32>, vector<16x32xf32>, vector<16x32xf32> -> vector<16x32xf32>
    %61 = vector.shape_cast %60 : vector<16x32xf32> to vector<4x4x32xf32>
    %62 = vector.extract_strided_slice %33 {offsets = [0, 0, 16], sizes = [4, 4, 16], strides = [1, 1, 1]} : vector<4x4x96xf32> to vector<4x4x16xf32>
    %63 = vector.extract_strided_slice %38 {offsets = [0, 0, 48], sizes = [4, 20, 16], strides = [1, 1, 1]} : vector<4x20x96xf32> to vector<4x20x16xf32>
    %64 = vector.extract_strided_slice %38 {offsets = [0, 0, 80], sizes = [4, 20, 16], strides = [1, 1, 1]} : vector<4x20x96xf32> to vector<4x20x16xf32>
    "tpu.trace_start"() <{level = 10 : i32, message = "bqd,bkd->bqk"}> : () -> ()
    %cst_30 = arith.constant dense<0.000000e+00> : vector<4x4x20xf32>
    %65 = tpu.matmul %62, %63, %cst_30 {dimension_numbers = #tpu.dot_dimension_numbers<[2], [2], [1], [1], [0, 0, 0, 1, 1, 1], [0], [0]>} : vector<4x4x16xf32>, vector<4x20x16xf32>, vector<4x4x20xf32> -> vector<4x4x20xf32>
    "tpu.trace_stop"() : () -> ()
    %cst_31 = arith.constant 2.500000e-01 : f32
    %66 = vector.broadcast %cst_31 : f32 to vector<4x4x20xf32>
    %67 = arith.mulf %65, %66 : vector<4x4x20xf32>
    %68 = vector.broadcast %2 : vector<4x1x20xf32> to vector<4x4x20xf32>
    %69 = arith.addf %67, %68 : vector<4x4x20xf32>
    %cst_32 = arith.constant dense<0xFF800000> : vector<4x4xf32>
    %70 = vector.multi_reduction <maximumf>, %69, %cst_32 [2] : vector<4x4x20xf32> to vector<4x4xf32>
    %71 = vector.shape_cast %70 : vector<4x4xf32> to vector<4x4x1xf32>
    %72 = vector.broadcast %71 : vector<4x4x1xf32> to vector<4x4x20xf32>
    %73 = arith.subf %69, %72 : vector<4x4x20xf32>
    %74 = math.exp %73 : vector<4x4x20xf32>
    %cst_33 = arith.constant dense<0.000000e+00> : vector<4x4xf32>
    %75 = vector.multi_reduction <add>, %74, %cst_33 [2] : vector<4x4x20xf32> to vector<4x4xf32>
    %76 = vector.shape_cast %75 : vector<4x4xf32> to vector<4x4x1xf32>
    %77 = tpu.reciprocal %76 {approx = true} : vector<4x4x1xf32> -> vector<4x4x1xf32>
    %78 = vector.broadcast %77 : vector<4x4x1xf32> to vector<4x4x20xf32>
    %79 = arith.mulf %74, %78 : vector<4x4x20xf32>
    "tpu.trace_start"() <{level = 10 : i32, message = "bqk,bkd->bqd"}> : () -> ()
    %cst_34 = arith.constant dense<0.000000e+00> : vector<4x4x16xf32>
    %80 = tpu.matmul %79, %64, %cst_34 {dimension_numbers = #tpu.dot_dimension_numbers<[2], [1], [1], [2], [0, 0, 0, 1, 1, 2], [0], [0]>} : vector<4x4x20xf32>, vector<4x20x16xf32>, vector<4x4x16xf32> -> vector<4x4x16xf32>
    "tpu.trace_stop"() : () -> ()
    %81 = vector.extract_strided_slice %6 {offsets = [16, 0], sizes = [16, 32], strides = [1, 1]} : vector<32x32xf32> to vector<16x32xf32>
    %82 = vector.shape_cast %80 : vector<4x4x16xf32> to vector<16x16xf32>
    %cst_35 = arith.constant dense<0.000000e+00> : vector<16x32xf32>
    %83 = tpu.matmul %82, %81, %cst_35 {dimension_numbers = #tpu.dot_dimension_numbers<[1], [0], [0], [1], [0, 0, 1, 1], [], []>} : vector<16x16xf32>, vector<16x32xf32>, vector<16x32xf32> -> vector<16x32xf32>
    %84 = vector.shape_cast %83 : vector<16x32xf32> to vector<4x4x32xf32>
    %85 = arith.addf %61, %84 : vector<4x4x32xf32>
    %86 = vector.broadcast %16 : vector<1x1x32xf32> to vector<4x4x32xf32>
    %87 = arith.addf %85, %86 : vector<4x4x32xf32>
    %88 = arith.addf %0, %87 : vector<4x4x32xf32>
    %cst_36 = arith.constant dense<0.000000e+00> : vector<4x4xf32>
    %89 = vector.multi_reduction <add>, %88, %cst_36 [2] : vector<4x4x32xf32> to vector<4x4xf32>
    %90 = vector.shape_cast %89 : vector<4x4xf32> to vector<4x4x1xf32>
    %cst_37 = arith.constant 3.200000e+01 : f32
    %91 = vector.broadcast %cst_37 : f32 to vector<4x4x1xf32>
    %92 = arith.divf %90, %91 : vector<4x4x1xf32>
    %93 = vector.broadcast %92 : vector<4x4x1xf32> to vector<4x4x32xf32>
    %94 = arith.subf %88, %93 : vector<4x4x32xf32>
    %95 = arith.mulf %94, %94 : vector<4x4x32xf32>
    %cst_38 = arith.constant dense<0.000000e+00> : vector<4x4xf32>
    %96 = vector.multi_reduction <add>, %95, %cst_38 [2] : vector<4x4x32xf32> to vector<4x4xf32>
    %97 = vector.shape_cast %96 : vector<4x4xf32> to vector<4x4x1xf32>
    %cst_39 = arith.constant 3.200000e+01 : f32
    %98 = vector.broadcast %cst_39 : f32 to vector<4x4x1xf32>
    %99 = arith.divf %97, %98 : vector<4x4x1xf32>
    %100 = vector.broadcast %92 : vector<4x4x1xf32> to vector<4x4x32xf32>
    %101 = arith.subf %88, %100 : vector<4x4x32xf32>
    %cst_40 = arith.constant 9.99999974E-6 : f32
    %102 = vector.broadcast %cst_40 : f32 to vector<4x4x1xf32>
    %103 = arith.addf %99, %102 : vector<4x4x1xf32>
    %104 = math.rsqrt %103 : vector<4x4x1xf32>
    %105 = vector.broadcast %104 : vector<4x4x1xf32> to vector<4x4x32xf32>
    %106 = arith.mulf %101, %105 : vector<4x4x32xf32>
    %107 = vector.broadcast %18 : vector<1x1x32xf32> to vector<4x4x32xf32>
    %108 = arith.mulf %106, %107 : vector<4x4x32xf32>
    %109 = vector.broadcast %20 : vector<1x1x32xf32> to vector<4x4x32xf32>
    %110 = arith.addf %108, %109 : vector<4x4x32xf32>
    %111 = vector.shape_cast %110 : vector<4x4x32xf32> to vector<16x32xf32>
    %cst_41 = arith.constant dense<0.000000e+00> : vector<16x128xf32>
    %112 = tpu.matmul %111, %8, %cst_41 {dimension_numbers = #tpu.dot_dimension_numbers<[1], [0], [0], [1], [0, 0, 1, 1], [], []>} : vector<16x32xf32>, vector<32x128xf32>, vector<16x128xf32> -> vector<16x128xf32>
    %113 = vector.shape_cast %112 : vector<16x128xf32> to vector<4x4x128xf32>
    %114 = vector.broadcast %22 : vector<1x1x128xf32> to vector<4x4x128xf32>
    %115 = arith.addf %113, %114 : vector<4x4x128xf32>
    %cst_42 = arith.constant 0.000000e+00 : f32
    %116 = vector.broadcast %cst_42 : f32 to vector<4x4x128xf32>
    %117 = arith.maximumf %115, %116 : vector<4x4x128xf32>
    %118 = vector.shape_cast %117 : vector<4x4x128xf32> to vector<16x128xf32>
    %cst_43 = arith.constant dense<0.000000e+00> : vector<16x32xf32>
    %119 = tpu.matmul %118, %10, %cst_43 {dimension_numbers = #tpu.dot_dimension_numbers<[1], [0], [0], [1], [0, 0, 1, 1], [], []>} : vector<16x128xf32>, vector<128x32xf32>, vector<16x32xf32> -> vector<16x32xf32>
    %120 = vector.shape_cast %119 : vector<16x32xf32> to vector<4x4x32xf32>
    %121 = vector.broadcast %24 : vector<1x1x32xf32> to vector<4x4x32xf32>
    %122 = arith.addf %120, %121 : vector<4x4x32xf32>
    %123 = arith.addf %110, %122 : vector<4x4x32xf32>
    %cst_44 = arith.constant dense<0.000000e+00> : vector<4x4xf32>
    %124 = vector.multi_reduction <add>, %123, %cst_44 [2] : vector<4x4x32xf32> to vector<4x4xf32>
    %125 = vector.shape_cast %124 : vector<4x4xf32> to vector<4x4x1xf32>
    %cst_45 = arith.constant 3.200000e+01 : f32
    %126 = vector.broadcast %cst_45 : f32 to vector<4x4x1xf32>
    %127 = arith.divf %125, %126 : vector<4x4x1xf32>
    %128 = vector.broadcast %127 : vector<4x4x1xf32> to vector<4x4x32xf32>
    %129 = arith.subf %123, %128 : vector<4x4x32xf32>
    %130 = arith.mulf %129, %129 : vector<4x4x32xf32>
    %cst_46 = arith.constant dense<0.000000e+00> : vector<4x4xf32>
    %131 = vector.multi_reduction <add>, %130, %cst_46 [2] : vector<4x4x32xf32> to vector<4x4xf32>
    %132 = vector.shape_cast %131 : vector<4x4xf32> to vector<4x4x1xf32>
    %cst_47 = arith.constant 3.200000e+01 : f32
    %133 = vector.broadcast %cst_47 : f32 to vector<4x4x1xf32>
    %134 = arith.divf %132, %133 : vector<4x4x1xf32>
    %135 = vector.broadcast %127 : vector<4x4x1xf32> to vector<4x4x32xf32>
    %136 = arith.subf %123, %135 : vector<4x4x32xf32>
    %cst_48 = arith.constant 9.99999974E-6 : f32
    %137 = vector.broadcast %cst_48 : f32 to vector<4x4x1xf32>
    %138 = arith.addf %134, %137 : vector<4x4x1xf32>
    %139 = math.rsqrt %138 : vector<4x4x1xf32>
    %140 = vector.broadcast %139 : vector<4x4x1xf32> to vector<4x4x32xf32>
    %141 = arith.mulf %136, %140 : vector<4x4x32xf32>
    %142 = vector.broadcast %26 : vector<1x1x32xf32> to vector<4x4x32xf32>
    %143 = arith.mulf %141, %142 : vector<4x4x32xf32>
    %144 = vector.broadcast %28 : vector<1x1x32xf32> to vector<4x4x32xf32>
    %145 = arith.addf %143, %144 : vector<4x4x32xf32>
    %c1 = arith.constant 1 : index
    %c0_49 = arith.constant 0 : index
    %c0_50 = arith.constant 0 : index
    %146 = vector.load %arg3[%c1, %c0_49, %c0_50] : memref<3x32x96xf32, #tpu.memory_space<vmem>>, vector<1x32x96xf32>
    %147 = vector.shape_cast %146 : vector<1x32x96xf32> to vector<32x96xf32>
    %c1_51 = arith.constant 1 : index
    %c0_52 = arith.constant 0 : index
    %c0_53 = arith.constant 0 : index
    %148 = vector.load %arg4[%c1_51, %c0_52, %c0_53] : memref<3x32x32xf32, #tpu.memory_space<vmem>>, vector<1x32x32xf32>
    %149 = vector.shape_cast %148 : vector<1x32x32xf32> to vector<32x32xf32>
    %c1_54 = arith.constant 1 : index
    %c0_55 = arith.constant 0 : index
    %c0_56 = arith.constant 0 : index
    %150 = vector.load %arg5[%c1_54, %c0_55, %c0_56] : memref<3x32x128xf32, #tpu.memory_space<vmem>>, vector<1x32x128xf32>
    %151 = vector.shape_cast %150 : vector<1x32x128xf32> to vector<32x128xf32>
    %c1_57 = arith.constant 1 : index
    %c0_58 = arith.constant 0 : index
    %c0_59 = arith.constant 0 : index
    %152 = vector.load %arg6[%c1_57, %c0_58, %c0_59] : memref<3x128x32xf32, #tpu.memory_space<vmem>>, vector<1x128x32xf32>
    %153 = vector.shape_cast %152 : vector<1x128x32xf32> to vector<128x32xf32>
    %c1_60 = arith.constant 1 : index
    %c0_61 = arith.constant 0 : index
    %c0_62 = arith.constant 0 : index
    %154 = vector.load %arg7[%c1_60, %c0_61, %c0_62] : memref<3x8x128xf32, #tpu.memory_space<vmem>>, vector<1x8x128xf32>
    %155 = vector.shape_cast %154 : vector<1x8x128xf32> to vector<8x128xf32>
    %156 = vector.extract_strided_slice %155 {offsets = [0, 0], sizes = [1, 96], strides = [1, 1]} : vector<8x128xf32> to vector<1x96xf32>
    %157 = vector.shape_cast %156 : vector<1x96xf32> to vector<1x1x96xf32>
    %158 = vector.extract_strided_slice %155 {offsets = [1, 0], sizes = [1, 32], strides = [1, 1]} : vector<8x128xf32> to vector<1x32xf32>
    %159 = vector.shape_cast %158 : vector<1x32xf32> to vector<1x1x32xf32>
    %160 = vector.extract_strided_slice %155 {offsets = [2, 0], sizes = [1, 32], strides = [1, 1]} : vector<8x128xf32> to vector<1x32xf32>
    %161 = vector.shape_cast %160 : vector<1x32xf32> to vector<1x1x32xf32>
    %162 = vector.extract_strided_slice %155 {offsets = [3, 0], sizes = [1, 32], strides = [1, 1]} : vector<8x128xf32> to vector<1x32xf32>
    %163 = vector.shape_cast %162 : vector<1x32xf32> to vector<1x1x32xf32>
    %164 = vector.extract_strided_slice %155 {offsets = [4, 0], sizes = [1, 128], strides = [1, 1]} : vector<8x128xf32> to vector<1x128xf32>
    %165 = vector.shape_cast %164 : vector<1x128xf32> to vector<1x1x128xf32>
    %166 = vector.extract_strided_slice %155 {offsets = [5, 0], sizes = [1, 32], strides = [1, 1]} : vector<8x128xf32> to vector<1x32xf32>
    %167 = vector.shape_cast %166 : vector<1x32xf32> to vector<1x1x32xf32>
    %168 = vector.extract_strided_slice %155 {offsets = [6, 0], sizes = [1, 32], strides = [1, 1]} : vector<8x128xf32> to vector<1x32xf32>
    %169 = vector.shape_cast %168 : vector<1x32xf32> to vector<1x1x32xf32>
    %170 = vector.extract_strided_slice %155 {offsets = [7, 0], sizes = [1, 32], strides = [1, 1]} : vector<8x128xf32> to vector<1x32xf32>
    %171 = vector.shape_cast %170 : vector<1x32xf32> to vector<1x1x32xf32>
    %172 = vector.shape_cast %145 : vector<4x4x32xf32> to vector<16x32xf32>
    %cst_63 = arith.constant dense<0.000000e+00> : vector<16x96xf32>
    %173 = tpu.matmul %172, %147, %cst_63 {dimension_numbers = #tpu.dot_dimension_numbers<[1], [0], [0], [1], [0, 0, 1, 1], [], []>} : vector<16x32xf32>, vector<32x96xf32>, vector<16x96xf32> -> vector<16x96xf32>
    %174 = vector.shape_cast %173 : vector<16x96xf32> to vector<4x4x96xf32>
    %175 = vector.broadcast %157 : vector<1x1x96xf32> to vector<4x4x96xf32>
    %176 = arith.addf %174, %175 : vector<4x4x96xf32>
    %177 = vector.extract_strided_slice %176 {offsets = [0, 0, 0], sizes = [4, 4, 16], strides = [1, 1, 1]} : vector<4x4x96xf32> to vector<4x4x16xf32>
    %178 = vector.extract_strided_slice %176 {offsets = [0, 0, 32], sizes = [4, 4, 16], strides = [1, 1, 1]} : vector<4x4x96xf32> to vector<4x4x16xf32>
    %179 = vector.extract_strided_slice %176 {offsets = [0, 0, 64], sizes = [4, 4, 16], strides = [1, 1, 1]} : vector<4x4x96xf32> to vector<4x4x16xf32>
    "tpu.trace_start"() <{level = 10 : i32, message = "bqd,bkd->bqk"}> : () -> ()
    %cst_64 = arith.constant dense<0.000000e+00> : vector<4x4x4xf32>
    %180 = tpu.matmul %177, %178, %cst_64 {dimension_numbers = #tpu.dot_dimension_numbers<[2], [2], [1], [1], [0, 0, 0, 1, 1, 1], [0], [0]>} : vector<4x4x16xf32>, vector<4x4x16xf32>, vector<4x4x4xf32> -> vector<4x4x4xf32>
    "tpu.trace_stop"() : () -> ()
    %cst_65 = arith.constant 2.500000e-01 : f32
    %181 = vector.broadcast %cst_65 : f32 to vector<4x4x4xf32>
    %182 = arith.mulf %180, %181 : vector<4x4x4xf32>
    %cst_66 = arith.constant dense<0xFF800000> : vector<4x4xf32>
    %183 = vector.multi_reduction <maximumf>, %182, %cst_66 [2] : vector<4x4x4xf32> to vector<4x4xf32>
    %184 = vector.shape_cast %183 : vector<4x4xf32> to vector<4x4x1xf32>
    %185 = vector.broadcast %184 : vector<4x4x1xf32> to vector<4x4x4xf32>
    %186 = arith.subf %182, %185 : vector<4x4x4xf32>
    %187 = math.exp %186 : vector<4x4x4xf32>
    %cst_67 = arith.constant dense<0.000000e+00> : vector<4x4xf32>
    %188 = vector.multi_reduction <add>, %187, %cst_67 [2] : vector<4x4x4xf32> to vector<4x4xf32>
    %189 = vector.shape_cast %188 : vector<4x4xf32> to vector<4x4x1xf32>
    %190 = tpu.reciprocal %189 {approx = true} : vector<4x4x1xf32> -> vector<4x4x1xf32>
    %191 = vector.broadcast %190 : vector<4x4x1xf32> to vector<4x4x4xf32>
    %192 = arith.mulf %187, %191 : vector<4x4x4xf32>
    "tpu.trace_start"() <{level = 10 : i32, message = "bqk,bkd->bqd"}> : () -> ()
    %cst_68 = arith.constant dense<0.000000e+00> : vector<4x4x16xf32>
    %193 = tpu.matmul %192, %179, %cst_68 {dimension_numbers = #tpu.dot_dimension_numbers<[2], [1], [1], [2], [0, 0, 0, 1, 1, 2], [0], [0]>} : vector<4x4x4xf32>, vector<4x4x16xf32>, vector<4x4x16xf32> -> vector<4x4x16xf32>
    "tpu.trace_stop"() : () -> ()
    %194 = vector.extract_strided_slice %149 {offsets = [0, 0], sizes = [16, 32], strides = [1, 1]} : vector<32x32xf32> to vector<16x32xf32>
    %195 = vector.shape_cast %193 : vector<4x4x16xf32> to vector<16x16xf32>
    %cst_69 = arith.constant dense<0.000000e+00> : vector<16x32xf32>
    %196 = tpu.matmul %195, %194, %cst_69 {dimension_numbers = #tpu.dot_dimension_numbers<[1], [0], [0], [1], [0, 0, 1, 1], [], []>} : vector<16x16xf32>, vector<16x32xf32>, vector<16x32xf32> -> vector<16x32xf32>
    %197 = vector.shape_cast %196 : vector<16x32xf32> to vector<4x4x32xf32>
    %198 = vector.extract_strided_slice %176 {offsets = [0, 0, 16], sizes = [4, 4, 16], strides = [1, 1, 1]} : vector<4x4x96xf32> to vector<4x4x16xf32>
    %199 = vector.extract_strided_slice %176 {offsets = [0, 0, 48], sizes = [4, 4, 16], strides = [1, 1, 1]} : vector<4x4x96xf32> to vector<4x4x16xf32>
    %200 = vector.extract_strided_slice %176 {offsets = [0, 0, 80], sizes = [4, 4, 16], strides = [1, 1, 1]} : vector<4x4x96xf32> to vector<4x4x16xf32>
    "tpu.trace_start"() <{level = 10 : i32, message = "bqd,bkd->bqk"}> : () -> ()
    %cst_70 = arith.constant dense<0.000000e+00> : vector<4x4x4xf32>
    %201 = tpu.matmul %198, %199, %cst_70 {dimension_numbers = #tpu.dot_dimension_numbers<[2], [2], [1], [1], [0, 0, 0, 1, 1, 1], [0], [0]>} : vector<4x4x16xf32>, vector<4x4x16xf32>, vector<4x4x4xf32> -> vector<4x4x4xf32>
    "tpu.trace_stop"() : () -> ()
    %cst_71 = arith.constant 2.500000e-01 : f32
    %202 = vector.broadcast %cst_71 : f32 to vector<4x4x4xf32>
    %203 = arith.mulf %201, %202 : vector<4x4x4xf32>
    %cst_72 = arith.constant dense<0xFF800000> : vector<4x4xf32>
    %204 = vector.multi_reduction <maximumf>, %203, %cst_72 [2] : vector<4x4x4xf32> to vector<4x4xf32>
    %205 = vector.shape_cast %204 : vector<4x4xf32> to vector<4x4x1xf32>
    %206 = vector.broadcast %205 : vector<4x4x1xf32> to vector<4x4x4xf32>
    %207 = arith.subf %203, %206 : vector<4x4x4xf32>
    %208 = math.exp %207 : vector<4x4x4xf32>
    %cst_73 = arith.constant dense<0.000000e+00> : vector<4x4xf32>
    %209 = vector.multi_reduction <add>, %208, %cst_73 [2] : vector<4x4x4xf32> to vector<4x4xf32>
    %210 = vector.shape_cast %209 : vector<4x4xf32> to vector<4x4x1xf32>
    %211 = tpu.reciprocal %210 {approx = true} : vector<4x4x1xf32> -> vector<4x4x1xf32>
    %212 = vector.broadcast %211 : vector<4x4x1xf32> to vector<4x4x4xf32>
    %213 = arith.mulf %208, %212 : vector<4x4x4xf32>
    "tpu.trace_start"() <{level = 10 : i32, message = "bqk,bkd->bqd"}> : () -> ()
    %cst_74 = arith.constant dense<0.000000e+00> : vector<4x4x16xf32>
    %214 = tpu.matmul %213, %200, %cst_74 {dimension_numbers = #tpu.dot_dimension_numbers<[2], [1], [1], [2], [0, 0, 0, 1, 1, 2], [0], [0]>} : vector<4x4x4xf32>, vector<4x4x16xf32>, vector<4x4x16xf32> -> vector<4x4x16xf32>
    "tpu.trace_stop"() : () -> ()
    %215 = vector.extract_strided_slice %149 {offsets = [16, 0], sizes = [16, 32], strides = [1, 1]} : vector<32x32xf32> to vector<16x32xf32>
    %216 = vector.shape_cast %214 : vector<4x4x16xf32> to vector<16x16xf32>
    %cst_75 = arith.constant dense<0.000000e+00> : vector<16x32xf32>
    %217 = tpu.matmul %216, %215, %cst_75 {dimension_numbers = #tpu.dot_dimension_numbers<[1], [0], [0], [1], [0, 0, 1, 1], [], []>} : vector<16x16xf32>, vector<16x32xf32>, vector<16x32xf32> -> vector<16x32xf32>
    %218 = vector.shape_cast %217 : vector<16x32xf32> to vector<4x4x32xf32>
    %219 = arith.addf %197, %218 : vector<4x4x32xf32>
    %220 = vector.broadcast %159 : vector<1x1x32xf32> to vector<4x4x32xf32>
    %221 = arith.addf %219, %220 : vector<4x4x32xf32>
    %222 = arith.addf %145, %221 : vector<4x4x32xf32>
    %cst_76 = arith.constant dense<0.000000e+00> : vector<4x4xf32>
    %223 = vector.multi_reduction <add>, %222, %cst_76 [2] : vector<4x4x32xf32> to vector<4x4xf32>
    %224 = vector.shape_cast %223 : vector<4x4xf32> to vector<4x4x1xf32>
    %cst_77 = arith.constant 3.200000e+01 : f32
    %225 = vector.broadcast %cst_77 : f32 to vector<4x4x1xf32>
    %226 = arith.divf %224, %225 : vector<4x4x1xf32>
    %227 = vector.broadcast %226 : vector<4x4x1xf32> to vector<4x4x32xf32>
    %228 = arith.subf %222, %227 : vector<4x4x32xf32>
    %229 = arith.mulf %228, %228 : vector<4x4x32xf32>
    %cst_78 = arith.constant dense<0.000000e+00> : vector<4x4xf32>
    %230 = vector.multi_reduction <add>, %229, %cst_78 [2] : vector<4x4x32xf32> to vector<4x4xf32>
    %231 = vector.shape_cast %230 : vector<4x4xf32> to vector<4x4x1xf32>
    %cst_79 = arith.constant 3.200000e+01 : f32
    %232 = vector.broadcast %cst_79 : f32 to vector<4x4x1xf32>
    %233 = arith.divf %231, %232 : vector<4x4x1xf32>
    %234 = vector.broadcast %226 : vector<4x4x1xf32> to vector<4x4x32xf32>
    %235 = arith.subf %222, %234 : vector<4x4x32xf32>
    %cst_80 = arith.constant 9.99999974E-6 : f32
    %236 = vector.broadcast %cst_80 : f32 to vector<4x4x1xf32>
    %237 = arith.addf %233, %236 : vector<4x4x1xf32>
    %238 = math.rsqrt %237 : vector<4x4x1xf32>
    %239 = vector.broadcast %238 : vector<4x4x1xf32> to vector<4x4x32xf32>
    %240 = arith.mulf %235, %239 : vector<4x4x32xf32>
    %241 = vector.broadcast %161 : vector<1x1x32xf32> to vector<4x4x32xf32>
    %242 = arith.mulf %240, %241 : vector<4x4x32xf32>
    %243 = vector.broadcast %163 : vector<1x1x32xf32> to vector<4x4x32xf32>
    %244 = arith.addf %242, %243 : vector<4x4x32xf32>
    %245 = vector.shape_cast %244 : vector<4x4x32xf32> to vector<16x32xf32>
    %cst_81 = arith.constant dense<0.000000e+00> : vector<16x128xf32>
    %246 = tpu.matmul %245, %151, %cst_81 {dimension_numbers = #tpu.dot_dimension_numbers<[1], [0], [0], [1], [0, 0, 1, 1], [], []>} : vector<16x32xf32>, vector<32x128xf32>, vector<16x128xf32> -> vector<16x128xf32>
    %247 = vector.shape_cast %246 : vector<16x128xf32> to vector<4x4x128xf32>
    %248 = vector.broadcast %165 : vector<1x1x128xf32> to vector<4x4x128xf32>
    %249 = arith.addf %247, %248 : vector<4x4x128xf32>
    %cst_82 = arith.constant 0.000000e+00 : f32
    %250 = vector.broadcast %cst_82 : f32 to vector<4x4x128xf32>
    %251 = arith.maximumf %249, %250 : vector<4x4x128xf32>
    %252 = vector.shape_cast %251 : vector<4x4x128xf32> to vector<16x128xf32>
    %cst_83 = arith.constant dense<0.000000e+00> : vector<16x32xf32>
    %253 = tpu.matmul %252, %153, %cst_83 {dimension_numbers = #tpu.dot_dimension_numbers<[1], [0], [0], [1], [0, 0, 1, 1], [], []>} : vector<16x128xf32>, vector<128x32xf32>, vector<16x32xf32> -> vector<16x32xf32>
    %254 = vector.shape_cast %253 : vector<16x32xf32> to vector<4x4x32xf32>
    %255 = vector.broadcast %167 : vector<1x1x32xf32> to vector<4x4x32xf32>
    %256 = arith.addf %254, %255 : vector<4x4x32xf32>
    %257 = arith.addf %244, %256 : vector<4x4x32xf32>
    %cst_84 = arith.constant dense<0.000000e+00> : vector<4x4xf32>
    %258 = vector.multi_reduction <add>, %257, %cst_84 [2] : vector<4x4x32xf32> to vector<4x4xf32>
    %259 = vector.shape_cast %258 : vector<4x4xf32> to vector<4x4x1xf32>
    %cst_85 = arith.constant 3.200000e+01 : f32
    %260 = vector.broadcast %cst_85 : f32 to vector<4x4x1xf32>
    %261 = arith.divf %259, %260 : vector<4x4x1xf32>
    %262 = vector.broadcast %261 : vector<4x4x1xf32> to vector<4x4x32xf32>
    %263 = arith.subf %257, %262 : vector<4x4x32xf32>
    %264 = arith.mulf %263, %263 : vector<4x4x32xf32>
    %cst_86 = arith.constant dense<0.000000e+00> : vector<4x4xf32>
    %265 = vector.multi_reduction <add>, %264, %cst_86 [2] : vector<4x4x32xf32> to vector<4x4xf32>
    %266 = vector.shape_cast %265 : vector<4x4xf32> to vector<4x4x1xf32>
    %cst_87 = arith.constant 3.200000e+01 : f32
    %267 = vector.broadcast %cst_87 : f32 to vector<4x4x1xf32>
    %268 = arith.divf %266, %267 : vector<4x4x1xf32>
    %269 = vector.broadcast %261 : vector<4x4x1xf32> to vector<4x4x32xf32>
    %270 = arith.subf %257, %269 : vector<4x4x32xf32>
    %cst_88 = arith.constant 9.99999974E-6 : f32
    %271 = vector.broadcast %cst_88 : f32 to vector<4x4x1xf32>
    %272 = arith.addf %268, %271 : vector<4x4x1xf32>
    %273 = math.rsqrt %272 : vector<4x4x1xf32>
    %274 = vector.broadcast %273 : vector<4x4x1xf32> to vector<4x4x32xf32>
    %275 = arith.mulf %270, %274 : vector<4x4x32xf32>
    %276 = vector.broadcast %169 : vector<1x1x32xf32> to vector<4x4x32xf32>
    %277 = arith.mulf %275, %276 : vector<4x4x32xf32>
    %278 = vector.broadcast %171 : vector<1x1x32xf32> to vector<4x4x32xf32>
    %279 = arith.addf %277, %278 : vector<4x4x32xf32>
    %c2 = arith.constant 2 : index
    %c0_89 = arith.constant 0 : index
    %c0_90 = arith.constant 0 : index
    %280 = vector.load %arg3[%c2, %c0_89, %c0_90] : memref<3x32x96xf32, #tpu.memory_space<vmem>>, vector<1x32x96xf32>
    %281 = vector.shape_cast %280 : vector<1x32x96xf32> to vector<32x96xf32>
    %c2_91 = arith.constant 2 : index
    %c0_92 = arith.constant 0 : index
    %c0_93 = arith.constant 0 : index
    %282 = vector.load %arg4[%c2_91, %c0_92, %c0_93] : memref<3x32x32xf32, #tpu.memory_space<vmem>>, vector<1x32x32xf32>
    %283 = vector.shape_cast %282 : vector<1x32x32xf32> to vector<32x32xf32>
    %c2_94 = arith.constant 2 : index
    %c0_95 = arith.constant 0 : index
    %c0_96 = arith.constant 0 : index
    %284 = vector.load %arg5[%c2_94, %c0_95, %c0_96] : memref<3x32x128xf32, #tpu.memory_space<vmem>>, vector<1x32x128xf32>
    %285 = vector.shape_cast %284 : vector<1x32x128xf32> to vector<32x128xf32>
    %c2_97 = arith.constant 2 : index
    %c0_98 = arith.constant 0 : index
    %c0_99 = arith.constant 0 : index
    %286 = vector.load %arg6[%c2_97, %c0_98, %c0_99] : memref<3x128x32xf32, #tpu.memory_space<vmem>>, vector<1x128x32xf32>
    %287 = vector.shape_cast %286 : vector<1x128x32xf32> to vector<128x32xf32>
    %c2_100 = arith.constant 2 : index
    %c0_101 = arith.constant 0 : index
    %c0_102 = arith.constant 0 : index
    %288 = vector.load %arg7[%c2_100, %c0_101, %c0_102] : memref<3x8x128xf32, #tpu.memory_space<vmem>>, vector<1x8x128xf32>
    %289 = vector.shape_cast %288 : vector<1x8x128xf32> to vector<8x128xf32>
    %290 = vector.extract_strided_slice %289 {offsets = [0, 0], sizes = [1, 96], strides = [1, 1]} : vector<8x128xf32> to vector<1x96xf32>
    %291 = vector.shape_cast %290 : vector<1x96xf32> to vector<1x1x96xf32>
    %292 = vector.extract_strided_slice %289 {offsets = [1, 0], sizes = [1, 32], strides = [1, 1]} : vector<8x128xf32> to vector<1x32xf32>
    %293 = vector.shape_cast %292 : vector<1x32xf32> to vector<1x1x32xf32>
    %294 = vector.extract_strided_slice %289 {offsets = [2, 0], sizes = [1, 32], strides = [1, 1]} : vector<8x128xf32> to vector<1x32xf32>
    %295 = vector.shape_cast %294 : vector<1x32xf32> to vector<1x1x32xf32>
    %296 = vector.extract_strided_slice %289 {offsets = [3, 0], sizes = [1, 32], strides = [1, 1]} : vector<8x128xf32> to vector<1x32xf32>
    %297 = vector.shape_cast %296 : vector<1x32xf32> to vector<1x1x32xf32>
    %298 = vector.extract_strided_slice %289 {offsets = [4, 0], sizes = [1, 128], strides = [1, 1]} : vector<8x128xf32> to vector<1x128xf32>
    %299 = vector.shape_cast %298 : vector<1x128xf32> to vector<1x1x128xf32>
    %300 = vector.extract_strided_slice %289 {offsets = [5, 0], sizes = [1, 32], strides = [1, 1]} : vector<8x128xf32> to vector<1x32xf32>
    %301 = vector.shape_cast %300 : vector<1x32xf32> to vector<1x1x32xf32>
    %302 = vector.extract_strided_slice %289 {offsets = [6, 0], sizes = [1, 32], strides = [1, 1]} : vector<8x128xf32> to vector<1x32xf32>
    %303 = vector.shape_cast %302 : vector<1x32xf32> to vector<1x1x32xf32>
    %304 = vector.extract_strided_slice %289 {offsets = [7, 0], sizes = [1, 32], strides = [1, 1]} : vector<8x128xf32> to vector<1x32xf32>
    %305 = vector.shape_cast %304 : vector<1x32xf32> to vector<1x1x32xf32>
    %306 = vector.shape_cast %279 : vector<4x4x32xf32> to vector<16x32xf32>
    %cst_103 = arith.constant dense<0.000000e+00> : vector<16x96xf32>
    %307 = tpu.matmul %306, %281, %cst_103 {dimension_numbers = #tpu.dot_dimension_numbers<[1], [0], [0], [1], [0, 0, 1, 1], [], []>} : vector<16x32xf32>, vector<32x96xf32>, vector<16x96xf32> -> vector<16x96xf32>
    %308 = vector.shape_cast %307 : vector<16x96xf32> to vector<4x4x96xf32>
    %309 = vector.broadcast %291 : vector<1x1x96xf32> to vector<4x4x96xf32>
    %310 = arith.addf %308, %309 : vector<4x4x96xf32>
    %311 = vector.extract_strided_slice %310 {offsets = [0, 0, 0], sizes = [4, 4, 16], strides = [1, 1, 1]} : vector<4x4x96xf32> to vector<4x4x16xf32>
    %312 = vector.extract_strided_slice %310 {offsets = [0, 0, 32], sizes = [4, 4, 16], strides = [1, 1, 1]} : vector<4x4x96xf32> to vector<4x4x16xf32>
    %313 = vector.extract_strided_slice %310 {offsets = [0, 0, 64], sizes = [4, 4, 16], strides = [1, 1, 1]} : vector<4x4x96xf32> to vector<4x4x16xf32>
    "tpu.trace_start"() <{level = 10 : i32, message = "bqd,bkd->bqk"}> : () -> ()
    %cst_104 = arith.constant dense<0.000000e+00> : vector<4x4x4xf32>
    %314 = tpu.matmul %311, %312, %cst_104 {dimension_numbers = #tpu.dot_dimension_numbers<[2], [2], [1], [1], [0, 0, 0, 1, 1, 1], [0], [0]>} : vector<4x4x16xf32>, vector<4x4x16xf32>, vector<4x4x4xf32> -> vector<4x4x4xf32>
    "tpu.trace_stop"() : () -> ()
    %cst_105 = arith.constant 2.500000e-01 : f32
    %315 = vector.broadcast %cst_105 : f32 to vector<4x4x4xf32>
    %316 = arith.mulf %314, %315 : vector<4x4x4xf32>
    %cst_106 = arith.constant dense<0xFF800000> : vector<4x4xf32>
    %317 = vector.multi_reduction <maximumf>, %316, %cst_106 [2] : vector<4x4x4xf32> to vector<4x4xf32>
    %318 = vector.shape_cast %317 : vector<4x4xf32> to vector<4x4x1xf32>
    %319 = vector.broadcast %318 : vector<4x4x1xf32> to vector<4x4x4xf32>
    %320 = arith.subf %316, %319 : vector<4x4x4xf32>
    %321 = math.exp %320 : vector<4x4x4xf32>
    %cst_107 = arith.constant dense<0.000000e+00> : vector<4x4xf32>
    %322 = vector.multi_reduction <add>, %321, %cst_107 [2] : vector<4x4x4xf32> to vector<4x4xf32>
    %323 = vector.shape_cast %322 : vector<4x4xf32> to vector<4x4x1xf32>
    %324 = tpu.reciprocal %323 {approx = true} : vector<4x4x1xf32> -> vector<4x4x1xf32>
    %325 = vector.broadcast %324 : vector<4x4x1xf32> to vector<4x4x4xf32>
    %326 = arith.mulf %321, %325 : vector<4x4x4xf32>
    "tpu.trace_start"() <{level = 10 : i32, message = "bqk,bkd->bqd"}> : () -> ()
    %cst_108 = arith.constant dense<0.000000e+00> : vector<4x4x16xf32>
    %327 = tpu.matmul %326, %313, %cst_108 {dimension_numbers = #tpu.dot_dimension_numbers<[2], [1], [1], [2], [0, 0, 0, 1, 1, 2], [0], [0]>} : vector<4x4x4xf32>, vector<4x4x16xf32>, vector<4x4x16xf32> -> vector<4x4x16xf32>
    "tpu.trace_stop"() : () -> ()
    %328 = vector.extract_strided_slice %283 {offsets = [0, 0], sizes = [16, 32], strides = [1, 1]} : vector<32x32xf32> to vector<16x32xf32>
    %329 = vector.shape_cast %327 : vector<4x4x16xf32> to vector<16x16xf32>
    %cst_109 = arith.constant dense<0.000000e+00> : vector<16x32xf32>
    %330 = tpu.matmul %329, %328, %cst_109 {dimension_numbers = #tpu.dot_dimension_numbers<[1], [0], [0], [1], [0, 0, 1, 1], [], []>} : vector<16x16xf32>, vector<16x32xf32>, vector<16x32xf32> -> vector<16x32xf32>
    %331 = vector.shape_cast %330 : vector<16x32xf32> to vector<4x4x32xf32>
    %332 = vector.extract_strided_slice %310 {offsets = [0, 0, 16], sizes = [4, 4, 16], strides = [1, 1, 1]} : vector<4x4x96xf32> to vector<4x4x16xf32>
    %333 = vector.extract_strided_slice %310 {offsets = [0, 0, 48], sizes = [4, 4, 16], strides = [1, 1, 1]} : vector<4x4x96xf32> to vector<4x4x16xf32>
    %334 = vector.extract_strided_slice %310 {offsets = [0, 0, 80], sizes = [4, 4, 16], strides = [1, 1, 1]} : vector<4x4x96xf32> to vector<4x4x16xf32>
    "tpu.trace_start"() <{level = 10 : i32, message = "bqd,bkd->bqk"}> : () -> ()
    %cst_110 = arith.constant dense<0.000000e+00> : vector<4x4x4xf32>
    %335 = tpu.matmul %332, %333, %cst_110 {dimension_numbers = #tpu.dot_dimension_numbers<[2], [2], [1], [1], [0, 0, 0, 1, 1, 1], [0], [0]>} : vector<4x4x16xf32>, vector<4x4x16xf32>, vector<4x4x4xf32> -> vector<4x4x4xf32>
    "tpu.trace_stop"() : () -> ()
    %cst_111 = arith.constant 2.500000e-01 : f32
    %336 = vector.broadcast %cst_111 : f32 to vector<4x4x4xf32>
    %337 = arith.mulf %335, %336 : vector<4x4x4xf32>
    %cst_112 = arith.constant dense<0xFF800000> : vector<4x4xf32>
    %338 = vector.multi_reduction <maximumf>, %337, %cst_112 [2] : vector<4x4x4xf32> to vector<4x4xf32>
    %339 = vector.shape_cast %338 : vector<4x4xf32> to vector<4x4x1xf32>
    %340 = vector.broadcast %339 : vector<4x4x1xf32> to vector<4x4x4xf32>
    %341 = arith.subf %337, %340 : vector<4x4x4xf32>
    %342 = math.exp %341 : vector<4x4x4xf32>
    %cst_113 = arith.constant dense<0.000000e+00> : vector<4x4xf32>
    %343 = vector.multi_reduction <add>, %342, %cst_113 [2] : vector<4x4x4xf32> to vector<4x4xf32>
    %344 = vector.shape_cast %343 : vector<4x4xf32> to vector<4x4x1xf32>
    %345 = tpu.reciprocal %344 {approx = true} : vector<4x4x1xf32> -> vector<4x4x1xf32>
    %346 = vector.broadcast %345 : vector<4x4x1xf32> to vector<4x4x4xf32>
    %347 = arith.mulf %342, %346 : vector<4x4x4xf32>
    "tpu.trace_start"() <{level = 10 : i32, message = "bqk,bkd->bqd"}> : () -> ()
    %cst_114 = arith.constant dense<0.000000e+00> : vector<4x4x16xf32>
    %348 = tpu.matmul %347, %334, %cst_114 {dimension_numbers = #tpu.dot_dimension_numbers<[2], [1], [1], [2], [0, 0, 0, 1, 1, 2], [0], [0]>} : vector<4x4x4xf32>, vector<4x4x16xf32>, vector<4x4x16xf32> -> vector<4x4x16xf32>
    "tpu.trace_stop"() : () -> ()
    %349 = vector.extract_strided_slice %283 {offsets = [16, 0], sizes = [16, 32], strides = [1, 1]} : vector<32x32xf32> to vector<16x32xf32>
    %350 = vector.shape_cast %348 : vector<4x4x16xf32> to vector<16x16xf32>
    %cst_115 = arith.constant dense<0.000000e+00> : vector<16x32xf32>
    %351 = tpu.matmul %350, %349, %cst_115 {dimension_numbers = #tpu.dot_dimension_numbers<[1], [0], [0], [1], [0, 0, 1, 1], [], []>} : vector<16x16xf32>, vector<16x32xf32>, vector<16x32xf32> -> vector<16x32xf32>
    %352 = vector.shape_cast %351 : vector<16x32xf32> to vector<4x4x32xf32>
    %353 = arith.addf %331, %352 : vector<4x4x32xf32>
    %354 = vector.broadcast %293 : vector<1x1x32xf32> to vector<4x4x32xf32>
    %355 = arith.addf %353, %354 : vector<4x4x32xf32>
    %356 = arith.addf %279, %355 : vector<4x4x32xf32>
    %cst_116 = arith.constant dense<0.000000e+00> : vector<4x4xf32>
    %357 = vector.multi_reduction <add>, %356, %cst_116 [2] : vector<4x4x32xf32> to vector<4x4xf32>
    %358 = vector.shape_cast %357 : vector<4x4xf32> to vector<4x4x1xf32>
    %cst_117 = arith.constant 3.200000e+01 : f32
    %359 = vector.broadcast %cst_117 : f32 to vector<4x4x1xf32>
    %360 = arith.divf %358, %359 : vector<4x4x1xf32>
    %361 = vector.broadcast %360 : vector<4x4x1xf32> to vector<4x4x32xf32>
    %362 = arith.subf %356, %361 : vector<4x4x32xf32>
    %363 = arith.mulf %362, %362 : vector<4x4x32xf32>
    %cst_118 = arith.constant dense<0.000000e+00> : vector<4x4xf32>
    %364 = vector.multi_reduction <add>, %363, %cst_118 [2] : vector<4x4x32xf32> to vector<4x4xf32>
    %365 = vector.shape_cast %364 : vector<4x4xf32> to vector<4x4x1xf32>
    %cst_119 = arith.constant 3.200000e+01 : f32
    %366 = vector.broadcast %cst_119 : f32 to vector<4x4x1xf32>
    %367 = arith.divf %365, %366 : vector<4x4x1xf32>
    %368 = vector.broadcast %360 : vector<4x4x1xf32> to vector<4x4x32xf32>
    %369 = arith.subf %356, %368 : vector<4x4x32xf32>
    %cst_120 = arith.constant 9.99999974E-6 : f32
    %370 = vector.broadcast %cst_120 : f32 to vector<4x4x1xf32>
    %371 = arith.addf %367, %370 : vector<4x4x1xf32>
    %372 = math.rsqrt %371 : vector<4x4x1xf32>
    %373 = vector.broadcast %372 : vector<4x4x1xf32> to vector<4x4x32xf32>
    %374 = arith.mulf %369, %373 : vector<4x4x32xf32>
    %375 = vector.broadcast %295 : vector<1x1x32xf32> to vector<4x4x32xf32>
    %376 = arith.mulf %374, %375 : vector<4x4x32xf32>
    %377 = vector.broadcast %297 : vector<1x1x32xf32> to vector<4x4x32xf32>
    %378 = arith.addf %376, %377 : vector<4x4x32xf32>
    %379 = vector.shape_cast %378 : vector<4x4x32xf32> to vector<16x32xf32>
    %cst_121 = arith.constant dense<0.000000e+00> : vector<16x128xf32>
    %380 = tpu.matmul %379, %285, %cst_121 {dimension_numbers = #tpu.dot_dimension_numbers<[1], [0], [0], [1], [0, 0, 1, 1], [], []>} : vector<16x32xf32>, vector<32x128xf32>, vector<16x128xf32> -> vector<16x128xf32>
    %381 = vector.shape_cast %380 : vector<16x128xf32> to vector<4x4x128xf32>
    %382 = vector.broadcast %299 : vector<1x1x128xf32> to vector<4x4x128xf32>
    %383 = arith.addf %381, %382 : vector<4x4x128xf32>
    %cst_122 = arith.constant 0.000000e+00 : f32
    %384 = vector.broadcast %cst_122 : f32 to vector<4x4x128xf32>
    %385 = arith.maximumf %383, %384 : vector<4x4x128xf32>
    %386 = vector.shape_cast %385 : vector<4x4x128xf32> to vector<16x128xf32>
    %cst_123 = arith.constant dense<0.000000e+00> : vector<16x32xf32>
    %387 = tpu.matmul %386, %287, %cst_123 {dimension_numbers = #tpu.dot_dimension_numbers<[1], [0], [0], [1], [0, 0, 1, 1], [], []>} : vector<16x128xf32>, vector<128x32xf32>, vector<16x32xf32> -> vector<16x32xf32>
    %388 = vector.shape_cast %387 : vector<16x32xf32> to vector<4x4x32xf32>
    %389 = vector.broadcast %301 : vector<1x1x32xf32> to vector<4x4x32xf32>
    %390 = arith.addf %388, %389 : vector<4x4x32xf32>
    %391 = arith.addf %378, %390 : vector<4x4x32xf32>
    %cst_124 = arith.constant dense<0.000000e+00> : vector<4x4xf32>
    %392 = vector.multi_reduction <add>, %391, %cst_124 [2] : vector<4x4x32xf32> to vector<4x4xf32>
    %393 = vector.shape_cast %392 : vector<4x4xf32> to vector<4x4x1xf32>
    %cst_125 = arith.constant 3.200000e+01 : f32
    %394 = vector.broadcast %cst_125 : f32 to vector<4x4x1xf32>
    %395 = arith.divf %393, %394 : vector<4x4x1xf32>
    %396 = vector.broadcast %395 : vector<4x4x1xf32> to vector<4x4x32xf32>
    %397 = arith.subf %391, %396 : vector<4x4x32xf32>
    %398 = arith.mulf %397, %397 : vector<4x4x32xf32>
    %cst_126 = arith.constant dense<0.000000e+00> : vector<4x4xf32>
    %399 = vector.multi_reduction <add>, %398, %cst_126 [2] : vector<4x4x32xf32> to vector<4x4xf32>
    %400 = vector.shape_cast %399 : vector<4x4xf32> to vector<4x4x1xf32>
    %cst_127 = arith.constant 3.200000e+01 : f32
    %401 = vector.broadcast %cst_127 : f32 to vector<4x4x1xf32>
    %402 = arith.divf %400, %401 : vector<4x4x1xf32>
    %403 = vector.broadcast %395 : vector<4x4x1xf32> to vector<4x4x32xf32>
    %404 = arith.subf %391, %403 : vector<4x4x32xf32>
    %cst_128 = arith.constant 9.99999974E-6 : f32
    %405 = vector.broadcast %cst_128 : f32 to vector<4x4x1xf32>
    %406 = arith.addf %402, %405 : vector<4x4x1xf32>
    %407 = math.rsqrt %406 : vector<4x4x1xf32>
    %408 = vector.broadcast %407 : vector<4x4x1xf32> to vector<4x4x32xf32>
    %409 = arith.mulf %404, %408 : vector<4x4x32xf32>
    %410 = vector.broadcast %303 : vector<1x1x32xf32> to vector<4x4x32xf32>
    %411 = arith.mulf %409, %410 : vector<4x4x32xf32>
    %412 = vector.broadcast %305 : vector<1x1x32xf32> to vector<4x4x32xf32>
    %413 = arith.addf %411, %412 : vector<4x4x32xf32>
    %c0_129 = arith.constant 0 : index
    %c0_130 = arith.constant 0 : index
    %c0_131 = arith.constant 0 : index
    %414 = vector.load %arg8[%c0_129, %c0_130, %c0_131] : memref<4x4x32xf32, #tpu.memory_space<vmem>>, vector<4x4x32xf32>
    tpu.vector_store %arg8[%c0_129, %c0_130, %c0_131], %413 {strides = array<i32>} : memref<4x4x32xf32, #tpu.memory_space<vmem>>, vector<4x4x32xf32>,
    return
  }
}

</mosaic_0001>

<bundles_post_ra>
// kernel: tpu_custom_call.1
= control target key start
LH: loop header
LB: loop body
LE: loop exit
PB: predicated region body
PF: predicated region fallthrough
CT: control target
= control target key end

     0   :  { %vm85_vm0 = vcmask 261120   ;;  %s8992_s0 = inlined_call_operand.vmem [shape: f32[4,4,32], index: 0, kind: input, shape index: {}]   ;;  %s8993_s1 = inlined_call_operand.vmem [shape: f32[4,20,32], index: 1, kind: input, shape index: {}]   ;;  %s8994_s2 = inlined_call_operand.vmem [shape: f32[4,1,20], index: 2, kind: input, shape index: {}]   ;;  %s8995_s3 = inlined_call_operand.vmem [shape: f32[3,32,96], index: 3, kind: input, shape index: {}]   ;;  %s8996_s4 = inlined_call_operand.vmem [shape: f32[3,32,32], index: 4, kind: input, shape index: {}]   ;;  %s8997_s5 = inlined_call_operand.vmem [shape: f32[3,32,128], index: 5, kind: input, shape index: {}]   ;;  %s8998_s6 = inlined_call_operand.vmem [shape: f32[3,128,32], index: 6, kind: input, shape index: {}]   ;;  %s8999_s7 = inlined_call_operand.vmem [shape: f32[3,8,128], index: 7, kind: input, shape index: {}]   ;;  %s9000_s8 = inlined_call_operand.hbm [shape: f32[4,4,32], index: 8, kind: output, shape index: {}]  }
   0x1   :  { %v53_v0 = vld [vmem:[%s8995_s3 + $0x18] sm:$0xff]  ;;  %v52_v1 = vld [vmem:[%s8995_s3 + $0x10] sm:$0xff]  ;;  %v34_v2 = vld [vmem:[%s8993_s1] sm:$0xff] }
   0x2   :  { %6948 = vmatprep.subr.mxu1 %v53_v0  ;;  %v35_v3 = vld [vmem:[%s8993_s1 + $0x8] sm:$0xff]  ;;  %6937 = vmatprep.subr.mxu0 %v53_v0  ;;  %v191_v5 = vcombine.high %v34_v2, %v34_v2  ;;  %v37_v7 = vld [vmem:[%s8993_s1 + $0x18] sm:$0xff]  ;;  %v36_v8 = vld [vmem:[%s8993_s1 + $0x10] sm:$0xf] }
   0x3   :  { %6949 = vmatpush3.msra.mxu1 %v53_v0  ;;  %v51_v4 = vld [vmem:[%s8995_s3 + $0x8] sm:$0xff]  ;;  %v192_v6 = vcombine.high %v35_v3, %v35_v3  ;;  %6938 = vmatpush3.msra.mxu0 %v53_v0  ;;  %v38_v9 = vld [vmem:[%s8993_s1 + $0x20] sm:$0xff]  ;;  %v193_v13 = vcombine.high %v37_v7, %v37_v7  ;;  %v201_v16 = vcombine.low %v36_v8, %v37_v7  ;;  %v40_v18 = vld [vmem:[%s8993_s1 + $0x30] sm:$0xff] }
   0x4   :  { %6950 = vmatprep.subr.mxu1 %v52_v1  ;;  %6939 = vmatprep.subr.mxu0 %v52_v1  ;;  %v50_v10 = vld [vmem:[%s8995_s3] sm:$0xff]  ;;  %v199_v11 = vcombine.low %v34_v2, %v191_v5  ;;  %v194_v17 = vcombine.high %v38_v9, %v38_v9  ;;  %v32_v19 = vld [vmem:[%s8992_s0 + $0x8] sm:$0xf]  ;;  %v33_v20 = vld [vmem:[%s8992_s0 + $0xc] sm:$0xf] }
   0x5   :  { %6951 = vmatpush3.msra.mxu1 %v52_v1  ;;  %v200_v12 = vcombine.low %v35_v3, %v192_v6  ;;  %v30_v14 = vld [vmem:[%s8992_s0] sm:$0xf]  ;;  %v31_v15 = vld [vmem:[%s8992_s0 + $0x4] sm:$0xf]  ;;  %v39_v21 = vld [vmem:[%s8993_s1 + $0x28] sm:$0xf]  ;;  %6940 = vmatpush3.msra.mxu0 %v52_v1 }
   0x6   :  { %6952 = vmatprep.subr.mxu1 %v51_v4  ;;  %6956 = vmatprep.mubr.msk.f32.mxu1 %vm85_vm0, %v199_v11  ;;  %v41_v22 = vld [vmem:[%s8993_s1 + $0x38] sm:$0xff]  ;;  %v83_v23 = vcombine.low %v30_v14, %v31_v15 }
   0x7   :  { %6953 = vmatpush3.msra.mxu1 %v51_v4 }
   0x8   :  { %6954 = vmatprep.subr.mxu1 %v50_v10 }
   0x9   :  { %13 = vsyncpa [#allocation3], 0  ;;  %6955 = vmatpush3.msra.mxu1 %v50_v10  ;;  %6941 = vmatprep.subr.mxu0 %v51_v4  ;;  %v84_v24 = vcombine.low %v32_v19, %v33_v20  ;;  %v202_v25 = vcombine.low %v193_v13, %v38_v9  ;;  %v195_v26 = vcombine.high %v40_v18, %v40_v18  ;;  %v43_v29 = vld [vmem:[%s8993_s1 + $0x48] sm:$0xff]  ;;  %v42_v32 = vld [vmem:[%s8993_s1 + $0x40] sm:$0xf]  ;;  %v7670_v40 = vmov 0.0  }
   0xa   :  { %6957 = vmatmul.mubr.msk.f32.vlgmr.msra.gmra.mxu1 %vm85_vm0, %v200_v12  ;;  %6942 = vmatpush3.msra.mxu0 %v51_v4  ;;  %v203_v27 = vcombine.low %v194_v17, %v39_v21  ;;  %v196_v28 = vcombine.high %v41_v22, %v41_v22  ;;  %v44_v33 = vld [vmem:[%s8993_s1 + $0x50] sm:$0xff]  ;;  %v197_v34 = vcombine.high %v43_v29, %v43_v29  ;;  %v45_v38 = vld [vmem:[%s8993_s1 + $0x58] sm:$0xf]  ;;  %v171_v41 = vlaneseq  ;;  %v7806_v44 = vld [vmem:[%s8999_s7] sm:$0xff]  ;;  %s7672_s24 = smov 96   ;;  %s7673_s11 = smov 64  }
   0xb   :  { %6959 = vmatprep.mubr.msk.f32.mxu1 %vm85_vm0, %v201_v16  ;;  %6943 = vmatprep.subr.mxu0 %v50_v10  ;;  %v204_v30 = vcombine.low %v40_v18, %v195_v26  ;;  %v206_v35 = vcombine.low %v42_v32, %v43_v29  ;;  %v198_v36 = vcombine.high %v44_v33, %v44_v33  ;;  %vm7671_vm1 = vmmov 0   ;;  %s7675_s12 = smov 112   ;;  %s7676_s17 = smov 48  }
   0xc   :  { %6944 = vmatpush3.msra.mxu0 %v50_v10  ;;  %6945 = vmatprep.mubr.msk.f32.mxu0 %vm85_vm0, %v83_v23  ;;  %v205_v31 = vcombine.low %v41_v22, %v196_v28  ;;  %v207_v37 = vcombine.low %v197_v34, %v44_v33  ;;  %v7798_v42 = vshrl.u32 %v171_v41, 7  ;;  %vm410_vm2 = vcmask 130048  }
   0xd   :  { %6946 = vmatmul.mubr.msk.f32.vlgmr.msra.gmra.mxu0 %vm85_vm0, %v84_v24  ;;  %v208_v39 = vcombine.low %v198_v36, %v45_v38  ;;  %6971 = vmatprep.subr.mxu1 %v7670_v40  ;;  %vm798_vm3 = vcmask 158720   ;;  %vm855_vm4 = vcmask 1043456   ;;  %vm851_vm5 = vcmask 162816  }
   0xe   :  { %6960 = vmatmul.mubr.msk.f32.gmra.mxu1 %vm85_vm0, %v202_v25  ;;  %6989 = vmatprep.subr.mxu0 %v7670_v40  ;;  %v7801_v43 = vsub.s32 0, %v7798_v42  ;;  %vm2103_vm6 = vcmask 257024   ;;  %vm2890_vm7 = vcmask 27648   ;;  %vm2937_vm8 = vcmask 31744  }
   0xf   :  { %6962 = vmatprep.mubr.msk.f32.mxu1 %vm85_vm0, %v203_v27  ;;  %6995 = vmatprep.mubr.msk.f32.mxu0 %vm7671_vm1, %v7670_v40 }
  0x10   :  { %v7810_v45 = vrot.slane %v7806_v44, %v7801_v43 }
  0x12   :  { %6963 = vmatmul.mubr.msk.f32.gmra.mxu1 %vm85_vm0, %v204_v30  ;;  %v375_v49 = vcombine.high %v7810_v45, %v7810_v45 }
  0x13   :  { %6965 = vmatprep.mubr.msk.f32.mxu1 %vm85_vm0, %v205_v31 }
  0x16   :  { %6966 = vmatmul.mubr.msk.f32.gmra.mxu1 %vm85_vm0, %v206_v35 }
  0x17   :  { %6968 = vmatprep.mubr.msk.f32.mxu1 %vm85_vm0, %v207_v37 }
  0x1a   :  { %6969 = vmatmul.mubr.msk.f32.gmra.mxu1 %vm85_vm0, %v208_v39 }
  0x1b   :  { %6977 = vmatprep.mubr.msk.f32.mxu1 %vm7671_vm1, %v7670_v40 }
  0xca   :  { %v6958_v46 = vpop.f32.mrf.mxu1 }
  0xcb   :  { %v355_v48 = vcombine.high %v6958_v46, %v6958_v46  ;;  %v379_v60 = vadd.f32 %v6958_v46, %v7810_v45 }
  0xcc   :  { %v295_v47 = vpop.f32.mrf.mxu1 }
  0xcd   :  { %v354_v50 = vcombine.high %v295_v47, %v295_v47  ;;  %v377_v52 = vadd.f32 %v295_v47, %v7810_v45  ;;  %v380_v55 = vadd.f32 %v375_v49, %v355_v48  ;;  %v6947_v32 = vpop.f32.mrf.mxu0 }
  0xce   :  { %v6961_v51 = vpop.f32.mrf.mxu1 }
  0xcf   :  { %v378_v53 = vadd.f32 %v375_v49, %v354_v50  ;;  %v357_v61 = vcombine.high %v6961_v51, %v6961_v51  ;;  %v7829_v63 = vcombine.low %v379_v60, %v380_v55  ;;  %v383_v6 = vadd.f32 %v6961_v51, %v375_v49  ;;  %v156_v35 = vpop.f32.mrf.mxu0 }
  0xd0   :  { %v305_v54 = vpop.f32.mrf.mxu1  ;;  %v7883_v38 = vadd.f32 %v7810_v45, %v156_v35  ;;  %v167_v47 = vcombine.high %v156_v35, %v156_v35  ;;  %v7902_v50 = vadd.f32 %v6947_v32, %v7810_v45 }
  0xd1   :  { %v7815_v56 = vcombine.low %v377_v52, %v378_v53  ;;  %v7818_v57 = vadd.f32 %v305_v54, %v7810_v45  ;;  %v356_v58 = vcombine.high %v305_v54, %v305_v54  ;;  %v384_v4 = vadd.f32 %v357_v61, %v7810_v45 }
  0xd2   :  { %v6964_v59 = vpop.f32.mrf.mxu1  ;;  %v7905_v51 = vadd.f32 %v7810_v45, %v167_v47  ;;  %v168_v53 = vcombine.high %v6947_v32, %v6947_v32 }
  0xd3   :  { %404 = vrot.lane.b32.xlu1 %v7815_v56, %s7672_s24  ;;  %408 = vrot.lane.b32.xlu0 %v7818_v57, %s7672_s24  ;;  %v382_v2 = vadd.f32 %v356_v58, %v7810_v45  ;;  %v359_v16 = vcombine.high %v6964_v59, %v6964_v59  ;;  %v387_v24 = vadd.f32 %v6964_v59, %v7810_v45  ;;  %v7933_v59 = vld [vmem:[%s8994_s2] ss:$0 sm:$0xff] }
  0xd4   :  { %v315_v62 = vpop.f32.mrf.mxu1  ;;  %v7923_v55 = vadd.f32 %v7810_v45, %v168_v53 }
  0xd5   :  { %v358_v0 = vcombine.high %v315_v62, %v315_v62  ;;  %v385_v1 = vadd.f32 %v375_v49, %v315_v62  ;;  %v7842_v10 = vcombine.low %v382_v2, %v383_v6  ;;  %v388_v25 = vadd.f32 %v375_v49, %v359_v16  ;;  %v7940_v2 = vld [vmem:[%s8994_s2 + $0x2] ss:$0 sm:$0xff] }
  0xd6   :  { %v6967_v3 = vpop.f32.mrf.mxu1 }
  0xd7   :  { %v7834_v5 = vadd.f32 %v358_v0, %v7810_v45  ;;  %406 = vrot.lane.b32.xlu0 %v7829_v63, %s7672_s24  ;;  %v7838_v8 = vcombine.low %v384_v4, %v385_v1  ;;  %v7845_v12 = vadd.f32 %v6967_v3, %v7810_v45  ;;  %v361_v18 = vcombine.high %v6967_v3, %v6967_v3  ;;  %v7945_v3 = vld [vmem:[%s8994_s2 + $0x1] ss:$0 sm:$0xff] }
  0xd8   :  { %v325_v7 = vpop.f32.mrf.mxu1  ;;  %v7868_v29 = vcombine.low %v387_v24, %v388_v25 }
  0xd9   :  { %501 = vrot.lane.b32.xlu1 %v7834_v5, %s7672_s24  ;;  %v360_v9 = vcombine.high %v325_v7, %v325_v7  ;;  %v389_v13 = vadd.f32 %v325_v7, %v7810_v45  ;;  %v392_v26 = vadd.f32 %v361_v18, %v7810_v45 }
  0xda   :  { %v6970_v11 = vpop.f32.mrf.mxu1 }
  0xdb   :  { %499 = vrot.lane.b32.xlu0 %v7838_v8, %s7672_s24  ;;  %v390_v14 = vadd.f32 %v375_v49, %v360_v9  ;;  %v363_v15 = vcombine.high %v6970_v11, %v6970_v11  ;;  %v395_v19 = vadd.f32 %v6970_v11, %v375_v49 }
  0xdc   :  { %v335_v17 = vpop.f32.mrf.mxu1 }
  0xdd   :  { %497 = vrot.lane.b32.xlu1 %v7842_v10, %s7672_s24  ;;  %v7853_v20 = vadd.f32 %v363_v15, %v7810_v45  ;;  %v362_v21 = vcombine.high %v335_v17, %v335_v17  ;;  %v7855_v22 = vcombine.low %v389_v13, %v390_v14  ;;  %v393_v27 = vadd.f32 %v375_v49, %v335_v17  ;;  %v7954_v17 = vld [vmem:[%s8994_s2 + $0x3] ss:$0 sm:$0xff]  ;;  %s7674_s2 = smov 80  }
  0xdf   :  { %593 = vrot.lane.b32.xlu0 %v7845_v12, %s7672_s24  ;;  %v394_v23 = vadd.f32 %v362_v21, %v7810_v45  ;;  %v7870_v30 = vcombine.low %v392_v26, %v393_v27 }
  0xe1   :  { %v7862_v28 = vcombine.low %v394_v23, %v395_v19  ;;  %685 = vrot.lane.b32.xlu1 %v7853_v20, %s7672_s24 }
  0xe3   :  { %591 = vrot.lane.b32.xlu0 %v7855_v22, %s7672_s24 }
  0xe5   :  { %683 = vrot.lane.b32.xlu1 %v7862_v28, %s7672_s24 }
  0xe7   :  { %589 = vrot.lane.b32.xlu0 %v7868_v29, %s7672_s24 }
  0xe9   :  { %681 = vrot.lane.b32.xlu1 %v7870_v30, %s7672_s24 }
 0x145   :  { %v409_v31 = vpop.permute.xlu0 %408  ;;  %v405_v33 = vpop.permute.xlu1 %404 }
 0x146   :  { %6972 = vmatpush3.xpose.msk.msra.mxu1 %vm410_vm2, %v409_v31 }
 0x147   :  { %6973 = vmatprep.subr.mxu1 %v7670_v40 }
 0x149   :  { %v407_v34 = vpop.permute.xlu0 %406 }
 0x14a   :  { %6974 = vmatpush3.xpose.msk.msra.mxu1 %vm410_vm2, %v407_v34 }
 0x14b   :  { %6975 = vmatprep.subr.mxu1 %v7670_v40  ;;  %v502_v36 = vpop.permute.xlu1 %501 }
 0x14d   :  { %v500_v37 = vpop.permute.xlu0 %499 }
 0x14e   :  { %6976 = vmatpush3.xpose.msk.msra.mxu1 %vm410_vm2, %v405_v33 }
 0x14f   :  { %6980 = vmatprep.subr.mxu1 %v7670_v40  ;;  %v498_v41 = vpop.permute.xlu1 %497 }
 0x151   :  { %v594_v39 = vpop.permute.xlu0 %593  ;;  %6978 = vmatmul.mubr.msk.f32.vlgmr.msra.gmra.mxu1 %vm410_vm2, %v7883_v38 }
 0x152   :  { %6981 = vmatpush3.xpose.msk.msra.mxu1 %vm410_vm2, %v502_v36  ;;  %6990 = vmatpush3.xpose.msk.msra.mxu0 %vm410_vm2, %v594_v39 }
 0x153   :  { %6982 = vmatprep.subr.mxu1 %v7670_v40  ;;  %6991 = vmatprep.subr.mxu0 %v7670_v40  ;;  %v686_v49 = vpop.permute.xlu1 %685 }
 0x154   :  { %6986 = vmatprep.mubr.msk.f32.mxu1 %vm7671_vm1, %v7670_v40 }
 0x155   :  { %v592_v46 = vpop.permute.xlu0 %591 }
 0x156   :  { %6983 = vmatpush3.xpose.msk.msra.mxu1 %vm410_vm2, %v500_v37  ;;  %6992 = vmatpush3.xpose.msk.msra.mxu0 %vm410_vm2, %v592_v46 }
 0x157   :  { %6984 = vmatprep.subr.mxu1 %v7670_v40  ;;  %6993 = vmatprep.subr.mxu0 %v7670_v40  ;;  %v684_v52 = vpop.permute.xlu1 %683 }
 0x159   :  { %v590_v48 = vpop.permute.xlu0 %589 }
 0x15a   :  { %6985 = vmatpush3.xpose.msk.msra.mxu1 %vm410_vm2, %v498_v41  ;;  %6994 = vmatpush3.xpose.msk.msra.mxu0 %vm410_vm2, %v590_v48 }
 0x15b   :  { %6998 = vmatprep.subr.mxu1 %v7670_v40  ;;  %7007 = vmatprep.subr.mxu0 %v7670_v40  ;;  %v682_v54 = vpop.permute.xlu1 %681 }
 0x15d   :  { %6987 = vmatmul.mubr.msk.f32.vlgmr.msra.gmra.mxu1 %vm410_vm2, %v7905_v51  ;;  %6996 = vmatmul.mubr.msk.f32.vlgmr.msra.gmra.mxu0 %vm410_vm2, %v7902_v50 }
 0x15e   :  { %6999 = vmatpush3.xpose.msk.msra.mxu1 %vm410_vm2, %v686_v49  ;;  %7004 = vmatprep.mubr.msk.f32.mxu1 %vm7671_vm1, %v7670_v40 }
 0x15f   :  { %7000 = vmatprep.subr.mxu1 %v7670_v40  ;;  %7013 = vmatprep.mubr.msk.f32.mxu0 %vm7671_vm1, %v7670_v40 }
 0x162   :  { %7001 = vmatpush3.xpose.msk.msra.mxu1 %vm410_vm2, %v684_v52 }
 0x163   :  { %7002 = vmatprep.subr.mxu1 %v7670_v40 }
 0x166   :  { %7003 = vmatpush3.xpose.msk.msra.mxu1 %vm410_vm2, %v682_v54 }
 0x167   :  { %7025 = vmatprep.subr.mxu1 %v7670_v40 }
 0x169   :  { %7005 = vmatmul.mubr.msk.f32.vlgmr.msra.gmra.mxu1 %vm410_vm2, %v7923_v55 }
 0x16a   :  { %7031 = vmatprep.mubr.msk.f32.mxu1 %vm7671_vm1, %v7670_v40 }
 0x211   :  { %v486_v58 = vpop.f32.mrf.mxu1 }
 0x212   :  { %v766_v60 = vmul.f32 0.25, %v486_v58 }
 0x213   :  { %v6979_v61 = vpop.f32.mrf.mxu1 }
 0x214   :  { %v794_v45 = vadd.f32 %v7933_v59, %v766_v60 }
 0x216   :  { %v799_v62 = vsel %vm798_vm3, %v794_v45, -inf }
 0x217   :  { %800 = vmax.xlane.f32.xlu0 %v799_v62 }
 0x21d   :  { %v578_v0 = vpop.f32.mrf.mxu1  ;;  %v670_v1 = vpop.f32.mrf.mxu0 }
 0x21e   :  { %v767_v4 = vmul.f32 0.25, %v578_v0  ;;  %v768_v6 = vmul.f32 0.25, %v670_v1 }
 0x21f   :  { %v6988_v7 = vpop.f32.mrf.mxu1  ;;  %v6997_v9 = vpop.f32.mrf.mxu0 }
 0x220   :  { %v796_v11 = vadd.f32 %v7940_v2, %v768_v6  ;;  %v795_v13 = vadd.f32 %v7945_v3, %v767_v4 }
 0x222   :  { %v805_v14 = vsel %vm798_vm3, %v796_v11, -inf  ;;  %v802_v15 = vsel %vm798_vm3, %v795_v13, -inf }
 0x223   :  { %806 = vmax.xlane.f32.xlu0 %v805_v14  ;;  %803 = vmax.xlane.f32.xlu1 %v802_v15 }
 0x229   :  { %v762_v16 = vpop.f32.mrf.mxu1 }
 0x22a   :  { %v769_v18 = vmul.f32 0.25, %v762_v16 }
 0x22b   :  { %v7006_v19 = vpop.f32.mrf.mxu1 }
 0x22c   :  { %v797_v21 = vadd.f32 %v7954_v17, %v769_v18 }
 0x22e   :  { %v808_v23 = vsel %vm798_vm3, %v797_v21, -inf }
 0x22f   :  { %809 = vmax.xlane.f32.xlu0 %v808_v23 }
 0x234   :  { %847 = vrot.lane.b32.xlu1 %v7818_v57, %s7673_s11 }
 0x238   :  { %843 = vrot.lane.b32.xlu1 %v7815_v56, %s7673_s11 }
 0x23c   :  { %932 = vrot.lane.b32.xlu1 %v7834_v5, %s7673_s11 }
 0x240   :  { %928 = vrot.lane.b32.xlu1 %v7842_v10, %s7673_s11 }
 0x244   :  { %1098 = vrot.lane.b32.xlu1 %v7853_v20, %s7673_s11 }
 0x245   :  { %845 = vrot.lane.b32.xlu0 %v7829_v63, %s7673_s11 }
 0x248   :  { %1096 = vrot.lane.b32.xlu1 %v7862_v28, %s7673_s11 }
 0x249   :  { %930 = vrot.lane.b32.xlu0 %v7838_v8, %s7673_s11 }
 0x24d   :  { %1015 = vrot.lane.b32.xlu0 %v7845_v12, %s7673_s11 }
 0x251   :  { %1013 = vrot.lane.b32.xlu0 %v7855_v22, %s7673_s11 }
 0x2a0   :  { %v801_v24 = vpop.xlane.xlu0 %800 }
 0x2a1   :  { %v811_v25 = vsub.f32 %v794_v45, %v801_v24 }
 0x2a3   :  { %v815_v26 = vmul.f32 1.442695, %v811_v25 }
 0x2a5   :  { %7498 = vpow2.f32 %v815_v26 }
 0x2ac   :  { %v807_v27 = vpop.xlane.xlu0 %806  ;;  %v804_v31 = vpop.xlane.xlu1 %803 }
 0x2ad   :  { %v813_v32 = vsub.f32 %v796_v11, %v807_v27  ;;  %v812_v33 = vsub.f32 %v795_v13, %v804_v31 }
 0x2af   :  { %v819_v34 = vmul.f32 1.442695, %v813_v32  ;;  %v817_v35 = vmul.f32 1.442695, %v812_v33 }
 0x2b0   :  { %v848_v36 = vpop.permute.xlu1 %847 }
 0x2b1   :  { %7500 = vpow2.f32 %v819_v34  ;;  %7008 = vmatpush3.msk.msra.mxu0 %vm855_vm4, %v848_v36  ;;  %v54_v36 = vld [vmem:[%s8996_s4] sm:$0xff] }
 0x2b2   :  { %v7979_v37 = vpop.eup %7498  ;;  %7502 = vpow2.f32 %v817_v35  ;;  %7009 = vmatprep.subr.mxu0 %v7670_v40  ;;  %v55_v35 = vld [vmem:[%s8996_s4 + $0x8] sm:$0xff] }
 0x2b3   :  { %v823_v39 = vsel %vm798_vm3, %v7979_v37, 0.0 }
 0x2b4   :  { %824 = vadd.xlane.f32.xlu1 %v823_v39  ;;  %v844_v52 = vpop.permute.xlu1 %843 }
 0x2b8   :  { %v810_v41 = vpop.xlane.xlu0 %809 }
 0x2b9   :  { %v814_v46 = vsub.f32 %v797_v21, %v810_v41 }
 0x2bb   :  { %v821_v47 = vmul.f32 1.442695, %v814_v46 }
 0x2bc   :  { %v846_v48 = vpop.permute.xlu0 %845 }
 0x2bd   :  { %7504 = vpow2.f32 %v821_v47  ;;  %7010 = vmatpush3.msra.mxu0 %v846_v48 }
 0x2be   :  { %v7984_v49 = vpop.eup %7500  ;;  %7011 = vmatprep.subr.mxu0 %v7670_v40 }
 0x2bf   :  { %v7987_v53 = vpop.eup %7502  ;;  %7012 = vmatpush3.msra.mxu0 %v844_v52  ;;  %v829_v54 = vsel %vm798_vm3, %v7984_v49, 0.0 }
 0x2c0   :  { %830 = vadd.xlane.f32.xlu1 %v829_v54  ;;  %v826_v58 = vsel %vm798_vm3, %v7987_v53, 0.0  ;;  %v931_v60 = vpop.permute.xlu0 %930  ;;  %7016 = vmatprep.subr.mxu0 %v7670_v40 }
 0x2c1   :  { %827 = vadd.xlane.f32.xlu0 %v826_v58 }
 0x2c4   :  { %v1016_v61 = vpop.permute.xlu0 %1015 }
 0x2c5   :  { %7026 = vmatpush3.msk.msra.mxu1 %vm855_vm4, %v1016_v61 }
 0x2c6   :  { %7027 = vmatprep.subr.mxu1 %v7670_v40 }
 0x2c8   :  { %v1014_v45 = vpop.permute.xlu0 %1013 }
 0x2c9   :  { %7028 = vmatpush3.msra.mxu1 %v1014_v45 }
 0x2ca   :  { %v7996_v62 = vpop.eup %7504  ;;  %7029 = vmatprep.subr.mxu1 %v7670_v40 }
 0x2cb   :  { %v832_v0 = vsel %vm798_vm3, %v7996_v62, 0.0 }
 0x2cc   :  { %833 = vadd.xlane.f32.xlu0 %v832_v0 }
 0x2d1   :  { %1094 = vrot.lane.b32.xlu1 %v7870_v30, %s7673_s11 }
 0x2d5   :  { %1360 = vrot.lane.b32.xlu1 %v7834_v5, %s7674_s2 }
 0x2d9   :  { %1358 = vrot.lane.b32.xlu1 %v7838_v8, %s7674_s2 }
 0x2dd   :  { %1356 = vrot.lane.b32.xlu1 %v7842_v10, %s7674_s2 }
 0x2e1   :  { %1354 = vrot.lane.b32.xlu1 %v7905_v51, %s7675_s12  ;;  %v933_v51 = vpop.permute.xlu1 %932 }
 0x2e2   :  { %1011 = vrot.lane.b32.xlu0 %v7868_v29, %s7673_s11 }
 0x2e5   :  { %1532 = vrot.lane.b32.xlu1 %v7853_v20, %s7674_s2  ;;  %v929_v1 = vpop.permute.xlu1 %928 }
 0x2e6   :  { %1274 = vrot.lane.b32.xlu0 %v7818_v57, %s7674_s2 }
 0x2e9   :  { %1530 = vrot.lane.b32.xlu1 %v7862_v28, %s7674_s2  ;;  %v1099_v4 = vpop.permute.xlu1 %1098 }
 0x2ea   :  { %1272 = vrot.lane.b32.xlu0 %v7829_v63, %s7674_s2 }
 0x2ed   :  { %1528 = vrot.lane.b32.xlu1 %v7870_v30, %s7674_s2  ;;  %v1097_v6 = vpop.permute.xlu1 %1096 }
 0x2ee   :  { %1270 = vrot.lane.b32.xlu0 %v7815_v56, %s7674_s2 }
 0x2f1   :  { %1526 = vrot.lane.b32.xlu1 %v7923_v55, %s7675_s12 }
 0x2f2   :  { %1268 = vrot.lane.b32.xlu0 %v7883_v38, %s7675_s12 }
 0x2f6   :  { %1446 = vrot.lane.b32.xlu0 %v7845_v12, %s7674_s2 }
 0x2fa   :  { %1444 = vrot.lane.b32.xlu0 %v7855_v22, %s7674_s2 }
 0x2fe   :  { %1442 = vrot.lane.b32.xlu0 %v7868_v29, %s7674_s2 }
 0x302   :  { %1440 = vrot.lane.b32.xlu0 %v7902_v50, %s7675_s12 }
 0x33d   :  { %v825_v55 = vpop.xlane.xlu1 %824 }
 0x33e   :  { %7506 = vrcp.f32 %v825_v55 }
 0x349   :  { %v831_v7 = vpop.xlane.xlu1 %830 }
 0x34a   :  { %7508 = vrcp.f32 %v831_v7  ;;  %v828_v38 = vpop.xlane.xlu0 %827 }
 0x34b   :  { %v7507_v9 = vpop.eup %7506  ;;  %7510 = vrcp.f32 %v828_v38 }
 0x34c   :  { %v839_v11 = vmul.f32 %v7507_v9, %v7979_v37 }
 0x34d   :  { %v1095_v21 = vpop.permute.xlu1 %1094 }
 0x34e   :  { %7014 = vmatmul.mubr.msk.f32.vlgmr.msra.gmra.mxu0 %vm851_vm5, %v839_v11 }
 0x34f   :  { %7017 = vmatpush3.msk.msra.mxu0 %vm855_vm4, %v933_v51  ;;  %7022 = vmatprep.mubr.msk.f32.mxu0 %vm7671_vm1, %v7670_v40 }
 0x350   :  { %7018 = vmatprep.subr.mxu0 %v7670_v40 }
 0x351   :  { %7019 = vmatpush3.msra.mxu0 %v931_v60  ;;  %v1361_v41 = vpop.permute.xlu1 %1360 }
 0x352   :  { %7020 = vmatprep.subr.mxu0 %v7670_v40 }
 0x353   :  { %7021 = vmatpush3.msra.mxu0 %v929_v1 }
 0x354   :  { %7034 = vmatprep.subr.mxu0 %v7670_v40 }
 0x355   :  { %v834_v50 = vpop.xlane.xlu0 %833  ;;  %v1359_v48 = vpop.permute.xlu1 %1358 }
 0x356   :  { %7512 = vrcp.f32 %v834_v50 }
 0x357   :  { %v7509_v13 = vpop.eup %7508 }
 0x358   :  { %v7511_v14 = vpop.eup %7510  ;;  %v841_v15 = vmul.f32 %v7509_v13, %v7984_v49 }
 0x359   :  { %v1012_v16 = vpop.permute.xlu0 %1011  ;;  %v840_v18 = vmul.f32 %v7511_v14, %v7987_v53  ;;  %v1357_v54 = vpop.permute.xlu1 %1356 }
 0x35a   :  { %7030 = vmatpush3.msra.mxu1 %v1012_v16 }
 0x35b   :  { %7023 = vmatmul.mubr.msk.f32.vlgmr.msra.gmra.mxu0 %vm851_vm5, %v840_v18  ;;  %7032 = vmatmul.mubr.msk.f32.vlgmr.msra.gmra.mxu1 %vm851_vm5, %v841_v15 }
 0x35c   :  { %7035 = vmatpush3.msk.msra.mxu0 %vm855_vm4, %v1099_v4  ;;  %7040 = vmatprep.mubr.msk.f32.mxu0 %vm7671_vm1, %v7670_v40 }
 0x35d   :  { %7036 = vmatprep.subr.mxu0 %v7670_v40  ;;  %v1275_v19 = vpop.permute.xlu0 %1274  ;;  %7043 = vmatprep.subr.mxu1 %v55_v35  ;;  %v1355_v61 = vpop.permute.xlu1 %1354 }
 0x35e   :  { %7037 = vmatpush3.msra.mxu0 %v1097_v6  ;;  %7044 = vmatpush3.msra.mxu1 %v55_v35 }
 0x35f   :  { %7038 = vmatprep.subr.mxu0 %v7670_v40  ;;  %7045 = vmatprep.subr.mxu1 %v54_v36 }
 0x360   :  { %7039 = vmatpush3.msra.mxu0 %v1095_v21  ;;  %7046 = vmatpush3.msra.mxu1 %v54_v36 }
 0x361   :  { %v1273_v23 = vpop.permute.xlu0 %1272  ;;  %7050 = vmatprep.subr.mxu0 %v7670_v40  ;;  %7059 = vmatprep.subr.mxu1 %v7670_v40 }
 0x363   :  { %v7513_v24 = vpop.eup %7512 }
 0x364   :  { %v842_v25 = vmul.f32 %v7513_v24, %v7996_v62  ;;  %v1533_v62 = vpop.permute.xlu1 %1532 }
 0x365   :  { %v1271_v26 = vpop.permute.xlu0 %1270 }
 0x366   :  { %7041 = vmatmul.mubr.msk.f32.vlgmr.msra.gmra.mxu0 %vm851_vm5, %v842_v25 }
 0x367   :  { %7051 = vmatpush3.xpose.msk.msra.mxu0 %vm410_vm2, %v1275_v19  ;;  %7056 = vmatprep.mubr.msk.f32.mxu0 %vm7671_vm1, %v7670_v40 }
 0x368   :  { %7052 = vmatprep.subr.mxu0 %v7670_v40  ;;  %v1531_v1 = vpop.permute.xlu1 %1530 }
 0x369   :  { %v1269_v27 = vpop.permute.xlu0 %1268 }
 0x36b   :  { %7053 = vmatpush3.xpose.msk.msra.mxu0 %vm410_vm2, %v1273_v23 }
 0x36c   :  { %7054 = vmatprep.subr.mxu0 %v7670_v40  ;;  %v1529_v7 = vpop.permute.xlu1 %1528 }
 0x36d   :  { %v1447_v31 = vpop.permute.xlu0 %1446 }
 0x36f   :  { %7055 = vmatpush3.xpose.msk.msra.mxu0 %vm410_vm2, %v1271_v26 }
 0x370   :  { %7068 = vmatprep.subr.mxu0 %v7670_v40 }
 0x371   :  { %v1445_v32 = vpop.permute.xlu0 %1444 }
 0x372   :  { %7057 = vmatmul.mubr.msk.f32.vlgmr.msra.gmra.mxu0 %vm410_vm2, %v1269_v27 }
 0x373   :  { %7069 = vmatpush3.xpose.msk.msra.mxu0 %vm410_vm2, %v1447_v31  ;;  %7074 = vmatprep.mubr.msk.f32.mxu0 %vm7671_vm1, %v7670_v40 }
 0x374   :  { %7070 = vmatprep.subr.mxu0 %v7670_v40 }
 0x375   :  { %v1443_v33 = vpop.permute.xlu0 %1442 }
 0x377   :  { %7071 = vmatpush3.xpose.msk.msra.mxu0 %vm410_vm2, %v1445_v32 }
 0x378   :  { %7072 = vmatprep.subr.mxu0 %v7670_v40 }
 0x379   :  { %v1441_v34 = vpop.permute.xlu0 %1440 }
 0x37b   :  { %7073 = vmatpush3.xpose.msk.msra.mxu0 %vm410_vm2, %v1443_v33 }
 0x37c   :  { %7086 = vmatprep.subr.mxu0 %v7670_v40 }
 0x37e   :  { %7075 = vmatmul.mubr.msk.f32.vlgmr.msra.gmra.mxu0 %vm410_vm2, %v1441_v34 }
 0x37f   :  { %7092 = vmatprep.mubr.msk.f32.mxu0 %vm7671_vm1, %v7670_v40 }
 0x40e   :  { %v924_v37 = vpop.f32.mrf.mxu0 }
 0x410   :  { %v7015_v39 = vpop.f32.mrf.mxu0 }
 0x41b   :  { %v1007_v46 = vpop.f32.mrf.mxu0  ;;  %v1090_v47 = vpop.f32.mrf.mxu1 }
 0x41c   :  { %v1181_v49 = vcombine.low %v924_v37, %v1007_v46 }
 0x41d   :  { %v7024_v52 = vpop.f32.mrf.mxu0  ;;  %v7033_v53 = vpop.f32.mrf.mxu1 }
 0x41e   :  { %7047 = vmatprep.mubr.msk.f32.mxu1 %vm410_vm2, %v1181_v49 }
 0x426   :  { %v1173_v58 = vpop.f32.mrf.mxu0 }
 0x427   :  { %v1182_v60 = vcombine.low %v1090_v47, %v1173_v58 }
 0x428   :  { %v7042_v45 = vpop.f32.mrf.mxu0 }
 0x429   :  { %7048 = vmatmul.mubr.msk.f32.vlgmr.msra.gmra.mxu1 %vm410_vm2, %v1182_v60 }
 0x42a   :  { %7060 = vmatpush3.xpose.msk.msra.mxu1 %vm410_vm2, %v1361_v41  ;;  %7065 = vmatprep.mubr.msk.f32.mxu1 %vm7671_vm1, %v7670_v40 }
 0x42b   :  { %7061 = vmatprep.subr.mxu1 %v7670_v40 }
 0x42e   :  { %7062 = vmatpush3.xpose.msk.msra.mxu1 %vm410_vm2, %v1359_v48 }
 0x42f   :  { %7063 = vmatprep.subr.mxu1 %v7670_v40 }
 0x432   :  { %v1350_v0 = vpop.f32.mrf.mxu0  ;;  %7064 = vmatpush3.xpose.msk.msra.mxu1 %vm410_vm2, %v1357_v54 }
 0x433   :  { %v1612_v51 = vmul.f32 0.25, %v1350_v0  ;;  %7077 = vmatprep.subr.mxu1 %v7670_v40 }
 0x434   :  { %v7058_v4 = vpop.f32.mrf.mxu0 }
 0x435   :  { %7066 = vmatmul.mubr.msk.f32.vlgmr.msra.gmra.mxu1 %vm410_vm2, %v1355_v61  ;;  %v1616_v6 = vadd.f32 %v7933_v59, %v1612_v51  ;;  %v1527_v59 = vpop.permute.xlu1 %1526 }
 0x436   :  { %7078 = vmatpush3.xpose.msk.msra.mxu1 %vm410_vm2, %v1533_v62  ;;  %7083 = vmatprep.mubr.msk.f32.mxu1 %vm7671_vm1, %v7670_v40 }
 0x437   :  { %v1620_v55 = vsel %vm798_vm3, %v1616_v6, -inf  ;;  %7079 = vmatprep.subr.mxu1 %v7670_v40 }
 0x438   :  { %1621 = vmax.xlane.f32.xlu0 %v1620_v55 }
 0x43a   :  { %7080 = vmatpush3.xpose.msk.msra.mxu1 %vm410_vm2, %v1531_v1 }
 0x43b   :  { %7081 = vmatprep.subr.mxu1 %v7670_v40 }
 0x43e   :  { %v1522_v38 = vpop.f32.mrf.mxu0  ;;  %7082 = vmatpush3.xpose.msk.msra.mxu1 %vm410_vm2, %v1529_v7 }
 0x43f   :  { %v1614_v9 = vmul.f32 0.25, %v1522_v38  ;;  %7095 = vmatprep.subr.mxu1 %v7670_v40 }
 0x440   :  { %v7076_v11 = vpop.f32.mrf.mxu0 }
 0x441   :  { %7084 = vmatmul.mubr.msk.f32.vlgmr.msra.gmra.mxu1 %vm410_vm2, %v1527_v59  ;;  %v1618_v50 = vadd.f32 %v7940_v2, %v1614_v9 }
 0x442   :  { %7101 = vmatprep.mubr.msk.f32.mxu1 %vm7671_vm1, %v7670_v40 }
 0x443   :  { %v1626_v13 = vsel %vm798_vm3, %v1618_v50, -inf }
 0x444   :  { %1627 = vmax.xlane.f32.xlu0 %v1626_v13  ;;  %v56_v13 = vld [vmem:[%s8996_s4 + $0x10] sm:$0xff] }
 0x4c1   :  { %v1622_v14 = vpop.xlane.xlu0 %1621 }
 0x4c2   :  { %v1632_v15 = vsub.f32 %v1616_v6, %v1622_v14 }
 0x4c4   :  { %v1636_v18 = vmul.f32 1.442695, %v1632_v15 }
 0x4c6   :  { %7514 = vpow2.f32 %v1636_v18 }
 0x4cd   :  { %v1628_v16 = vpop.xlane.xlu0 %1627 }
 0x4ce   :  { %v1634_v19 = vsub.f32 %v1618_v50, %v1628_v16  ;;  %v57_v50 = vld [vmem:[%s8996_s4 + $0x18] sm:$0xff] }
 0x4d0   :  { %v1640_v21 = vmul.f32 1.442695, %v1634_v19 }
 0x4d2   :  { %7516 = vpow2.f32 %v1640_v21 }
 0x4d3   :  { %v7515_v32 = vpop.eup %7514 }
 0x4d4   :  { %v1644_v33 = vsel %vm798_vm3, %v7515_v32, 0.0 }
 0x4df   :  { %v8117_v34 = vpop.eup %7516 }
 0x4e0   :  { %v1650_v37 = vsel %vm798_vm3, %v8117_v34, 0.0 }
 0x4e9   :  { %v8110_v23 = vpop.f32.mrf.mxu1 }
 0x4eb   :  { %v8112_v24 = vpop.f32.mrf.mxu1 }
 0x4f5   :  { %v1436_v25 = vpop.f32.mrf.mxu1 }
 0x4f6   :  { %v1613_v2 = vmul.f32 0.25, %v1436_v25 }
 0x4f7   :  { %v7067_v26 = vpop.f32.mrf.mxu1 }
 0x4f8   :  { %v1617_v27 = vadd.f32 %v7945_v3, %v1613_v2  ;;  %v8181_v26 = vsub.s32 1, %v7798_v42 }
 0x4fa   :  { %v1623_v31 = vsel %vm798_vm3, %v1617_v27, -inf }
 0x4fb   :  { %1624 = vmax.xlane.f32.xlu1 %v1623_v31 }
 0x4ff   :  { %1645 = vadd.xlane.f32.xlu1 %v1644_v33  ;;  %v2094_v33 = vrot.slane %v7806_v44, %v8181_v26 }
 0x501   :  { %v1608_v35 = vpop.f32.mrf.mxu1 }
 0x502   :  { %v1615_v36 = vmul.f32 0.25, %v1608_v35  ;;  %v1265_v35 = vcombine.high %v8110_v23, %v8110_v23 }
 0x503   :  { %1651 = vadd.xlane.f32.xlu1 %v1650_v37  ;;  %v7085_v39 = vpop.f32.mrf.mxu1 }
 0x504   :  { %v1619_v41 = vadd.f32 %v7954_v17, %v1615_v36  ;;  %v1264_v36 = vcombine.high %v8112_v24, %v8112_v24 }
 0x506   :  { %v1629_v3 = vsel %vm798_vm3, %v1619_v41, -inf }
 0x507   :  { %1630 = vmax.xlane.f32.xlu0 %v1629_v3 }
 0x514   :  { %1668 = vrot.lane.b32.xlu1 %v7818_v57, %s7676_s17 }
 0x518   :  { %1666 = vrot.lane.b32.xlu1 %v7829_v63, %s7676_s17 }
 0x51c   :  { %1749 = vrot.lane.b32.xlu1 %v7838_v8, %s7676_s17 }
 0x51d   :  { %1751 = vrot.lane.b32.xlu0 %v7834_v5, %s7676_s17 }
 0x520   :  { %1747 = vrot.lane.b32.xlu1 %v7842_v10, %s7676_s17 }
 0x521   :  { %1664 = vrot.lane.b32.xlu0 %v7815_v56, %s7676_s17 }
 0x524   :  { %1917 = vrot.lane.b32.xlu1 %v7853_v20, %s7676_s17 }
 0x525   :  { %1834 = vrot.lane.b32.xlu0 %v7845_v12, %s7676_s17 }
 0x528   :  { %1915 = vrot.lane.b32.xlu1 %v7862_v28, %s7676_s17 }
 0x529   :  { %1832 = vrot.lane.b32.xlu0 %v7855_v22, %s7676_s17 }
 0x52c   :  { %1913 = vrot.lane.b32.xlu1 %v7870_v30, %s7676_s17 }
 0x584   :  { %v1625_v57 = vpop.xlane.xlu1 %1624 }
 0x585   :  { %v1633_v63 = vsub.f32 %v1617_v27, %v1625_v57 }
 0x587   :  { %v1638_v5 = vmul.f32 1.442695, %v1633_v63 }
 0x588   :  { %v1646_v8 = vpop.xlane.xlu1 %1645 }
 0x589   :  { %7518 = vpow2.f32 %v1638_v5  ;;  %v7642_v5 = vld [vmem:[%s8992_s0] sm:$0xf] }
 0x58a   :  { %7520 = vrcp.f32 %v1646_v8 }
 0x58c   :  { %v1652_v56 = vpop.xlane.xlu1 %1651 }
 0x590   :  { %v1669_v10 = vpop.permute.xlu1 %1668  ;;  %v1631_v20 = vpop.xlane.xlu0 %1630 }
 0x591   :  { %v1635_v17 = vsub.f32 %v1619_v41, %v1631_v20  ;;  %7087 = vmatpush3.msk.msra.mxu0 %vm855_vm4, %v1669_v10 }
 0x592   :  { %7088 = vmatprep.subr.mxu0 %v7670_v40 }
 0x593   :  { %v1642_v12 = vmul.f32 1.442695, %v1635_v17 }
 0x594   :  { %v1667_v28 = vpop.permute.xlu1 %1666  ;;  %v1752_v22 = vpop.permute.xlu0 %1751 }
 0x595   :  { %7522 = vpow2.f32 %v1642_v12  ;;  %7089 = vmatpush3.msra.mxu0 %v1667_v28  ;;  %7096 = vmatpush3.msk.msra.mxu1 %vm855_vm4, %v1752_v22  ;;  %v7645_v22 = vld [vmem:[%s8992_s0 + $0xc] sm:$0xf] }
 0x596   :  { %v7519_v30 = vpop.eup %7518  ;;  %7090 = vmatprep.subr.mxu0 %v7670_v40  ;;  %7097 = vmatprep.subr.mxu1 %v7670_v40  ;;  %7524 = vrcp.f32 %v1652_v56 }
 0x597   :  { %v7521_v46 = vpop.eup %7520  ;;  %v1647_v47 = vsel %vm798_vm3, %v7519_v30, 0.0 }
 0x598   :  { %v1750_v48 = vpop.permute.xlu1 %1749  ;;  %1648 = vadd.xlane.f32.xlu0 %v1647_v47  ;;  %v1665_v49 = vpop.permute.xlu0 %1664  ;;  %v1660_v52 = vmul.f32 %v7521_v46, %v7515_v32 }
 0x599   :  { %7091 = vmatpush3.msra.mxu0 %v1665_v49  ;;  %7098 = vmatpush3.msra.mxu1 %v1750_v48 }
 0x59a   :  { %7093 = vmatmul.mubr.msk.f32.vlgmr.msra.gmra.mxu0 %vm851_vm5, %v1660_v52  ;;  %7099 = vmatprep.subr.mxu1 %v7670_v40 }
 0x59b   :  { %7104 = vmatprep.subr.mxu0 %v7670_v40  ;;  %7110 = vmatprep.mubr.msk.f32.mxu0 %vm7671_vm1, %v7670_v40 }
 0x59c   :  { %v1748_v53 = vpop.permute.xlu1 %1747  ;;  %v1835_v54 = vpop.permute.xlu0 %1834 }
 0x59d   :  { %7100 = vmatpush3.msra.mxu1 %v1748_v53  ;;  %7105 = vmatpush3.msk.msra.mxu0 %vm855_vm4, %v1835_v54 }
 0x59e   :  { %7106 = vmatprep.subr.mxu0 %v7670_v40  ;;  %7113 = vmatprep.subr.mxu1 %v7670_v40 }
 0x5a0   :  { %v1833_v58 = vpop.permute.xlu0 %1832  ;;  %v1918_v62 = vpop.permute.xlu1 %1917 }
 0x5a1   :  { %7107 = vmatpush3.msra.mxu0 %v1833_v58 }
 0x5a2   :  { %v7523_v60 = vpop.eup %7522  ;;  %7108 = vmatprep.subr.mxu0 %v7670_v40 }
 0x5a3   :  { %v1653_v61 = vsel %vm798_vm3, %v7523_v60, 0.0  ;;  %v7525_v51 = vpop.eup %7524 }
 0x5a4   :  { %1654 = vadd.xlane.f32.xlu0 %v1653_v61  ;;  %v1916_v4 = vpop.permute.xlu1 %1915  ;;  %v1662_v7 = vmul.f32 %v7525_v51, %v8117_v34 }
 0x5ba   :  { %1830 = vrot.lane.b32.xlu0 %v7868_v29, %s7676_s17  ;;  %v1914_v29 = vpop.permute.xlu1 %1913 }
 0x621   :  { %v1649_v45 = vpop.xlane.xlu0 %1648 }
 0x622   :  { %7526 = vrcp.f32 %v1649_v45 }
 0x62d   :  { %v1655_v0 = vpop.xlane.xlu0 %1654 }
 0x62e   :  { %7528 = vrcp.f32 %v1655_v0 }
 0x62f   :  { %v7527_v1 = vpop.eup %7526 }
 0x630   :  { %v1661_v6 = vmul.f32 %v7527_v1, %v7519_v30 }
 0x631   :  { %v1831_v55 = vpop.permute.xlu0 %1830 }
 0x632   :  { %7102 = vmatmul.mubr.msk.f32.vlgmr.msra.gmra.mxu1 %vm851_vm5, %v1661_v6  ;;  %7109 = vmatpush3.msra.mxu0 %v1831_v55 }
 0x633   :  { %7114 = vmatpush3.msk.msra.mxu1 %vm855_vm4, %v1918_v62  ;;  %7111 = vmatmul.mubr.msk.f32.vlgmr.msra.gmra.mxu0 %vm851_vm5, %v1662_v7 }
 0x634   :  { %7115 = vmatprep.subr.mxu1 %v7670_v40  ;;  %7119 = vmatprep.mubr.msk.f32.mxu1 %vm7671_vm1, %v7670_v40 }
 0x635   :  { %7116 = vmatpush3.msra.mxu1 %v1916_v4  ;;  %7122 = vmatprep.subr.mxu0 %v57_v50 }
 0x636   :  { %7117 = vmatprep.subr.mxu1 %v7670_v40  ;;  %7123 = vmatpush3.msra.mxu0 %v57_v50  ;;  %v58_v50 = vld [vmem:[%s8997_s5] sm:$0xff] }
 0x637   :  { %7118 = vmatpush3.msra.mxu1 %v1914_v29  ;;  %7124 = vmatprep.subr.mxu0 %v56_v13 }
 0x638   :  { %7125 = vmatpush3.msra.mxu0 %v56_v13  ;;  %v77_v13 = vld [vmem:[%s8998_s6 + $0x78] sm:$0xff] }
 0x639   :  { %7140 = vmatprep.subr.mxu0 %v77_v13 }
 0x63b   :  { %v7529_v38 = vpop.eup %7528 }
 0x63c   :  { %v1663_v9 = vmul.f32 %v7529_v38, %v7523_v60 }
 0x63e   :  { %7120 = vmatmul.mubr.msk.f32.vlgmr.msra.gmra.mxu1 %vm851_vm5, %v1663_v9  ;;  %v61_v9 = vld [vmem:[%s8997_s5 + $0x18] sm:$0xff] }
 0x63f   :  { %7129 = vmatprep.subr.mxu1 %v61_v9 }
 0x640   :  { %7130 = vmatpush3.msra.mxu1 %v61_v9 }
 0x65a   :  { %v1743_v59 = vpop.f32.mrf.mxu0 }
 0x65c   :  { %v7094_v11 = vpop.f32.mrf.mxu0 }
 0x65d   :  { %v59_v11 = vld [vmem:[%s8997_s5 + $0x8] sm:$0xff] }
 0x6f2   :  { %v1826_v14 = vpop.f32.mrf.mxu1 }
 0x6f3   :  { %v2000_v15 = vcombine.low %v1743_v59, %v1826_v14  ;;  %v1909_v16 = vpop.f32.mrf.mxu0  ;;  %v60_v59 = vld [vmem:[%s8997_s5 + $0x10] sm:$0xff] }
 0x6f4   :  { %v7103_v18 = vpop.f32.mrf.mxu1  ;;  %7131 = vmatprep.subr.mxu1 %v60_v59  ;;  %v76_v14 = vld [vmem:[%s8998_s6 + $0x70] sm:$0xff] }
 0x6f5   :  { %v7112_v19 = vpop.f32.mrf.mxu0  ;;  %7126 = vmatprep.mubr.msk.f32.mxu0 %vm410_vm2, %v2000_v15  ;;  %7132 = vmatpush3.msra.mxu1 %v60_v59  ;;  %v75_v15 = vld [vmem:[%s8998_s6 + $0x68] sm:$0xff]  ;;  %v73_v18 = vld [vmem:[%s8998_s6 + $0x58] sm:$0xff] }
 0x6f6   :  { %7133 = vmatprep.subr.mxu1 %v59_v11  ;;  %v72_v19 = vld [vmem:[%s8998_s6 + $0x50] sm:$0xff] }
 0x6f7   :  { %7134 = vmatpush3.msra.mxu1 %v59_v11 }
 0x6f8   :  { %7135 = vmatprep.subr.mxu1 %v58_v50 }
 0x6f9   :  { %7136 = vmatpush3.msra.mxu1 %v58_v50 }
 0x6fe   :  { %v1992_v21 = vpop.f32.mrf.mxu1 }
 0x6ff   :  { %v2001_v25 = vcombine.low %v1909_v16, %v1992_v21  ;;  %v74_v16 = vld [vmem:[%s8998_s6 + $0x60] sm:$0xff]  ;;  %v71_v21 = vld [vmem:[%s8998_s6 + $0x48] sm:$0xff] }
 0x700   :  { %v7121_v2 = vpop.f32.mrf.mxu1 }
 0x701   :  { %7127 = vmatmul.mubr.msk.f32.vlgmr.msra.gmra.mxu0 %vm410_vm2, %v2001_v25  ;;  %v70_v25 = vld [vmem:[%s8998_s6 + $0x40] sm:$0xff]  ;;  %v69_v2 = vld [vmem:[%s8998_s6 + $0x38] sm:$0xff] }
 0x702   :  { %7141 = vmatpush3.msra.mxu0 %v77_v13 }
 0x703   :  { %7142 = vmatprep.subr.mxu0 %v76_v14 }
 0x704   :  { %7143 = vmatpush3.msra.mxu0 %v76_v14 }
 0x705   :  { %7144 = vmatprep.subr.mxu0 %v75_v15 }
 0x706   :  { %7145 = vmatpush3.msra.mxu0 %v75_v15 }
 0x707   :  { %7146 = vmatprep.subr.mxu0 %v74_v16 }
 0x708   :  { %7147 = vmatpush3.msra.mxu0 %v74_v16 }
 0x709   :  { %7148 = vmatprep.subr.mxu0 %v73_v18 }
 0x70a   :  { %7149 = vmatpush3.msra.mxu0 %v73_v18 }
 0x70b   :  { %7150 = vmatprep.subr.mxu0 %v72_v19 }
 0x70c   :  { %7151 = vmatpush3.msra.mxu0 %v72_v19 }
 0x70d   :  { %7152 = vmatprep.subr.mxu0 %v71_v21 }
 0x70e   :  { %7153 = vmatpush3.msra.mxu0 %v71_v21 }
 0x70f   :  { %7154 = vmatprep.subr.mxu0 %v70_v25 }
 0x710   :  { %7155 = vmatpush3.msra.mxu0 %v70_v25  ;;  %v8317_v25 = vsub.s32 5, %v7798_v42 }
 0x711   :  { %7156 = vmatprep.subr.mxu0 %v69_v2 }
 0x712   :  { %7157 = vmatpush3.msra.mxu0 %v69_v2 }
 0x7c1   :  { %v7128_v27 = vpop.f32.mrf.mxu0 }
 0x7c2   :  { %v2084_v31 = vcombine.high %v7128_v27, %v7128_v27  ;;  %v2089_v32 = vadd.f32 %v7128_v27, %v8110_v23  ;;  %v7643_v23 = vld [vmem:[%s8992_s0 + $0x4] sm:$0xf]  ;;  %v68_v27 = vld [vmem:[%s8998_s6 + $0x30] sm:$0xff] }
 0x7c3   :  { %v2072_v34 = vpop.f32.mrf.mxu0  ;;  %7158 = vmatprep.subr.mxu0 %v68_v27 }
 0x7c4   :  { %v2083_v37 = vcombine.high %v2072_v34, %v2072_v34  ;;  %v2087_v39 = vadd.f32 %v2072_v34, %v8112_v24  ;;  %v2090_v41 = vadd.f32 %v2084_v31, %v1265_v35  ;;  %v2097_v3 = vadd.f32 %v2094_v33, %v2089_v32  ;;  %v7644_v24 = vld [vmem:[%s8992_s0 + $0x8] sm:$0xf]  ;;  %7159 = vmatpush3.msra.mxu0 %v68_v27 }
 0x7c6   :  { %v2088_v57 = vadd.f32 %v2083_v37, %v1264_v36  ;;  %v2095_v63 = vadd.f32 %v2094_v33, %v2087_v39  ;;  %v2101_v20 = vadd.f32 %v7644_v24, %v2097_v3  ;;  %v2098_v17 = vadd.f32 %v2094_v33, %v2090_v41 }
 0x7c8   :  { %v2099_v8 = vadd.f32 %v7642_v5, %v2095_v63  ;;  %v2096_v44 = vadd.f32 %v2094_v33, %v2088_v57  ;;  %v2110_v28 = vsel %vm2103_vm6, %v2101_v20, 0.0  ;;  %v2102_v30 = vadd.f32 %v7645_v22, %v2098_v17 }
 0x7c9   :  { %v8270_v5 = vsub.s32 2, %v7798_v42 }
 0x7ca   :  { %v2104_v56 = vsel %vm2103_vm6, %v2099_v8, 0.0  ;;  %v2100_v10 = vadd.f32 %v7643_v23, %v2096_v44  ;;  %v2113_v46 = vsel %vm2103_vm6, %v2102_v30, 0.0 }
 0x7cb   :  { %2105 = vadd.xlane.f32.xlu0 %v2104_v56  ;;  %v8280_v56 = vsub.s32 3, %v7798_v42 }
 0x7cc   :  { %v2107_v12 = vsel %vm2103_vm6, %v2100_v10, 0.0 }
 0x7cd   :  { %2108 = vadd.xlane.f32.xlu1 %v2107_v12 }
 0x7cf   :  { %2111 = vadd.xlane.f32.xlu0 %v2110_v28 }
 0x7d3   :  { %2114 = vadd.xlane.f32.xlu0 %v2113_v46 }
 0x854   :  { %v2106_v47 = vpop.xlane.xlu0 %2105 }
 0x855   :  { %v2117_v48 = vmul.f32 0.03125, %v2106_v47 }
 0x856   :  { %v2109_v49 = vpop.xlane.xlu1 %2108 }
 0x857   :  { %v8207_v52 = vsub.f32 %v2099_v8, %v2117_v48  ;;  %v2118_v53 = vmul.f32 0.03125, %v2109_v49  ;;  %v8275_v8 = vld [vmem:[%s8999_s7] sm:$0xff] }
 0x858   :  { %v2112_v54 = vpop.xlane.xlu0 %2111  ;;  %v2160_v44 = vrot.slane %v8275_v8, %v8270_v5  ;;  %v2168_v12 = vrot.slane %v8275_v8, %v8280_v56  ;;  %v2368_v2 = vrot.slane %v8275_v8, %v8317_v25 }
 0x859   :  { %v8209_v58 = vsub.f32 %v2100_v10, %v2118_v53  ;;  %v2119_v60 = vmul.f32 0.03125, %v2112_v54  ;;  %v2125_v61 = vmul.f32 %v8207_v52, %v8207_v52 }
 0x85b   :  { %v8213_v45 = vsub.f32 %v2101_v20, %v2119_v60  ;;  %v2129_v62 = vsel %vm2103_vm6, %v2125_v61, 0.0  ;;  %v2126_v0 = vmul.f32 %v8209_v58, %v8209_v58 }
 0x85c   :  { %v2115_v51 = vpop.xlane.xlu0 %2114  ;;  %2130 = vadd.xlane.f32.xlu1 %v2129_v62  ;;  %v66_v62 = vld [vmem:[%s8998_s6 + $0x20] sm:$0xff] }
 0x85d   :  { %v2120_v1 = vmul.f32 0.03125, %v2115_v51  ;;  %v2132_v4 = vsel %vm2103_vm6, %v2126_v0, 0.0  ;;  %v2127_v6 = vmul.f32 %v8213_v45, %v8213_v45  ;;  %v65_v0 = vld [vmem:[%s8998_s6 + $0x18] sm:$0xff]  ;;  %v64_v51 = vld [vmem:[%s8998_s6 + $0x10] sm:$0xff] }
 0x85e   :  { %2133 = vadd.xlane.f32.xlu0 %v2132_v4  ;;  %v62_v4 = vld [vmem:[%s8998_s6] sm:$0xff] }
 0x85f   :  { %v8221_v55 = vsub.f32 %v2102_v30, %v2120_v1  ;;  %v2135_v7 = vsel %vm2103_vm6, %v2127_v6, 0.0  ;;  %v63_v1 = vld [vmem:[%s8998_s6 + $0x8] sm:$0xff]  ;;  %v8310_v6 = vsub.s32 4, %v7798_v42 }
 0x860   :  { %2136 = vadd.xlane.f32.xlu1 %v2135_v7 }
 0x861   :  { %v2128_v29 = vmul.f32 %v8221_v55, %v8221_v55  ;;  %v2267_v7 = vrot.slane %v8275_v8, %v8310_v6 }
 0x863   :  { %v2138_v38 = vsel %vm2103_vm6, %v2128_v29, 0.0 }
 0x864   :  { %2139 = vadd.xlane.f32.xlu0 %v2138_v38 }
 0x8e5   :  { %v2131_v31 = vpop.xlane.xlu1 %2130 }
 0x8e6   :  { %v2141_v32 = vmul.f32 0.03125, %v2131_v31 }
 0x8e7   :  { %v2134_v33 = vpop.xlane.xlu0 %2133 }
 0x8e8   :  { %v2145_v34 = vadd.f32 1e-05, %v2141_v32  ;;  %v2142_v35 = vmul.f32 0.03125, %v2134_v33 }
 0x8e9   :  { %v2137_v36 = vpop.xlane.xlu1 %2136 }
 0x8ea   :  { %7530 = vrsqrt.f32 %v2145_v34  ;;  %v2146_v37 = vadd.f32 1e-05, %v2142_v35  ;;  %v2143_v39 = vmul.f32 0.03125, %v2137_v36 }
 0x8ec   :  { %7532 = vrsqrt.f32 %v2146_v37  ;;  %v2147_v41 = vadd.f32 1e-05, %v2143_v39 }
 0x8ed   :  { %v2140_v3 = vpop.xlane.xlu0 %2139 }
 0x8ee   :  { %7534 = vrsqrt.f32 %v2147_v41  ;;  %v2144_v57 = vmul.f32 0.03125, %v2140_v3 }
 0x8f0   :  { %v2148_v63 = vadd.f32 1e-05, %v2144_v57 }
 0x8f2   :  { %7536 = vrsqrt.f32 %v2148_v63 }
 0x8f7   :  { %v7531_v23 = vpop.eup %7530 }
 0x8f8   :  { %v2153_v10 = vmul.f32 %v7531_v23, %v8207_v52 }
 0x8f9   :  { %v7533_v24 = vpop.eup %7532 }
 0x8fa   :  { %v2154_v20 = vmul.f32 %v7533_v24, %v8209_v58  ;;  %v2161_v17 = vmul.f32 %v2160_v44, %v2153_v10 }
 0x8fb   :  { %v7535_v28 = vpop.eup %7534 }
 0x8fc   :  { %v2155_v22 = vmul.f32 %v7535_v28, %v8213_v45  ;;  %v2162_v30 = vmul.f32 %v2160_v44, %v2154_v20  ;;  %v2169_v46 = vadd.f32 %v2168_v12, %v2161_v17  ;;  %v67_v45 = vld [vmem:[%s8998_s6 + $0x28] sm:$0xff] }
 0x8fd   :  { %7160 = vmatprep.subr.mxu0 %v67_v45 }
 0x8fe   :  { %v2170_v47 = vadd.f32 %v2168_v12, %v2162_v30  ;;  %v2163_v54 = vmul.f32 %v2160_v44, %v2155_v22  ;;  %7161 = vmatpush3.msra.mxu0 %v67_v45 }
 0x8ff   :  { %v7537_v48 = vpop.eup %7536  ;;  %7162 = vmatprep.subr.mxu0 %v66_v62 }
 0x900   :  { %v2156_v49 = vmul.f32 %v7537_v48, %v8221_v55  ;;  %v2177_v53 = vcombine.low %v2169_v46, %v2170_v47  ;;  %v2171_v60 = vadd.f32 %v2168_v12, %v2163_v54  ;;  %7163 = vmatpush3.msra.mxu0 %v66_v62 }
 0x901   :  { %7164 = vmatprep.subr.mxu0 %v65_v0 }
 0x902   :  { %7137 = vmatprep.mubr.msk.f32.mxu1 %vm85_vm0, %v2177_v53  ;;  %v2164_v52 = vmul.f32 %v2160_v44, %v2156_v49  ;;  %7165 = vmatpush3.msra.mxu0 %v65_v0 }
 0x903   :  { %7166 = vmatprep.subr.mxu0 %v64_v51 }
 0x904   :  { %v2172_v58 = vadd.f32 %v2168_v12, %v2164_v52  ;;  %7167 = vmatpush3.msra.mxu0 %v64_v51  ;;  %v6546_v51 = vld [vmem:[%s8995_s3 + $0x38] sm:$0xff] }
 0x905   :  { %7168 = vmatprep.subr.mxu0 %v63_v1  ;;  %7175 = vmatprep.subr.mxu1 %v6546_v51 }
 0x906   :  { %v2178_v61 = vcombine.low %v2171_v60, %v2172_v58  ;;  %7169 = vmatpush3.msra.mxu0 %v63_v1  ;;  %v6545_v1 = vld [vmem:[%s8995_s3 + $0x30] sm:$0xff] }
 0x907   :  { %7170 = vmatprep.subr.mxu0 %v62_v4 }
 0x908   :  { %7138 = vmatmul.mubr.msk.f32.vlgmr.msra.gmra.mxu1 %vm85_vm0, %v2178_v61  ;;  %7171 = vmatpush3.msra.mxu0 %v62_v4  ;;  %v6544_v4 = vld [vmem:[%s8995_s3 + $0x28] sm:$0xff] }
 0x909   :  { %7211 = vmatprep.subr.mxu0 %v7670_v40  ;;  %7176 = vmatpush3.msra.mxu1 %v6546_v51 }
 0x90a   :  { %7177 = vmatprep.subr.mxu1 %v6545_v1 }
 0x90b   :  { %7178 = vmatpush3.msra.mxu1 %v6545_v1 }
 0x90c   :  { %7179 = vmatprep.subr.mxu1 %v6544_v4 }
 0x90d   :  { %7180 = vmatpush3.msra.mxu1 %v6544_v4 }
 0x9c8   :  { %v7139_v55 = vpop.f32.mrf.mxu1 }
 0x9c9   :  { %v2261_v29 = vcombine.high %v7139_v55, %v7139_v55  ;;  %v2270_v50 = vadd.f32 %v7139_v55, %v2267_v7  ;;  %v6543_v55 = vld [vmem:[%s8995_s3 + $0x20] sm:$0xff] }
 0x9ca   :  { %v2249_v38 = vpop.f32.mrf.mxu1  ;;  %7181 = vmatprep.subr.mxu1 %v6543_v55 }
 0x9cb   :  { %v2271_v9 = vadd.f32 %v2267_v7, %v2261_v29  ;;  %v2260_v59 = vcombine.high %v2249_v38, %v2249_v38  ;;  %v2268_v11 = vadd.f32 %v2267_v7, %v2249_v38  ;;  %v2274_v18 = vmax.f32 %v2270_v50, 0.0  ;;  %7182 = vmatpush3.msra.mxu1 %v6543_v55 }
 0x9cc   :  { %7186 = vmatprep.subr.mxu1 %v7670_v40 }
 0x9cd   :  { %v2269_v13 = vadd.f32 %v2267_v7, %v2260_v59  ;;  %v2275_v14 = vmax.f32 %v2271_v9, 0.0  ;;  %v2272_v15 = vmax.f32 %v2268_v11, 0.0 }
 0x9cf   :  { %v2273_v16 = vmax.f32 %v2269_v13, 0.0  ;;  %v2281_v21 = vcombine.low %v2274_v18, %v2275_v14 }
 0x9d1   :  { %v2280_v19 = vcombine.low %v2272_v15, %v2273_v16 }
 0x9d3   :  { %7172 = vmatprep.mubr.f32.mxu0 %v2280_v19  ;;  %v8343_v19 = vsub.s32 6, %v7798_v42 }
 0x9d4   :  { %7173 = vmatmul.mubr.f32.vlgmr.msra.gmra.mxu0 %v2281_v21 }
 0x9d5   :  { %7213 = vmatprep.mubr.msk.f32.mxu0 %vm7671_vm1, %v7670_v40  ;;  %v2432_v21 = vrot.slane %v8275_v8, %v8343_v19 }
 0xa94   :  { %v7174_v27 = vpop.f32.mrf.mxu0 }
 0xa95   :  { %v2362_v31 = vcombine.high %v7174_v27, %v7174_v27  ;;  %v2371_v33 = vadd.f32 %v7174_v27, %v2368_v2 }
 0xa96   :  { %v2350_v32 = vpop.f32.mrf.mxu0 }
 0xa97   :  { %v2361_v34 = vcombine.high %v2350_v32, %v2350_v32  ;;  %v2369_v35 = vadd.f32 %v2368_v2, %v2350_v32  ;;  %v2372_v36 = vadd.f32 %v2368_v2, %v2362_v31  ;;  %v2375_v57 = vadd.f32 %v2371_v33, %v2171_v60 }
 0xa99   :  { %v2370_v37 = vadd.f32 %v2368_v2, %v2361_v34  ;;  %v2373_v39 = vadd.f32 %v2369_v35, %v2169_v46  ;;  %v2376_v44 = vadd.f32 %v2372_v36, %v2172_v58  ;;  %v2383_v23 = vsel %vm2103_vm6, %v2375_v57, 0.0 }
 0xa9a   :  { %v8348_v2 = vsub.s32 7, %v7798_v42 }
 0xa9b   :  { %v2377_v41 = vsel %vm2103_vm6, %v2373_v39, 0.0  ;;  %v2374_v3 = vadd.f32 %v2370_v37, %v2170_v47  ;;  %v2386_v10 = vsel %vm2103_vm6, %v2376_v44, 0.0 }
 0xa9c   :  { %2378 = vadd.xlane.f32.xlu1 %v2377_v41  ;;  %v2440_v35 = vrot.slane %v8275_v8, %v8348_v2 }
 0xa9d   :  { %v2380_v63 = vsel %vm2103_vm6, %v2374_v3, 0.0 }
 0xa9e   :  { %2381 = vadd.xlane.f32.xlu0 %v2380_v63 }
 0xaa0   :  { %2384 = vadd.xlane.f32.xlu1 %v2383_v23 }
 0xaa2   :  { %2387 = vadd.xlane.f32.xlu0 %v2386_v10 }
 0xb25   :  { %v2379_v24 = vpop.xlane.xlu1 %2378 }
 0xb26   :  { %v2389_v20 = vmul.f32 0.03125, %v2379_v24 }
 0xb27   :  { %v2382_v17 = vpop.xlane.xlu0 %2381 }
 0xb28   :  { %v2393_v12 = vsub.f32 %v2373_v39, %v2389_v20  ;;  %v2390_v28 = vmul.f32 0.03125, %v2382_v17  ;;  %v8371_v20 = vld [vmem:[%s8999_s7 + $0x8] sm:$0xff] }
 0xb29   :  { %v2385_v22 = vpop.xlane.xlu1 %2384 }
 0xb2a   :  { %v2394_v30 = vsub.f32 %v2374_v3, %v2390_v28  ;;  %v2391_v46 = vmul.f32 0.03125, %v2385_v22  ;;  %v2397_v47 = vmul.f32 %v2393_v12, %v2393_v12 }
 0xb2b   :  { %v2388_v48 = vpop.xlane.xlu0 %2387 }
 0xb2c   :  { %v2395_v49 = vsub.f32 %v2375_v57, %v2391_v46  ;;  %v2392_v53 = vmul.f32 0.03125, %v2388_v48  ;;  %v2401_v54 = vsel %vm2103_vm6, %v2397_v47, 0.0  ;;  %v2398_v52 = vmul.f32 %v2394_v30, %v2394_v30 }
 0xb2d   :  { %2402 = vadd.xlane.f32.xlu1 %v2401_v54 }
 0xb2e   :  { %v2396_v60 = vsub.f32 %v2376_v44, %v2392_v53  ;;  %v2404_v58 = vsel %vm2103_vm6, %v2398_v52, 0.0  ;;  %v2399_v61 = vmul.f32 %v2395_v49, %v2395_v49 }
 0xb2f   :  { %2405 = vadd.xlane.f32.xlu0 %v2404_v58 }
 0xb30   :  { %v2407_v45 = vsel %vm2103_vm6, %v2399_v61, 0.0  ;;  %v2400_v62 = vmul.f32 %v2396_v60, %v2396_v60 }
 0xb31   :  { %2408 = vadd.xlane.f32.xlu1 %v2407_v45 }
 0xb32   :  { %v2410_v0 = vsel %vm2103_vm6, %v2400_v62, 0.0 }
 0xb33   :  { %2411 = vadd.xlane.f32.xlu0 %v2410_v0 }
 0xbb6   :  { %v2403_v7 = vpop.xlane.xlu1 %2402 }
 0xbb7   :  { %v2413_v29 = vmul.f32 0.03125, %v2403_v7 }
 0xbb8   :  { %v2406_v38 = vpop.xlane.xlu0 %2405 }
 0xbb9   :  { %v2417_v9 = vadd.f32 1e-05, %v2413_v29  ;;  %v2414_v59 = vmul.f32 0.03125, %v2406_v38 }
 0xbba   :  { %v2409_v11 = vpop.xlane.xlu1 %2408 }
 0xbbb   :  { %7538 = vrsqrt.f32 %v2417_v9  ;;  %v2418_v50 = vadd.f32 1e-05, %v2414_v59  ;;  %v2415_v13 = vmul.f32 0.03125, %v2409_v11 }
 0xbbc   :  { %v2412_v14 = vpop.xlane.xlu0 %2411 }
 0xbbd   :  { %7540 = vrsqrt.f32 %v2418_v50  ;;  %v2419_v15 = vadd.f32 1e-05, %v2415_v13  ;;  %v2416_v16 = vmul.f32 0.03125, %v2412_v14 }
 0xbbf   :  { %7542 = vrsqrt.f32 %v2419_v15  ;;  %v2420_v18 = vadd.f32 1e-05, %v2416_v16 }
 0xbc1   :  { %7544 = vrsqrt.f32 %v2420_v18 }
 0xbc8   :  { %v7539_v27 = vpop.eup %7538 }
 0xbc9   :  { %v2425_v31 = vmul.f32 %v7539_v27, %v2393_v12  ;;  %v2573_v12 = vrot.slane %v8371_v20, %v7801_v43 }
 0xbca   :  { %v7541_v32 = vpop.eup %7540 }
 0xbcb   :  { %v2426_v33 = vmul.f32 %v7541_v32, %v2394_v30  ;;  %v2433_v34 = vmul.f32 %v2432_v21, %v2425_v31 }
 0xbcc   :  { %v7543_v36 = vpop.eup %7542 }
 0xbcd   :  { %v2427_v37 = vmul.f32 %v7543_v36, %v2395_v49  ;;  %v2434_v39 = vmul.f32 %v2432_v21, %v2426_v33  ;;  %v8352_v57 = vadd.f32 %v2440_v35, %v2433_v34 }
 0xbce   :  { %v7545_v41 = vpop.eup %7544 }
 0xbcf   :  { %v2428_v3 = vmul.f32 %v7545_v41, %v2396_v60  ;;  %v8354_v63 = vadd.f32 %v2440_v35, %v2434_v39  ;;  %v2435_v44 = vmul.f32 %v2432_v21, %v2427_v37 }
 0xbd1   :  { %v2483_v42 = vcombine.low %v8352_v57, %v8354_v63  ;;  %v2436_v23 = vmul.f32 %v2432_v21, %v2428_v3  ;;  %v8359_v10 = vadd.f32 %v2440_v35, %v2435_v44 }
 0xbd3   :  { %7183 = vmatprep.mubr.msk.f32.mxu1 %vm85_vm0, %v2483_v42  ;;  %v8361_v24 = vadd.f32 %v2440_v35, %v2436_v23 }
 0xbd5   :  { %v2484_v8 = vcombine.low %v8359_v10, %v8361_v24 }
 0xbd7   :  { %7184 = vmatmul.mubr.msk.f32.vlgmr.msra.gmra.mxu1 %vm85_vm0, %v2484_v8 }
 0xbd8   :  { %7188 = vmatprep.mubr.msk.f32.mxu1 %vm7671_vm1, %v7670_v40 }
 0xc97   :  { %v7185_v17 = vpop.f32.mrf.mxu1 }
 0xc98   :  { %v2567_v47 = vcombine.high %v7185_v17, %v7185_v17  ;;  %v8381_v48 = vadd.f32 %v7185_v17, %v2573_v12 }
 0xc99   :  { %v2555_v28 = vpop.f32.mrf.mxu1 }
 0xc9a   :  { %v2566_v22 = vcombine.high %v2555_v28, %v2555_v28  ;;  %v8375_v30 = vadd.f32 %v2573_v12, %v2555_v28  ;;  %v8387_v49 = vadd.f32 %v2573_v12, %v2567_v47 }
 0xc9c   :  { %v8377_v46 = vadd.f32 %v2573_v12, %v2566_v22  ;;  %2579 = vrot.lane.b32.xlu1 %v8375_v30, %s7672_s24 }
 0xc9e   :  { %2656 = vrot.lane.b32.xlu0 %v8377_v46, %s7672_s24 }
 0xca0   :  { %2733 = vrot.lane.b32.xlu1 %v8381_v48, %s7672_s24 }
 0xca4   :  { %2810 = vrot.lane.b32.xlu1 %v8387_v49, %s7672_s24 }
 0xd0e   :  { %v2580_v53 = vpop.permute.xlu1 %2579 }
 0xd0f   :  { %7187 = vmatpush3.xpose.msk.msra.mxu1 %vm410_vm2, %v2580_v53 }
 0xd10   :  { %7191 = vmatprep.subr.mxu1 %v7670_v40  ;;  %v2657_v54 = vpop.permute.xlu0 %2656 }
 0xd12   :  { %7189 = vmatmul.mubr.msk.f32.vlgmr.msra.gmra.mxu1 %vm410_vm2, %v8375_v30  ;;  %v2734_v52 = vpop.permute.xlu1 %2733 }
 0xd13   :  { %7192 = vmatpush3.xpose.msk.msra.mxu1 %vm410_vm2, %v2657_v54  ;;  %7193 = vmatprep.mubr.msk.f32.mxu1 %vm7671_vm1, %v7670_v40 }
 0xd14   :  { %7196 = vmatprep.subr.mxu1 %v7670_v40 }
 0xd16   :  { %7194 = vmatmul.mubr.msk.f32.vlgmr.msra.gmra.mxu1 %vm410_vm2, %v8377_v46  ;;  %v2811_v60 = vpop.permute.xlu1 %2810 }
 0xd17   :  { %7197 = vmatpush3.xpose.msk.msra.mxu1 %vm410_vm2, %v2734_v52  ;;  %7198 = vmatprep.mubr.msk.f32.mxu1 %vm7671_vm1, %v7670_v40 }
 0xd18   :  { %7201 = vmatprep.subr.mxu1 %v7670_v40 }
 0xd1a   :  { %7199 = vmatmul.mubr.msk.f32.vlgmr.msra.gmra.mxu1 %vm410_vm2, %v8381_v48 }
 0xd1b   :  { %7202 = vmatpush3.xpose.msk.msra.mxu1 %vm410_vm2, %v2811_v60  ;;  %7203 = vmatprep.mubr.msk.f32.mxu1 %vm7671_vm1, %v7670_v40 }
 0xd1c   :  { %7206 = vmatprep.subr.mxu1 %v7670_v40 }
 0xd1e   :  { %7204 = vmatmul.mubr.msk.f32.vlgmr.msra.gmra.mxu1 %vm410_vm2, %v8387_v49 }
 0xd1f   :  { %7208 = vmatprep.mubr.msk.f32.mxu1 %vm7671_vm1, %v7670_v40 }
 0xdd2   :  { %v2651_v58 = vpop.f32.mrf.mxu1 }
 0xdd3   :  { %v2886_v61 = vmul.f32 0.25, %v2651_v58 }
 0xdd4   :  { %v7190_v45 = vpop.f32.mrf.mxu1 }
 0xdd5   :  { %v2891_v62 = vsel %vm2890_vm7, %v2886_v61, -inf }
 0xdd6   :  { %2892 = vmax.xlane.f32.xlu0 %v2891_v62  ;;  %v2728_v0 = vpop.f32.mrf.mxu1 }
 0xdd7   :  { %v2887_v51 = vmul.f32 0.25, %v2728_v0 }
 0xdd8   :  { %v7195_v1 = vpop.f32.mrf.mxu1 }
 0xdd9   :  { %v2894_v4 = vsel %vm2890_vm7, %v2887_v51, -inf }
 0xdda   :  { %2895 = vmax.xlane.f32.xlu1 %v2894_v4  ;;  %v2805_v55 = vpop.f32.mrf.mxu1 }
 0xddb   :  { %v2888_v7 = vmul.f32 0.25, %v2805_v55 }
 0xddc   :  { %v7200_v29 = vpop.f32.mrf.mxu1 }
 0xddd   :  { %v2897_v38 = vsel %vm2890_vm7, %v2888_v7, -inf  ;;  %v6548_v29 = vld [vmem:[%s8996_s4 + $0x28] sm:$0xff] }
 0xdde   :  { %2898 = vmax.xlane.f32.xlu0 %v2897_v38  ;;  %v2882_v9 = vpop.f32.mrf.mxu1  ;;  %v6547_v38 = vld [vmem:[%s8996_s4 + $0x20] sm:$0xff] }
 0xddf   :  { %v2889_v59 = vmul.f32 0.25, %v2882_v9 }
 0xde0   :  { %v7205_v11 = vpop.f32.mrf.mxu1 }
 0xde1   :  { %v2900_v50 = vsel %vm2890_vm7, %v2889_v59, -inf }
 0xde2   :  { %2901 = vmax.xlane.f32.xlu0 %v2900_v50 }
 0xdeb   :  { %2935 = vrot.lane.b32.xlu1 %v8375_v30, %s7673_s11 }
 0xe5f   :  { %v2893_v13 = vpop.xlane.xlu0 %2892 }
 0xe60   :  { %v2903_v14 = vsub.f32 %v2886_v61, %v2893_v13 }
 0xe62   :  { %v2907_v15 = vmul.f32 1.442695, %v2903_v14 }
 0xe63   :  { %v2896_v16 = vpop.xlane.xlu1 %2895 }
 0xe64   :  { %7546 = vpow2.f32 %v2907_v15  ;;  %v2904_v18 = vsub.f32 %v2887_v51, %v2896_v16 }
 0xe66   :  { %v2909_v21 = vmul.f32 1.442695, %v2904_v18 }
 0xe67   :  { %v2936_v27 = vpop.permute.xlu1 %2935  ;;  %v2899_v31 = vpop.xlane.xlu0 %2898 }
 0xe68   :  { %7548 = vpow2.f32 %v2909_v21  ;;  %v2905_v32 = vsub.f32 %v2888_v7, %v2899_v31  ;;  %7207 = vmatpush3.msk.msra.mxu1 %vm855_vm4, %v2936_v27 }
 0xe69   :  { %7216 = vmatprep.subr.mxu1 %v7670_v40 }
 0xe6a   :  { %v2911_v33 = vmul.f32 1.442695, %v2905_v32 }
 0xe6b   :  { %v2902_v34 = vpop.xlane.xlu0 %2901 }
 0xe6c   :  { %7550 = vpow2.f32 %v2911_v33  ;;  %v2906_v35 = vsub.f32 %v2889_v59, %v2902_v34 }
 0xe6e   :  { %v2913_v36 = vmul.f32 1.442695, %v2906_v35 }
 0xe70   :  { %7552 = vpow2.f32 %v2913_v36 }
 0xe71   :  { %v7547_v37 = vpop.eup %7546 }
 0xe72   :  { %v2915_v39 = vsel %vm2890_vm7, %v7547_v37, 0.0 }
 0xe73   :  { %2916 = vadd.xlane.f32.xlu1 %v2915_v39 }
 0xe75   :  { %v7549_v41 = vpop.eup %7548 }
 0xe76   :  { %v2918_v3 = vsel %vm2890_vm7, %v7549_v41, 0.0 }
 0xe77   :  { %2919 = vadd.xlane.f32.xlu0 %v2918_v3 }
 0xe79   :  { %v7551_v44 = vpop.eup %7550 }
 0xe7a   :  { %v2921_v42 = vsel %vm2890_vm7, %v7551_v44, 0.0 }
 0xe7b   :  { %2922 = vadd.xlane.f32.xlu1 %v2921_v42 }
 0xe7d   :  { %v7553_v23 = vpop.eup %7552 }
 0xe7e   :  { %v2924_v8 = vsel %vm2890_vm7, %v7553_v23, 0.0 }
 0xe7f   :  { %2925 = vadd.xlane.f32.xlu0 %v2924_v8 }
 0xe8c   :  { %3090 = vrot.lane.b32.xlu1 %v8381_v48, %s7673_s11 }
 0xe90   :  { %3167 = vrot.lane.b32.xlu1 %v8387_v49, %s7673_s11 }
 0xe94   :  { %3415 = vrot.lane.b32.xlu1 %v8377_v46, %s7674_s2 }
 0xe95   :  { %3013 = vrot.lane.b32.xlu0 %v8377_v46, %s7673_s11 }
 0xe98   :  { %3413 = vrot.lane.b32.xlu1 %v8377_v46, %s7675_s12 }
 0xe99   :  { %3337 = vrot.lane.b32.xlu0 %v8375_v30, %s7674_s2 }
 0xe9c   :  { %3571 = vrot.lane.b32.xlu1 %v8387_v49, %s7674_s2 }
 0xe9d   :  { %3335 = vrot.lane.b32.xlu0 %v8375_v30, %s7675_s12 }
 0xea0   :  { %3569 = vrot.lane.b32.xlu1 %v8387_v49, %s7675_s12 }
 0xea1   :  { %3493 = vrot.lane.b32.xlu0 %v8381_v48, %s7674_s2 }
 0xea5   :  { %3491 = vrot.lane.b32.xlu0 %v8381_v48, %s7675_s12 }
 0xefc   :  { %v2917_v17 = vpop.xlane.xlu1 %2916 }
 0xefd   :  { %7554 = vrcp.f32 %v2917_v17 }
 0xf00   :  { %v2920_v12 = vpop.xlane.xlu0 %2919 }
 0xf01   :  { %7556 = vrcp.f32 %v2920_v12 }
 0xf04   :  { %v2923_v28 = vpop.xlane.xlu1 %2922 }
 0xf05   :  { %7558 = vrcp.f32 %v2923_v28 }
 0xf08   :  { %v2926_v22 = vpop.xlane.xlu0 %2925  ;;  %v3091_v53 = vpop.permute.xlu1 %3090 }
 0xf09   :  { %7560 = vrcp.f32 %v2926_v22 }
 0xf0a   :  { %v7555_v47 = vpop.eup %7554 }
 0xf0b   :  { %v2931_v54 = vmul.f32 %v7555_v47, %v7547_v37 }
 0xf0c   :  { %v3014_v52 = vpop.permute.xlu0 %3013  ;;  %v3168_v45 = vpop.permute.xlu1 %3167 }
 0xf0d   :  { %7209 = vmatmul.mubr.msk.f32.vlgmr.msra.gmra.mxu1 %vm2937_vm8, %v2931_v54  ;;  %7212 = vmatpush3.msk.msra.mxu0 %vm855_vm4, %v3014_v52 }
 0xf0e   :  { %v7557_v60 = vpop.eup %7556  ;;  %7217 = vmatpush3.msk.msra.mxu1 %vm855_vm4, %v3091_v53  ;;  %7221 = vmatprep.subr.mxu0 %v7670_v40 }
 0xf0f   :  { %v2932_v58 = vmul.f32 %v7557_v60, %v7549_v41  ;;  %7218 = vmatprep.mubr.msk.f32.mxu1 %vm7671_vm1, %v7670_v40  ;;  %7226 = vmatprep.subr.mxu1 %v6548_v29 }
 0xf10   :  { %v3338_v61 = vpop.permute.xlu0 %3337  ;;  %v3416_v11 = vpop.permute.xlu1 %3415 }
 0xf11   :  { %7214 = vmatmul.mubr.msk.f32.vlgmr.msra.gmra.mxu0 %vm2937_vm8, %v2932_v58 }
 0xf12   :  { %v7559_v62 = vpop.eup %7558  ;;  %7222 = vmatpush3.msk.msra.mxu0 %vm855_vm4, %v3168_v45  ;;  %7223 = vmatprep.mubr.msk.f32.mxu0 %vm7671_vm1, %v7670_v40 }
 0xf13   :  { %v2933_v0 = vmul.f32 %v7559_v62, %v7551_v44  ;;  %7233 = vmatprep.subr.mxu0 %v7670_v40 }
 0xf14   :  { %v3336_v51 = vpop.permute.xlu0 %3335  ;;  %v3414_v16 = vpop.permute.xlu1 %3413 }
 0xf15   :  { %7219 = vmatmul.mubr.msk.f32.vlgmr.msra.gmra.mxu1 %vm2937_vm8, %v2933_v0 }
 0xf16   :  { %v7561_v1 = vpop.eup %7560  ;;  %7227 = vmatpush3.msra.mxu1 %v6548_v29 }
 0xf17   :  { %v2934_v4 = vmul.f32 %v7561_v1, %v7553_v23  ;;  %7228 = vmatprep.subr.mxu1 %v6547_v38 }
 0xf18   :  { %v3494_v55 = vpop.permute.xlu0 %3493  ;;  %7229 = vmatpush3.msra.mxu1 %v6547_v38  ;;  %v3572_v32 = vpop.permute.xlu1 %3571 }
 0xf19   :  { %7224 = vmatmul.mubr.msk.f32.vlgmr.msra.gmra.mxu0 %vm2937_vm8, %v2934_v4  ;;  %7238 = vmatprep.subr.mxu1 %v7670_v40 }
 0xf1a   :  { %7234 = vmatpush3.xpose.msk.msra.mxu0 %vm410_vm2, %v3338_v61  ;;  %7235 = vmatprep.mubr.msk.f32.mxu0 %vm7671_vm1, %v7670_v40 }
 0xf1b   :  { %7243 = vmatprep.subr.mxu0 %v7670_v40 }
 0xf1c   :  { %v3492_v7 = vpop.permute.xlu0 %3491  ;;  %v3570_v41 = vpop.permute.xlu1 %3569 }
 0xf1d   :  { %7236 = vmatmul.mubr.msk.f32.vlgmr.msra.gmra.mxu0 %vm410_vm2, %v3336_v51 }
 0xf1e   :  { %7244 = vmatpush3.xpose.msk.msra.mxu0 %vm410_vm2, %v3494_v55  ;;  %7245 = vmatprep.mubr.msk.f32.mxu0 %vm7671_vm1, %v7670_v40 }
 0xf1f   :  { %7253 = vmatprep.subr.mxu0 %v7670_v40 }
 0xf21   :  { %7246 = vmatmul.mubr.msk.f32.vlgmr.msra.gmra.mxu0 %vm410_vm2, %v3492_v7 }
 0xf22   :  { %7255 = vmatprep.mubr.msk.f32.mxu0 %vm7671_vm1, %v7670_v40 }
 0xfcd   :  { %v3009_v9 = vpop.f32.mrf.mxu1 }
 0xfcf   :  { %v7210_v59 = vpop.f32.mrf.mxu1 }
 0xfd1   :  { %v3086_v50 = vpop.f32.mrf.mxu0 }
 0xfd2   :  { %v3248_v13 = vcombine.low %v3009_v9, %v3086_v50 }
 0xfd3   :  { %v7215_v14 = vpop.f32.mrf.mxu0 }
 0xfd4   :  { %7230 = vmatprep.mubr.msk.f32.mxu1 %vm410_vm2, %v3248_v13 }
 0xfd5   :  { %v3163_v15 = vpop.f32.mrf.mxu1 }
 0xfd7   :  { %v7220_v18 = vpop.f32.mrf.mxu1 }
 0xfd9   :  { %v3240_v21 = vpop.f32.mrf.mxu0 }
 0xfda   :  { %v3249_v27 = vcombine.low %v3163_v15, %v3240_v21 }
 0xfdb   :  { %v7225_v31 = vpop.f32.mrf.mxu0 }
 0xfdc   :  { %7231 = vmatmul.mubr.msk.f32.vlgmr.msra.gmra.mxu1 %vm410_vm2, %v3249_v27 }
 0xfdd   :  { %7239 = vmatpush3.xpose.msk.msra.mxu1 %vm410_vm2, %v3416_v11  ;;  %v3409_v33 = vpop.f32.mrf.mxu0  ;;  %7240 = vmatprep.mubr.msk.f32.mxu1 %vm7671_vm1, %v7670_v40 }
 0xfde   :  { %v3647_v34 = vmul.f32 0.25, %v3409_v33  ;;  %7248 = vmatprep.subr.mxu1 %v7670_v40 }
 0xfdf   :  { %v7237_v35 = vpop.f32.mrf.mxu0 }
 0xfe0   :  { %7241 = vmatmul.mubr.msk.f32.vlgmr.msra.gmra.mxu1 %vm410_vm2, %v3414_v16  ;;  %v3651_v36 = vsel %vm2890_vm7, %v3647_v34, -inf }
 0xfe1   :  { %7249 = vmatpush3.xpose.msk.msra.mxu1 %vm410_vm2, %v3572_v32  ;;  %3652 = vmax.xlane.f32.xlu0 %v3651_v36  ;;  %v3565_v37 = vpop.f32.mrf.mxu0 }
 0xfe2   :  { %v3649_v39 = vmul.f32 0.25, %v3565_v37  ;;  %7250 = vmatprep.mubr.msk.f32.mxu1 %vm7671_vm1, %v7670_v40  ;;  %7258 = vmatprep.subr.mxu1 %v7670_v40 }
 0xfe3   :  { %v7247_v3 = vpop.f32.mrf.mxu0 }
 0xfe4   :  { %7251 = vmatmul.mubr.msk.f32.vlgmr.msra.gmra.mxu1 %vm410_vm2, %v3570_v41  ;;  %v3657_v44 = vsel %vm2890_vm7, %v3649_v39, -inf }
 0xfe5   :  { %3658 = vmax.xlane.f32.xlu0 %v3657_v44  ;;  %7260 = vmatprep.mubr.msk.f32.mxu1 %vm7671_vm1, %v7670_v40 }
0x106a   :  { %v3653_v42 = vpop.xlane.xlu0 %3652 }
0x106b   :  { %v3663_v23 = vsub.f32 %v3647_v34, %v3653_v42  ;;  %v6550_v42 = vld [vmem:[%s8996_s4 + $0x38] sm:$0xff] }
0x106d   :  { %v3667_v17 = vmul.f32 1.442695, %v3663_v23  ;;  %v6549_v23 = vld [vmem:[%s8996_s4 + $0x30] sm:$0xff] }
0x106e   :  { %v3659_v8 = vpop.xlane.xlu0 %3658 }
0x106f   :  { %v3665_v12 = vsub.f32 %v3649_v39, %v3659_v8  ;;  %7562 = vpow2.f32 %v3667_v17 }
0x1071   :  { %v3671_v28 = vmul.f32 1.442695, %v3665_v12 }
0x1073   :  { %7564 = vpow2.f32 %v3671_v28 }
0x107c   :  { %v7563_v58 = vpop.eup %7562 }
0x107d   :  { %v3675_v51 = vsel %vm2890_vm7, %v7563_v58, 0.0 }
0x1080   :  { %v7565_v1 = vpop.eup %7564 }
0x1081   :  { %v3681_v4 = vsel %vm2890_vm7, %v7565_v1, 0.0 }
0x109c   :  { %v8497_v22 = vpop.f32.mrf.mxu1 }
0x109e   :  { %v8499_v47 = vpop.f32.mrf.mxu1 }
0x10a0   :  { %v3487_v53 = vpop.f32.mrf.mxu1 }
0x10a1   :  { %v3648_v54 = vmul.f32 0.25, %v3487_v53 }
0x10a2   :  { %v7242_v52 = vpop.f32.mrf.mxu1 }
0x10a3   :  { %v3654_v60 = vsel %vm2890_vm7, %v3648_v54, -inf }
0x10a4   :  { %3655 = vmax.xlane.f32.xlu1 %v3654_v60  ;;  %v3643_v61 = vpop.f32.mrf.mxu1 }
0x10a5   :  { %v3650_v45 = vmul.f32 0.25, %v3643_v61  ;;  %v4101_v61 = vrot.slane %v8371_v20, %v8181_v26 }
0x10a6   :  { %v7252_v62 = vpop.f32.mrf.mxu1 }
0x10a7   :  { %v3660_v0 = vsel %vm2890_vm7, %v3650_v45, -inf  ;;  %v3332_v62 = vcombine.high %v8497_v22, %v8497_v22 }
0x10a8   :  { %3661 = vmax.xlane.f32.xlu0 %v3660_v0  ;;  %3676 = vadd.xlane.f32.xlu1 %v3675_v51  ;;  %v3331_v0 = vcombine.high %v8499_v47, %v8499_v47 }
0x10ac   :  { %3682 = vadd.xlane.f32.xlu1 %v3681_v4 }
0x10bd   :  { %3695 = vrot.lane.b32.xlu1 %v8375_v30, %s7676_s17 }
0x10c1   :  { %3849 = vrot.lane.b32.xlu1 %v8381_v48, %s7676_s17 }
0x10c5   :  { %3926 = vrot.lane.b32.xlu1 %v8387_v49, %s7676_s17 }
0x112d   :  { %v3656_v55 = vpop.xlane.xlu1 %3655 }
0x112e   :  { %v3664_v7 = vsub.f32 %v3648_v54, %v3656_v55 }
0x1130   :  { %v3669_v29 = vmul.f32 1.442695, %v3664_v7 }
0x1131   :  { %v3677_v38 = vpop.xlane.xlu1 %3676  ;;  %v3662_v9 = vpop.xlane.xlu0 %3661 }
0x1132   :  { %7566 = vpow2.f32 %v3669_v29  ;;  %v3666_v59 = vsub.f32 %v3650_v45, %v3662_v9 }
0x1133   :  { %7568 = vrcp.f32 %v3677_v38 }
0x1134   :  { %v3673_v11 = vmul.f32 1.442695, %v3666_v59 }
0x1135   :  { %v3683_v50 = vpop.xlane.xlu1 %3682 }
0x1136   :  { %7570 = vpow2.f32 %v3673_v11 }
0x1137   :  { %7572 = vrcp.f32 %v3683_v50 }
0x1139   :  { %v3696_v13 = vpop.permute.xlu1 %3695 }
0x113a   :  { %7254 = vmatpush3.msk.msra.mxu0 %vm855_vm4, %v3696_v13 }
0x113b   :  { %7263 = vmatprep.subr.mxu0 %v7670_v40 }
0x113d   :  { %v3850_v16 = vpop.permute.xlu1 %3849 }
0x113f   :  { %v7567_v30 = vpop.eup %7566 }
0x1140   :  { %v7569_v48 = vpop.eup %7568  ;;  %v3678_v49 = vsel %vm2890_vm7, %v7567_v30, 0.0 }
0x1141   :  { %3679 = vadd.xlane.f32.xlu0 %v3678_v49  ;;  %v3691_v14 = vmul.f32 %v7569_v48, %v7563_v58  ;;  %v3927_v36 = vpop.permute.xlu1 %3926 }
0x1143   :  { %v7571_v15 = vpop.eup %7570  ;;  %7256 = vmatmul.mubr.msk.f32.vlgmr.msra.gmra.mxu0 %vm2937_vm8, %v3691_v14 }
0x1144   :  { %v7573_v18 = vpop.eup %7572  ;;  %7264 = vmatpush3.msk.msra.mxu0 %vm855_vm4, %v3850_v16  ;;  %7265 = vmatprep.mubr.msk.f32.mxu0 %vm7671_vm1, %v7670_v40  ;;  %v3684_v21 = vsel %vm2890_vm7, %v7571_v15, 0.0 }
0x1145   :  { %3685 = vadd.xlane.f32.xlu0 %v3684_v21  ;;  %v3693_v27 = vmul.f32 %v7573_v18, %v7565_v1  ;;  %7273 = vmatprep.subr.mxu0 %v6550_v42 }
0x1147   :  { %7266 = vmatmul.mubr.msk.f32.vlgmr.msra.gmra.mxu0 %vm2937_vm8, %v3693_v27 }
0x1148   :  { %7274 = vmatpush3.msra.mxu0 %v6550_v42  ;;  %v6551_v42 = vld [vmem:[%s8997_s5 + $0x20] sm:$0xff] }
0x1149   :  { %7275 = vmatprep.subr.mxu0 %v6549_v23 }
0x114a   :  { %7276 = vmatpush3.msra.mxu0 %v6549_v23  ;;  %v6570_v23 = vld [vmem:[%s8998_s6 + $0xf8] sm:$0xff] }
0x114b   :  { %7291 = vmatprep.subr.mxu0 %v6570_v23 }
0x115b   :  { %3772 = vrot.lane.b32.xlu0 %v8377_v46, %s7676_s17 }
0x11ca   :  { %v3680_v31 = vpop.xlane.xlu0 %3679 }
0x11cb   :  { %7574 = vrcp.f32 %v3680_v31 }
0x11ce   :  { %v3686_v32 = vpop.xlane.xlu0 %3685 }
0x11cf   :  { %7576 = vrcp.f32 %v3686_v32 }
0x11d2   :  { %v3773_v33 = vpop.permute.xlu0 %3772 }
0x11d3   :  { %7259 = vmatpush3.msk.msra.mxu1 %vm855_vm4, %v3773_v33 }
0x11d4   :  { %7268 = vmatprep.subr.mxu1 %v7670_v40 }
0x11d8   :  { %v7575_v34 = vpop.eup %7574 }
0x11d9   :  { %v3692_v35 = vmul.f32 %v7575_v34, %v7567_v30 }
0x11db   :  { %7261 = vmatmul.mubr.msk.f32.vlgmr.msra.gmra.mxu1 %vm2937_vm8, %v3692_v35 }
0x11dc   :  { %v7577_v37 = vpop.eup %7576  ;;  %7269 = vmatpush3.msk.msra.mxu1 %vm855_vm4, %v3927_v36  ;;  %7270 = vmatprep.mubr.msk.f32.mxu1 %vm7671_vm1, %v7670_v40 }
0x11dd   :  { %v3694_v46 = vmul.f32 %v7577_v37, %v7571_v15 }
0x11df   :  { %7271 = vmatmul.mubr.msk.f32.vlgmr.msra.gmra.mxu1 %vm2937_vm8, %v3694_v46 }
0x1203   :  { %v3768_v39 = vpop.f32.mrf.mxu0 }
0x1205   :  { %v7257_v41 = vpop.f32.mrf.mxu0 }
0x1206   :  { %v6554_v41 = vld [vmem:[%s8997_s5 + $0x38] sm:$0xff] }
0x1207   :  { %v3922_v3 = vpop.f32.mrf.mxu0  ;;  %7280 = vmatprep.subr.mxu1 %v6554_v41 }
0x1208   :  { %7281 = vmatpush3.msra.mxu1 %v6554_v41 }
0x1209   :  { %v7267_v44 = vpop.f32.mrf.mxu0 }
0x120a   :  { %v6552_v44 = vld [vmem:[%s8997_s5 + $0x28] sm:$0xff] }
0x129b   :  { %v3845_v8 = vpop.f32.mrf.mxu1 }
0x129c   :  { %v4007_v17 = vcombine.low %v3768_v39, %v3845_v8  ;;  %v6569_v8 = vld [vmem:[%s8998_s6 + $0xf0] sm:$0xff] }
0x129d   :  { %v7262_v12 = vpop.f32.mrf.mxu1 }
0x129e   :  { %7277 = vmatprep.mubr.msk.f32.mxu0 %vm410_vm2, %v4007_v17  ;;  %v6568_v17 = vld [vmem:[%s8998_s6 + $0xe8] sm:$0xff]  ;;  %v6567_v12 = vld [vmem:[%s8998_s6 + $0xe0] sm:$0xff] }
0x129f   :  { %v3999_v28 = vpop.f32.mrf.mxu1 }
0x12a0   :  { %v4008_v53 = vcombine.low %v3922_v3, %v3999_v28  ;;  %v6553_v3 = vld [vmem:[%s8997_s5 + $0x30] sm:$0xff]  ;;  %v6566_v28 = vld [vmem:[%s8998_s6 + $0xd8] sm:$0xff] }
0x12a1   :  { %v7272_v54 = vpop.f32.mrf.mxu1  ;;  %7282 = vmatprep.subr.mxu1 %v6553_v3 }
0x12a2   :  { %7278 = vmatmul.mubr.msk.f32.vlgmr.msra.gmra.mxu0 %vm410_vm2, %v4008_v53  ;;  %7283 = vmatpush3.msra.mxu1 %v6553_v3  ;;  %v6565_v53 = vld [vmem:[%s8998_s6 + $0xd0] sm:$0xff]  ;;  %v6564_v54 = vld [vmem:[%s8998_s6 + $0xc8] sm:$0xff] }
0x12a3   :  { %7284 = vmatprep.subr.mxu1 %v6552_v44  ;;  %7292 = vmatpush3.msra.mxu0 %v6570_v23 }
0x12a4   :  { %7285 = vmatpush3.msra.mxu1 %v6552_v44  ;;  %7293 = vmatprep.subr.mxu0 %v6569_v8 }
0x12a5   :  { %7286 = vmatprep.subr.mxu1 %v6551_v42  ;;  %7294 = vmatpush3.msra.mxu0 %v6569_v8 }
0x12a6   :  { %7287 = vmatpush3.msra.mxu1 %v6551_v42  ;;  %7295 = vmatprep.subr.mxu0 %v6568_v17 }
0x12a7   :  { %7296 = vmatpush3.msra.mxu0 %v6568_v17 }
0x12a8   :  { %7297 = vmatprep.subr.mxu0 %v6567_v12 }
0x12a9   :  { %7298 = vmatpush3.msra.mxu0 %v6567_v12 }
0x12aa   :  { %7299 = vmatprep.subr.mxu0 %v6566_v28 }
0x12ab   :  { %7300 = vmatpush3.msra.mxu0 %v6566_v28 }
0x12ac   :  { %7301 = vmatprep.subr.mxu0 %v6565_v53 }
0x12ad   :  { %7302 = vmatpush3.msra.mxu0 %v6565_v53 }
0x12ae   :  { %7303 = vmatprep.subr.mxu0 %v6564_v54 }
0x12af   :  { %7304 = vmatpush3.msra.mxu0 %v6564_v54 }
0x1362   :  { %v7279_v52 = vpop.f32.mrf.mxu0 }
0x1363   :  { %v4091_v60 = vcombine.high %v7279_v52, %v7279_v52  ;;  %v4096_v58 = vadd.f32 %v7279_v52, %v8497_v22  ;;  %v6563_v52 = vld [vmem:[%s8998_s6 + $0xc0] sm:$0xff] }
0x1364   :  { %v4079_v45 = vpop.f32.mrf.mxu0  ;;  %7305 = vmatprep.subr.mxu0 %v6563_v52 }
0x1365   :  { %v4090_v51 = vcombine.high %v4079_v45, %v4079_v45  ;;  %v4094_v1 = vadd.f32 %v4079_v45, %v8499_v47  ;;  %v4097_v4 = vadd.f32 %v4091_v60, %v3332_v62  ;;  %v4104_v55 = vadd.f32 %v4101_v61, %v4096_v58  ;;  %v6562_v60 = vld [vmem:[%s8998_s6 + $0xb8] sm:$0xff]  ;;  %7306 = vmatpush3.msra.mxu0 %v6563_v52  ;;  %v6561_v58 = vld [vmem:[%s8998_s6 + $0xb0] sm:$0xff] }
0x1366   :  { %7307 = vmatprep.subr.mxu0 %v6562_v60 }
0x1367   :  { %v4095_v7 = vadd.f32 %v4090_v51, %v3331_v0  ;;  %v4102_v29 = vadd.f32 %v4101_v61, %v4094_v1  ;;  %v4108_v50 = vadd.f32 %v4104_v55, %v8359_v10  ;;  %v4105_v22 = vadd.f32 %v4101_v61, %v4097_v4  ;;  %7308 = vmatpush3.msra.mxu0 %v6562_v60 }
0x1368   :  { %7309 = vmatprep.subr.mxu0 %v6561_v58 }
0x1369   :  { %v4106_v38 = vadd.f32 %v4102_v29, %v8352_v57  ;;  %v4103_v9 = vadd.f32 %v4101_v61, %v4095_v7  ;;  %v4116_v47 = vsel %vm2103_vm6, %v4108_v50, 0.0  ;;  %v4109_v30 = vadd.f32 %v4105_v22, %v8361_v24  ;;  %7310 = vmatpush3.msra.mxu0 %v6561_v58 }
0x136a   :  { %v4373_v58 = vrot.slane %v8371_v20, %v8317_v25 }
0x136b   :  { %v4110_v59 = vsel %vm2103_vm6, %v4106_v38, 0.0  ;;  %v4107_v11 = vadd.f32 %v4103_v9, %v8354_v63  ;;  %v4119_v48 = vsel %vm2103_vm6, %v4109_v30, 0.0 }
0x136c   :  { %4111 = vadd.xlane.f32.xlu0 %v4110_v59  ;;  %v4165_v59 = vrot.slane %v8371_v20, %v8270_v5 }
0x136d   :  { %v4113_v13 = vsel %vm2103_vm6, %v4107_v11, 0.0 }
0x136e   :  { %4114 = vadd.xlane.f32.xlu1 %v4113_v13 }
0x1370   :  { %4117 = vadd.xlane.f32.xlu0 %v4116_v47 }
0x1374   :  { %4120 = vadd.xlane.f32.xlu0 %v4119_v48 }
0x13f5   :  { %v4112_v57 = vpop.xlane.xlu0 %4111 }
0x13f6   :  { %v4122_v49 = vmul.f32 0.03125, %v4112_v57 }
0x13f7   :  { %v4115_v14 = vpop.xlane.xlu1 %4114 }
0x13f8   :  { %v8553_v15 = vsub.f32 %v4106_v38, %v4122_v49  ;;  %v4123_v63 = vmul.f32 0.03125, %v4115_v14 }
0x13f9   :  { %v4118_v10 = vpop.xlane.xlu0 %4117 }
0x13fa   :  { %v8555_v16 = vsub.f32 %v4107_v11, %v4123_v63  ;;  %v4124_v18 = vmul.f32 0.03125, %v4118_v10  ;;  %v4130_v21 = vmul.f32 %v8553_v15, %v8553_v15 }
0x13fc   :  { %v8559_v27 = vsub.f32 %v4108_v50, %v4124_v18  ;;  %v4134_v24 = vsel %vm2103_vm6, %v4130_v21, 0.0  ;;  %v4131_v31 = vmul.f32 %v8555_v16, %v8555_v16 }
0x13fd   :  { %v4121_v32 = vpop.xlane.xlu0 %4120  ;;  %4135 = vadd.xlane.f32.xlu1 %v4134_v24 }
0x13fe   :  { %v4125_v33 = vmul.f32 0.03125, %v4121_v32  ;;  %v4137_v34 = vsel %vm2103_vm6, %v4131_v31, 0.0  ;;  %v4132_v35 = vmul.f32 %v8559_v27, %v8559_v27 }
0x13ff   :  { %4138 = vadd.xlane.f32.xlu0 %v4137_v34  ;;  %v6558_v34 = vld [vmem:[%s8998_s6 + $0x98] sm:$0xff] }
0x1400   :  { %v8567_v36 = vsub.f32 %v4109_v30, %v4125_v33  ;;  %v4140_v37 = vsel %vm2103_vm6, %v4132_v35, 0.0  ;;  %v4173_v30 = vrot.slane %v8371_v20, %v8280_v56  ;;  %v6559_v33 = vld [vmem:[%s8998_s6 + $0xa0] sm:$0xff]  ;;  %v6557_v35 = vld [vmem:[%s8998_s6 + $0x90] sm:$0xff] }
0x1401   :  { %4141 = vadd.xlane.f32.xlu1 %v4140_v37  ;;  %v6555_v37 = vld [vmem:[%s8998_s6 + $0x80] sm:$0xff] }
0x1402   :  { %v4133_v46 = vmul.f32 %v8567_v36, %v8567_v36 }
0x1404   :  { %v4143_v39 = vsel %vm2103_vm6, %v4133_v46, 0.0 }
0x1405   :  { %4144 = vadd.xlane.f32.xlu0 %v4143_v39  ;;  %v4272_v39 = vrot.slane %v8371_v20, %v8310_v6 }
0x1486   :  { %v4136_v61 = vpop.xlane.xlu1 %4135 }
0x1487   :  { %v4146_v45 = vmul.f32 0.03125, %v4136_v61 }
0x1488   :  { %v4139_v62 = vpop.xlane.xlu0 %4138 }
0x1489   :  { %v4150_v0 = vadd.f32 1e-05, %v4146_v45  ;;  %v4147_v51 = vmul.f32 0.03125, %v4139_v62 }
0x148a   :  { %v4142_v1 = vpop.xlane.xlu1 %4141 }
0x148b   :  { %7578 = vrsqrt.f32 %v4150_v0  ;;  %v4151_v4 = vadd.f32 1e-05, %v4147_v51  ;;  %v4148_v55 = vmul.f32 0.03125, %v4142_v1 }
0x148d   :  { %7580 = vrsqrt.f32 %v4151_v4  ;;  %v4152_v7 = vadd.f32 1e-05, %v4148_v55 }
0x148e   :  { %v4145_v29 = vpop.xlane.xlu0 %4144 }
0x148f   :  { %7582 = vrsqrt.f32 %v4152_v7  ;;  %v4149_v38 = vmul.f32 0.03125, %v4145_v29 }
0x1491   :  { %v4153_v9 = vadd.f32 1e-05, %v4149_v38 }
0x1493   :  { %7584 = vrsqrt.f32 %v4153_v9 }
0x1498   :  { %v7579_v11 = vpop.eup %7578 }
0x1499   :  { %v4158_v50 = vmul.f32 %v7579_v11, %v8553_v15 }
0x149a   :  { %v7581_v22 = vpop.eup %7580 }
0x149b   :  { %v4159_v13 = vmul.f32 %v7581_v22, %v8555_v16  ;;  %v4166_v47 = vmul.f32 %v4165_v59, %v4158_v50 }
0x149c   :  { %v7583_v48 = vpop.eup %7582 }
0x149d   :  { %v4160_v57 = vmul.f32 %v7583_v48, %v8559_v27  ;;  %v4167_v49 = vmul.f32 %v4165_v59, %v4159_v13  ;;  %v4174_v14 = vadd.f32 %v4173_v30, %v4166_v47  ;;  %v6560_v27 = vld [vmem:[%s8998_s6 + $0xa8] sm:$0xff] }
0x149e   :  { %7311 = vmatprep.subr.mxu0 %v6560_v27 }
0x149f   :  { %v4175_v63 = vadd.f32 %v4173_v30, %v4167_v49  ;;  %v4168_v24 = vmul.f32 %v4165_v59, %v4160_v57  ;;  %7312 = vmatpush3.msra.mxu0 %v6560_v27 }
0x14a0   :  { %v7585_v10 = vpop.eup %7584  ;;  %7313 = vmatprep.subr.mxu0 %v6559_v33 }
0x14a1   :  { %v4161_v18 = vmul.f32 %v7585_v10, %v8567_v36  ;;  %v4182_v21 = vcombine.low %v4174_v14, %v4175_v63  ;;  %v4176_v31 = vadd.f32 %v4173_v30, %v4168_v24  ;;  %7314 = vmatpush3.msra.mxu0 %v6559_v33  ;;  %v6556_v36 = vld [vmem:[%s8998_s6 + $0x88] sm:$0xff] }
0x14a2   :  { %7315 = vmatprep.subr.mxu0 %v6558_v34 }
0x14a3   :  { %7288 = vmatprep.mubr.msk.f32.mxu1 %vm85_vm0, %v4182_v21  ;;  %v4169_v15 = vmul.f32 %v4165_v59, %v4161_v18  ;;  %7316 = vmatpush3.msra.mxu0 %v6558_v34 }
0x14a4   :  { %7317 = vmatprep.subr.mxu0 %v6557_v35 }
0x14a5   :  { %v4177_v16 = vadd.f32 %v4173_v30, %v4169_v15  ;;  %7318 = vmatpush3.msra.mxu0 %v6557_v35  ;;  %v6615_v35 = vld [vmem:[%s8995_s3 + $0x58] sm:$0xff] }
0x14a6   :  { %7319 = vmatprep.subr.mxu0 %v6556_v36  ;;  %7326 = vmatprep.subr.mxu1 %v6615_v35 }
0x14a7   :  { %v4183_v32 = vcombine.low %v4176_v31, %v4177_v16  ;;  %7320 = vmatpush3.msra.mxu0 %v6556_v36  ;;  %v6614_v36 = vld [vmem:[%s8995_s3 + $0x50] sm:$0xff] }
0x14a8   :  { %7321 = vmatprep.subr.mxu0 %v6555_v37 }
0x14a9   :  { %7289 = vmatmul.mubr.msk.f32.vlgmr.msra.gmra.mxu1 %vm85_vm0, %v4183_v32  ;;  %7322 = vmatpush3.msra.mxu0 %v6555_v37  ;;  %v6613_v37 = vld [vmem:[%s8995_s3 + $0x48] sm:$0xff] }
0x14aa   :  { %7362 = vmatprep.subr.mxu0 %v7670_v40  ;;  %7327 = vmatpush3.msra.mxu1 %v6615_v35 }
0x14ab   :  { %7328 = vmatprep.subr.mxu1 %v6614_v36 }
0x14ac   :  { %7329 = vmatpush3.msra.mxu1 %v6614_v36 }
0x14ad   :  { %7330 = vmatprep.subr.mxu1 %v6613_v37 }
0x14ae   :  { %7331 = vmatpush3.msra.mxu1 %v6613_v37 }
0x1569   :  { %v7290_v46 = vpop.f32.mrf.mxu1 }
0x156a   :  { %v4266_v41 = vcombine.high %v7290_v46, %v7290_v46  ;;  %v4275_v8 = vadd.f32 %v7290_v46, %v4272_v39  ;;  %v6612_v46 = vld [vmem:[%s8995_s3 + $0x40] sm:$0xff] }
0x156b   :  { %v4254_v3 = vpop.f32.mrf.mxu1  ;;  %7332 = vmatprep.subr.mxu1 %v6612_v46 }
0x156c   :  { %v4276_v44 = vadd.f32 %v4272_v39, %v4266_v41  ;;  %v4265_v42 = vcombine.high %v4254_v3, %v4254_v3  ;;  %v4273_v23 = vadd.f32 %v4272_v39, %v4254_v3  ;;  %v4279_v54 = vmax.f32 %v4275_v8, 0.0  ;;  %7333 = vmatpush3.msra.mxu1 %v6612_v46 }
0x156d   :  { %7337 = vmatprep.subr.mxu1 %v7670_v40 }
0x156e   :  { %v4274_v17 = vadd.f32 %v4272_v39, %v4265_v42  ;;  %v4280_v12 = vmax.f32 %v4276_v44, 0.0  ;;  %v4277_v28 = vmax.f32 %v4273_v23, 0.0 }
0x1570   :  { %v4278_v53 = vmax.f32 %v4274_v17, 0.0  ;;  %v4286_v60 = vcombine.low %v4279_v54, %v4280_v12 }
0x1572   :  { %v4285_v52 = vcombine.low %v4277_v28, %v4278_v53 }
0x1574   :  { %7323 = vmatprep.mubr.f32.mxu0 %v4285_v52  ;;  %v7647_v52 = vld [vmem:[%s8999_s7 + $0x8] sm:$0xff] }
0x1575   :  { %7324 = vmatmul.mubr.f32.vlgmr.msra.gmra.mxu0 %v4286_v60  ;;  %v4437_v60 = vrot.slane %v7647_v52, %v8343_v19 }
0x1576   :  { %7364 = vmatprep.mubr.msk.f32.mxu0 %vm7671_vm1, %v7670_v40 }
0x1635   :  { %v7325_v61 = vpop.f32.mrf.mxu0 }
0x1636   :  { %v4367_v45 = vcombine.high %v7325_v61, %v7325_v61  ;;  %v4376_v0 = vadd.f32 %v7325_v61, %v4373_v58 }
0x1637   :  { %v4355_v62 = vpop.f32.mrf.mxu0 }
0x1638   :  { %v4366_v51 = vcombine.high %v4355_v62, %v4355_v62  ;;  %v4374_v1 = vadd.f32 %v4373_v58, %v4355_v62  ;;  %v4377_v4 = vadd.f32 %v4373_v58, %v4367_v45  ;;  %v4380_v9 = vadd.f32 %v4376_v0, %v4176_v31 }
0x163a   :  { %v4375_v55 = vadd.f32 %v4373_v58, %v4366_v51  ;;  %v4378_v7 = vadd.f32 %v4374_v1, %v4174_v14  ;;  %v4381_v11 = vadd.f32 %v4377_v4, %v4177_v16  ;;  %v4388_v20 = vsel %vm2103_vm6, %v4380_v9, 0.0 }
0x163b   :  { %v4445_v51 = vrot.slane %v7647_v52, %v8348_v2 }
0x163c   :  { %v4382_v29 = vsel %vm2103_vm6, %v4378_v7, 0.0  ;;  %v4379_v38 = vadd.f32 %v4375_v55, %v4175_v63  ;;  %v4391_v50 = vsel %vm2103_vm6, %v4381_v11, 0.0 }
0x163d   :  { %4383 = vadd.xlane.f32.xlu1 %v4382_v29 }
0x163e   :  { %v4385_v59 = vsel %vm2103_vm6, %v4379_v38, 0.0 }
0x163f   :  { %4386 = vadd.xlane.f32.xlu0 %v4385_v59 }
0x1641   :  { %4389 = vadd.xlane.f32.xlu1 %v4388_v20 }
0x1643   :  { %4392 = vadd.xlane.f32.xlu0 %v4391_v50 }
0x16c6   :  { %v4384_v22 = vpop.xlane.xlu1 %4383 }
0x16c7   :  { %v4394_v13 = vmul.f32 0.03125, %v4384_v22 }
0x16c8   :  { %v4387_v47 = vpop.xlane.xlu0 %4386 }
0x16c9   :  { %v4398_v30 = vsub.f32 %v4378_v7, %v4394_v13  ;;  %v4395_v48 = vmul.f32 0.03125, %v4387_v47  ;;  %v8695_v47 = vld [vmem:[%s8999_s7 + $0x10] sm:$0xff] }
0x16ca   :  { %v4390_v57 = vpop.xlane.xlu1 %4389 }
0x16cb   :  { %v4399_v49 = vsub.f32 %v4379_v38, %v4395_v48  ;;  %v4396_v14 = vmul.f32 0.03125, %v4390_v57  ;;  %v4402_v63 = vmul.f32 %v4398_v30, %v4398_v30  ;;  %v4578_v48 = vrot.slane %v8695_v47, %v7801_v43 }
0x16cc   :  { %v4393_v10 = vpop.xlane.xlu0 %4392 }
0x16cd   :  { %v4400_v18 = vsub.f32 %v4380_v9, %v4396_v14  ;;  %v4397_v21 = vmul.f32 0.03125, %v4393_v10  ;;  %v4406_v24 = vsel %vm2103_vm6, %v4402_v63, 0.0  ;;  %v4403_v15 = vmul.f32 %v4399_v49, %v4399_v49 }
0x16ce   :  { %4407 = vadd.xlane.f32.xlu1 %v4406_v24 }
0x16cf   :  { %v4401_v31 = vsub.f32 %v4381_v11, %v4397_v21  ;;  %v4409_v16 = vsel %vm2103_vm6, %v4403_v15, 0.0  ;;  %v4404_v32 = vmul.f32 %v4400_v18, %v4400_v18 }
0x16d0   :  { %4410 = vadd.xlane.f32.xlu0 %v4409_v16 }
0x16d1   :  { %v4412_v27 = vsel %vm2103_vm6, %v4404_v32, 0.0  ;;  %v4405_v33 = vmul.f32 %v4401_v31, %v4401_v31 }
0x16d2   :  { %4413 = vadd.xlane.f32.xlu1 %v4412_v27 }
0x16d3   :  { %v4415_v34 = vsel %vm2103_vm6, %v4405_v33, 0.0 }
0x16d4   :  { %4416 = vadd.xlane.f32.xlu0 %v4415_v34 }
0x1757   :  { %v4408_v39 = vpop.xlane.xlu1 %4407 }
0x1758   :  { %v4418_v41 = vmul.f32 0.03125, %v4408_v39 }
0x1759   :  { %v4411_v3 = vpop.xlane.xlu0 %4410 }
0x175a   :  { %v4422_v44 = vadd.f32 1e-05, %v4418_v41  ;;  %v4419_v42 = vmul.f32 0.03125, %v4411_v3 }
0x175b   :  { %v4414_v23 = vpop.xlane.xlu1 %4413 }
0x175c   :  { %7586 = vrsqrt.f32 %v4422_v44  ;;  %v4423_v8 = vadd.f32 1e-05, %v4419_v42  ;;  %v4420_v17 = vmul.f32 0.03125, %v4414_v23 }
0x175d   :  { %v4417_v12 = vpop.xlane.xlu0 %4416 }
0x175e   :  { %7588 = vrsqrt.f32 %v4423_v8  ;;  %v4424_v28 = vadd.f32 1e-05, %v4420_v17  ;;  %v4421_v53 = vmul.f32 0.03125, %v4417_v12 }
0x1760   :  { %7590 = vrsqrt.f32 %v4424_v28  ;;  %v4425_v54 = vadd.f32 1e-05, %v4421_v53 }
0x1762   :  { %7592 = vrsqrt.f32 %v4425_v54 }
0x1769   :  { %v7587_v58 = vpop.eup %7586 }
0x176a   :  { %v4430_v61 = vmul.f32 %v7587_v58, %v4398_v30 }
0x176b   :  { %v7589_v45 = vpop.eup %7588 }
0x176c   :  { %v4431_v62 = vmul.f32 %v7589_v45, %v4399_v49  ;;  %v4438_v0 = vmul.f32 %v4437_v60, %v4430_v61 }
0x176d   :  { %v7591_v1 = vpop.eup %7590 }
0x176e   :  { %v4432_v4 = vmul.f32 %v7591_v1, %v4400_v18  ;;  %v4439_v55 = vmul.f32 %v4437_v60, %v4431_v62  ;;  %v8676_v38 = vadd.f32 %v4445_v51, %v4438_v0 }
0x176f   :  { %v7593_v7 = vpop.eup %7592 }
0x1770   :  { %v4433_v29 = vmul.f32 %v7593_v7, %v4401_v31  ;;  %v8678_v9 = vadd.f32 %v4445_v51, %v4439_v55  ;;  %v4440_v59 = vmul.f32 %v4437_v60, %v4432_v4 }
0x1772   :  { %v4488_v11 = vcombine.low %v8676_v38, %v8678_v9  ;;  %v4441_v20 = vmul.f32 %v4437_v60, %v4433_v29  ;;  %v8683_v50 = vadd.f32 %v4445_v51, %v4440_v59 }
0x1774   :  { %7334 = vmatprep.mubr.msk.f32.mxu1 %vm85_vm0, %v4488_v11  ;;  %v8685_v22 = vadd.f32 %v4445_v51, %v4441_v20 }
0x1776   :  { %v4489_v13 = vcombine.low %v8683_v50, %v8685_v22 }
0x1778   :  { %7335 = vmatmul.mubr.msk.f32.vlgmr.msra.gmra.mxu1 %vm85_vm0, %v4489_v13 }
0x1779   :  { %7339 = vmatprep.mubr.msk.f32.mxu1 %vm7671_vm1, %v7670_v40 }
0x1838   :  { %v7336_v30 = vpop.f32.mrf.mxu1 }
0x1839   :  { %v4572_v10 = vcombine.high %v7336_v30, %v7336_v30  ;;  %v8705_v18 = vadd.f32 %v7336_v30, %v4578_v48 }
0x183a   :  { %v4560_v57 = vpop.f32.mrf.mxu1 }
0x183b   :  { %v4571_v49 = vcombine.high %v4560_v57, %v4560_v57  ;;  %v8699_v14 = vadd.f32 %v4578_v48, %v4560_v57  ;;  %v8711_v21 = vadd.f32 %v4578_v48, %v4572_v10 }
0x183d   :  { %v8701_v63 = vadd.f32 %v4578_v48, %v4571_v49  ;;  %4584 = vrot.lane.b32.xlu1 %v8699_v14, %s7672_s24 }
0x183f   :  { %4661 = vrot.lane.b32.xlu0 %v8701_v63, %s7672_s24 }
0x1841   :  { %4738 = vrot.lane.b32.xlu1 %v8705_v18, %s7672_s24 }
0x1845   :  { %4815 = vrot.lane.b32.xlu1 %v8711_v21, %s7672_s24 }
0x18af   :  { %v4585_v43 = vpop.permute.xlu1 %4584 }
0x18b0   :  { %7338 = vmatpush3.xpose.msk.msra.mxu1 %vm410_vm2, %v4585_v43 }
0x18b1   :  { %7342 = vmatprep.subr.mxu1 %v7670_v40  ;;  %v4662_v24 = vpop.permute.xlu0 %4661 }
0x18b3   :  { %7340 = vmatmul.mubr.msk.f32.vlgmr.msra.gmra.mxu1 %vm410_vm2, %v8699_v14  ;;  %v4739_v15 = vpop.permute.xlu1 %4738 }
0x18b4   :  { %7343 = vmatpush3.xpose.msk.msra.mxu1 %vm410_vm2, %v4662_v24  ;;  %7344 = vmatprep.mubr.msk.f32.mxu1 %vm7671_vm1, %v7670_v40 }
0x18b5   :  { %7347 = vmatprep.subr.mxu1 %v7670_v40 }
0x18b7   :  { %7345 = vmatmul.mubr.msk.f32.vlgmr.msra.gmra.mxu1 %vm410_vm2, %v8701_v63  ;;  %v4816_v31 = vpop.permute.xlu1 %4815 }
0x18b8   :  { %7348 = vmatpush3.xpose.msk.msra.mxu1 %vm410_vm2, %v4739_v15  ;;  %7349 = vmatprep.mubr.msk.f32.mxu1 %vm7671_vm1, %v7670_v40 }
0x18b9   :  { %7352 = vmatprep.subr.mxu1 %v7670_v40 }
0x18bb   :  { %7350 = vmatmul.mubr.msk.f32.vlgmr.msra.gmra.mxu1 %vm410_vm2, %v8705_v18 }
0x18bc   :  { %7353 = vmatpush3.xpose.msk.msra.mxu1 %vm410_vm2, %v4816_v31  ;;  %7354 = vmatprep.mubr.msk.f32.mxu1 %vm7671_vm1, %v7670_v40 }
0x18bd   :  { %7357 = vmatprep.subr.mxu1 %v7670_v40 }
0x18bf   :  { %7355 = vmatmul.mubr.msk.f32.vlgmr.msra.gmra.mxu1 %vm410_vm2, %v8711_v21 }
0x18c0   :  { %7359 = vmatprep.mubr.msk.f32.mxu1 %vm7671_vm1, %v7670_v40 }
0x1973   :  { %v4656_v16 = vpop.f32.mrf.mxu1 }
0x1974   :  { %v4891_v32 = vmul.f32 0.25, %v4656_v16 }
0x1975   :  { %v7341_v27 = vpop.f32.mrf.mxu1 }
0x1976   :  { %v4895_v33 = vsel %vm2890_vm7, %v4891_v32, -inf }
0x1977   :  { %4896 = vmax.xlane.f32.xlu0 %v4895_v33  ;;  %v4733_v34 = vpop.f32.mrf.mxu1 }
0x1978   :  { %v4892_v35 = vmul.f32 0.25, %v4733_v34 }
0x1979   :  { %v7346_v36 = vpop.f32.mrf.mxu1 }
0x197a   :  { %v4898_v37 = vsel %vm2890_vm7, %v4892_v35, -inf }
0x197b   :  { %4899 = vmax.xlane.f32.xlu1 %v4898_v37  ;;  %v4810_v46 = vpop.f32.mrf.mxu1 }
0x197c   :  { %v4893_v39 = vmul.f32 0.25, %v4810_v46 }
0x197d   :  { %v7351_v41 = vpop.f32.mrf.mxu1 }
0x197e   :  { %v4901_v3 = vsel %vm2890_vm7, %v4893_v39, -inf  ;;  %v6616_v41 = vld [vmem:[%s8996_s4 + $0x40] sm:$0xff] }
0x197f   :  { %4902 = vmax.xlane.f32.xlu0 %v4901_v3  ;;  %v4887_v44 = vpop.f32.mrf.mxu1 }
0x1980   :  { %v4894_v42 = vmul.f32 0.25, %v4887_v44 }
0x1981   :  { %v7356_v23 = vpop.f32.mrf.mxu1 }
0x1982   :  { %v4904_v8 = vsel %vm2890_vm7, %v4894_v42, -inf }
0x1983   :  { %4905 = vmax.xlane.f32.xlu0 %v4904_v8 }
0x198c   :  { %4939 = vrot.lane.b32.xlu1 %v8699_v14, %s7673_s11 }
0x1a00   :  { %v4897_v17 = vpop.xlane.xlu0 %4896 }
0x1a01   :  { %v4907_v12 = vsub.f32 %v4891_v32, %v4897_v17 }
0x1a03   :  { %v4911_v28 = vmul.f32 1.442695, %v4907_v12 }
0x1a04   :  { %v4900_v53 = vpop.xlane.xlu1 %4899 }
0x1a05   :  { %7594 = vpow2.f32 %v4911_v28  ;;  %v4908_v54 = vsub.f32 %v4892_v35, %v4900_v53 }
0x1a07   :  { %v4913_v52 = vmul.f32 1.442695, %v4908_v54 }
0x1a08   :  { %v4940_v60 = vpop.permute.xlu1 %4939  ;;  %v4903_v58 = vpop.xlane.xlu0 %4902 }
0x1a09   :  { %7596 = vpow2.f32 %v4913_v52  ;;  %v4909_v61 = vsub.f32 %v4893_v39, %v4903_v58  ;;  %7358 = vmatpush3.msk.msra.mxu1 %vm855_vm4, %v4940_v60  ;;  %v6617_v39 = vld [vmem:[%s8996_s4 + $0x48] sm:$0xff] }
0x1a0a   :  { %7367 = vmatprep.subr.mxu1 %v7670_v40 }
0x1a0b   :  { %v4915_v45 = vmul.f32 1.442695, %v4909_v61 }
0x1a0c   :  { %v4906_v62 = vpop.xlane.xlu0 %4905 }
0x1a0d   :  { %7598 = vpow2.f32 %v4915_v45  ;;  %v4910_v0 = vsub.f32 %v4894_v42, %v4906_v62 }
0x1a0f   :  { %v4917_v51 = vmul.f32 1.442695, %v4910_v0 }
0x1a11   :  { %7600 = vpow2.f32 %v4917_v51 }
0x1a12   :  { %v7595_v1 = vpop.eup %7594 }
0x1a13   :  { %v4919_v4 = vsel %vm2890_vm7, %v7595_v1, 0.0 }
0x1a14   :  { %4920 = vadd.xlane.f32.xlu1 %v4919_v4 }
0x1a16   :  { %v7597_v55 = vpop.eup %7596 }
0x1a17   :  { %v4922_v7 = vsel %vm2890_vm7, %v7597_v55, 0.0 }
0x1a18   :  { %4923 = vadd.xlane.f32.xlu0 %v4922_v7 }
0x1a1a   :  { %v7599_v29 = vpop.eup %7598 }
0x1a1b   :  { %v4925_v59 = vsel %vm2890_vm7, %v7599_v29, 0.0 }
0x1a1c   :  { %4926 = vadd.xlane.f32.xlu1 %v4925_v59 }
0x1a1e   :  { %v7601_v11 = vpop.eup %7600 }
0x1a1f   :  { %v4928_v20 = vsel %vm2890_vm7, %v7601_v11, 0.0 }
0x1a20   :  { %4929 = vadd.xlane.f32.xlu0 %v4928_v20 }
0x1a2d   :  { %5093 = vrot.lane.b32.xlu1 %v8705_v18, %s7673_s11 }
0x1a31   :  { %5170 = vrot.lane.b32.xlu1 %v8711_v21, %s7673_s11 }
0x1a35   :  { %5418 = vrot.lane.b32.xlu1 %v8701_v63, %s7674_s2 }
0x1a36   :  { %5016 = vrot.lane.b32.xlu0 %v8701_v63, %s7673_s11 }
0x1a39   :  { %5416 = vrot.lane.b32.xlu1 %v8701_v63, %s7675_s12 }
0x1a3a   :  { %5340 = vrot.lane.b32.xlu0 %v8699_v14, %s7674_s2 }
0x1a3d   :  { %5574 = vrot.lane.b32.xlu1 %v8711_v21, %s7674_s2 }
0x1a3e   :  { %5338 = vrot.lane.b32.xlu0 %v8699_v14, %s7675_s12 }
0x1a41   :  { %5572 = vrot.lane.b32.xlu1 %v8711_v21, %s7675_s12 }
0x1a42   :  { %5496 = vrot.lane.b32.xlu0 %v8705_v18, %s7674_s2 }
0x1a46   :  { %5494 = vrot.lane.b32.xlu0 %v8705_v18, %s7675_s12 }
0x1a9d   :  { %v4921_v13 = vpop.xlane.xlu1 %4920 }
0x1a9e   :  { %7602 = vrcp.f32 %v4921_v13 }
0x1aa1   :  { %v4924_v30 = vpop.xlane.xlu0 %4923 }
0x1aa2   :  { %7604 = vrcp.f32 %v4924_v30 }
0x1aa5   :  { %v4927_v48 = vpop.xlane.xlu1 %4926 }
0x1aa6   :  { %7606 = vrcp.f32 %v4927_v48 }
0x1aa9   :  { %v4930_v57 = vpop.xlane.xlu0 %4929  ;;  %v5094_v10 = vpop.permute.xlu1 %5093 }
0x1aaa   :  { %7608 = vrcp.f32 %v4930_v57 }
0x1aab   :  { %v7603_v49 = vpop.eup %7602 }
0x1aac   :  { %v4935_v43 = vmul.f32 %v7603_v49, %v7595_v1 }
0x1aad   :  { %v5017_v24 = vpop.permute.xlu0 %5016  ;;  %v5171_v32 = vpop.permute.xlu1 %5170 }
0x1aae   :  { %7360 = vmatmul.mubr.msk.f32.vlgmr.msra.gmra.mxu1 %vm2937_vm8, %v4935_v43  ;;  %7363 = vmatpush3.msk.msra.mxu0 %vm855_vm4, %v5017_v24 }
0x1aaf   :  { %v7605_v15 = vpop.eup %7604  ;;  %7368 = vmatpush3.msk.msra.mxu1 %vm855_vm4, %v5094_v10  ;;  %7372 = vmatprep.subr.mxu0 %v7670_v40 }
0x1ab0   :  { %v4936_v31 = vmul.f32 %v7605_v15, %v7597_v55  ;;  %7369 = vmatprep.mubr.msk.f32.mxu1 %vm7671_vm1, %v7670_v40  ;;  %7377 = vmatprep.subr.mxu1 %v6617_v39 }
0x1ab1   :  { %v5341_v16 = vpop.permute.xlu0 %5340  ;;  %v5419_v42 = vpop.permute.xlu1 %5418 }
0x1ab2   :  { %7365 = vmatmul.mubr.msk.f32.vlgmr.msra.gmra.mxu0 %vm2937_vm8, %v4936_v31 }
0x1ab3   :  { %v7607_v27 = vpop.eup %7606  ;;  %7373 = vmatpush3.msk.msra.mxu0 %vm855_vm4, %v5171_v32  ;;  %7374 = vmatprep.mubr.msk.f32.mxu0 %vm7671_vm1, %v7670_v40 }
0x1ab4   :  { %v4937_v33 = vmul.f32 %v7607_v27, %v7599_v29  ;;  %7384 = vmatprep.subr.mxu0 %v7670_v40 }
0x1ab5   :  { %v5339_v34 = vpop.permute.xlu0 %5338  ;;  %v5417_v28 = vpop.permute.xlu1 %5416 }
0x1ab6   :  { %7370 = vmatmul.mubr.msk.f32.vlgmr.msra.gmra.mxu1 %vm2937_vm8, %v4937_v33 }
0x1ab7   :  { %v7609_v35 = vpop.eup %7608  ;;  %7378 = vmatpush3.msra.mxu1 %v6617_v39 }
0x1ab8   :  { %v4938_v36 = vmul.f32 %v7609_v35, %v7601_v11  ;;  %7379 = vmatprep.subr.mxu1 %v6616_v41 }
0x1ab9   :  { %v5497_v37 = vpop.permute.xlu0 %5496  ;;  %7380 = vmatpush3.msra.mxu1 %v6616_v41  ;;  %v5575_v58 = vpop.permute.xlu1 %5574 }
0x1aba   :  { %7375 = vmatmul.mubr.msk.f32.vlgmr.msra.gmra.mxu0 %vm2937_vm8, %v4938_v36  ;;  %7389 = vmatprep.subr.mxu1 %v7670_v40 }
0x1abb   :  { %7385 = vmatpush3.xpose.msk.msra.mxu0 %vm410_vm2, %v5341_v16  ;;  %7386 = vmatprep.mubr.msk.f32.mxu0 %vm7671_vm1, %v7670_v40 }
0x1abc   :  { %7394 = vmatprep.subr.mxu0 %v7670_v40 }
0x1abd   :  { %v5495_v46 = vpop.permute.xlu0 %5494  ;;  %v5573_v4 = vpop.permute.xlu1 %5572 }
0x1abe   :  { %7387 = vmatmul.mubr.msk.f32.vlgmr.msra.gmra.mxu0 %vm410_vm2, %v5339_v34 }
0x1abf   :  { %7395 = vmatpush3.xpose.msk.msra.mxu0 %vm410_vm2, %v5497_v37  ;;  %7396 = vmatprep.mubr.msk.f32.mxu0 %vm7671_vm1, %v7670_v40 }
0x1ac0   :  { %7404 = vmatprep.subr.mxu0 %v7670_v40 }
0x1ac2   :  { %7397 = vmatmul.mubr.msk.f32.vlgmr.msra.gmra.mxu0 %vm410_vm2, %v5495_v46 }
0x1ac3   :  { %7406 = vmatprep.mubr.msk.f32.mxu0 %vm7671_vm1, %v7670_v40 }
0x1b6e   :  { %v5012_v3 = vpop.f32.mrf.mxu1 }
0x1b70   :  { %v7361_v44 = vpop.f32.mrf.mxu1 }
0x1b72   :  { %v5089_v23 = vpop.f32.mrf.mxu0 }
0x1b73   :  { %v5251_v8 = vcombine.low %v5012_v3, %v5089_v23 }
0x1b74   :  { %v7366_v17 = vpop.f32.mrf.mxu0 }
0x1b75   :  { %7381 = vmatprep.mubr.msk.f32.mxu1 %vm410_vm2, %v5251_v8 }
0x1b76   :  { %v5166_v12 = vpop.f32.mrf.mxu1 }
0x1b78   :  { %v7371_v53 = vpop.f32.mrf.mxu1 }
0x1b7a   :  { %v5243_v54 = vpop.f32.mrf.mxu0 }
0x1b7b   :  { %v5252_v52 = vcombine.low %v5166_v12, %v5243_v54 }
0x1b7c   :  { %v7376_v60 = vpop.f32.mrf.mxu0 }
0x1b7d   :  { %7382 = vmatmul.mubr.msk.f32.vlgmr.msra.gmra.mxu1 %vm410_vm2, %v5252_v52 }
0x1b7e   :  { %7390 = vmatpush3.xpose.msk.msra.mxu1 %vm410_vm2, %v5419_v42  ;;  %v5412_v61 = vpop.f32.mrf.mxu0  ;;  %7391 = vmatprep.mubr.msk.f32.mxu1 %vm7671_vm1, %v7670_v40 }
0x1b7f   :  { %v5650_v45 = vmul.f32 0.25, %v5412_v61  ;;  %7399 = vmatprep.subr.mxu1 %v7670_v40 }
0x1b80   :  { %v7388_v62 = vpop.f32.mrf.mxu0 }
0x1b81   :  { %7392 = vmatmul.mubr.msk.f32.vlgmr.msra.gmra.mxu1 %vm410_vm2, %v5417_v28  ;;  %v5654_v0 = vsel %vm2890_vm7, %v5650_v45, -inf }
0x1b82   :  { %7400 = vmatpush3.xpose.msk.msra.mxu1 %vm410_vm2, %v5575_v58  ;;  %5655 = vmax.xlane.f32.xlu0 %v5654_v0  ;;  %v5568_v51 = vpop.f32.mrf.mxu0 }
0x1b83   :  { %v5652_v1 = vmul.f32 0.25, %v5568_v51  ;;  %7401 = vmatprep.mubr.msk.f32.mxu1 %vm7671_vm1, %v7670_v40  ;;  %7409 = vmatprep.subr.mxu1 %v7670_v40 }
0x1b84   :  { %v7398_v55 = vpop.f32.mrf.mxu0 }
0x1b85   :  { %7402 = vmatmul.mubr.msk.f32.vlgmr.msra.gmra.mxu1 %vm410_vm2, %v5573_v4  ;;  %v5660_v7 = vsel %vm2890_vm7, %v5652_v1, -inf }
0x1b86   :  { %5661 = vmax.xlane.f32.xlu0 %v5660_v7  ;;  %7411 = vmatprep.mubr.msk.f32.mxu1 %vm7671_vm1, %v7670_v40  ;;  %v6619_v7 = vld [vmem:[%s8996_s4 + $0x58] sm:$0xff] }
0x1c0b   :  { %v5656_v29 = vpop.xlane.xlu0 %5655 }
0x1c0c   :  { %v5666_v59 = vsub.f32 %v5650_v45, %v5656_v29  ;;  %v6618_v29 = vld [vmem:[%s8996_s4 + $0x50] sm:$0xff] }
0x1c0e   :  { %v5670_v20 = vmul.f32 1.442695, %v5666_v59 }
0x1c0f   :  { %v5662_v11 = vpop.xlane.xlu0 %5661 }
0x1c10   :  { %v5668_v13 = vsub.f32 %v5652_v1, %v5662_v11  ;;  %7610 = vpow2.f32 %v5670_v20 }
0x1c12   :  { %v5674_v30 = vmul.f32 1.442695, %v5668_v13 }
0x1c14   :  { %7612 = vpow2.f32 %v5674_v30 }
0x1c1d   :  { %v7611_v15 = vpop.eup %7610 }
0x1c1e   :  { %v5678_v33 = vsel %vm2890_vm7, %v7611_v15, 0.0 }
0x1c21   :  { %v7613_v34 = vpop.eup %7612 }
0x1c22   :  { %v5684_v35 = vsel %vm2890_vm7, %v7613_v34, 0.0 }
0x1c3d   :  { %v8821_v48 = vpop.f32.mrf.mxu1 }
0x1c3f   :  { %v8823_v57 = vpop.f32.mrf.mxu1 }
0x1c41   :  { %v5490_v49 = vpop.f32.mrf.mxu1 }
0x1c42   :  { %v5651_v10 = vmul.f32 0.25, %v5490_v49 }
0x1c43   :  { %v7393_v43 = vpop.f32.mrf.mxu1 }
0x1c44   :  { %v5657_v24 = vsel %vm2890_vm7, %v5651_v10, -inf }
0x1c45   :  { %5658 = vmax.xlane.f32.xlu1 %v5657_v24  ;;  %v5646_v31 = vpop.f32.mrf.mxu1  ;;  %v6104_v24 = vrot.slane %v8695_v47, %v8181_v26 }
0x1c46   :  { %v5653_v16 = vmul.f32 0.25, %v5646_v31  ;;  %v5335_v31 = vcombine.high %v8821_v48, %v8821_v48 }
0x1c47   :  { %v7403_v32 = vpop.f32.mrf.mxu1 }
0x1c48   :  { %v5663_v27 = vsel %vm2890_vm7, %v5653_v16, -inf }
0x1c49   :  { %5664 = vmax.xlane.f32.xlu0 %v5663_v27  ;;  %5679 = vadd.xlane.f32.xlu1 %v5678_v33 }
0x1c4d   :  { %5685 = vadd.xlane.f32.xlu1 %v5684_v35 }
0x1c5e   :  { %5698 = vrot.lane.b32.xlu1 %v8699_v14, %s7676_s17 }
0x1c62   :  { %5852 = vrot.lane.b32.xlu1 %v8705_v18, %s7676_s17 }
0x1c66   :  { %5929 = vrot.lane.b32.xlu1 %v8711_v21, %s7676_s17 }
0x1cce   :  { %v5659_v36 = vpop.xlane.xlu1 %5658 }
0x1ccf   :  { %v5667_v37 = vsub.f32 %v5651_v10, %v5659_v36 }
0x1cd1   :  { %v5672_v46 = vmul.f32 1.442695, %v5667_v37 }
0x1cd2   :  { %v5680_v39 = vpop.xlane.xlu1 %5679  ;;  %v5665_v41 = vpop.xlane.xlu0 %5664 }
0x1cd3   :  { %7614 = vpow2.f32 %v5672_v46  ;;  %v5669_v3 = vsub.f32 %v5653_v16, %v5665_v41  ;;  %v5334_v16 = vcombine.high %v8823_v57, %v8823_v57 }
0x1cd4   :  { %7616 = vrcp.f32 %v5680_v39 }
0x1cd5   :  { %v5676_v44 = vmul.f32 1.442695, %v5669_v3 }
0x1cd6   :  { %v5686_v42 = vpop.xlane.xlu1 %5685 }
0x1cd7   :  { %7618 = vpow2.f32 %v5676_v44 }
0x1cd8   :  { %7620 = vrcp.f32 %v5686_v42 }
0x1cda   :  { %v5699_v23 = vpop.permute.xlu1 %5698 }
0x1cdb   :  { %7405 = vmatpush3.msk.msra.mxu0 %vm855_vm4, %v5699_v23 }
0x1cdc   :  { %7414 = vmatprep.subr.mxu0 %v7670_v40 }
0x1cde   :  { %v5853_v12 = vpop.permute.xlu1 %5852 }
0x1ce0   :  { %v7615_v14 = vpop.eup %7614 }
0x1ce1   :  { %v7617_v18 = vpop.eup %7616  ;;  %v5681_v21 = vsel %vm2890_vm7, %v7615_v14, 0.0 }
0x1ce2   :  { %5682 = vadd.xlane.f32.xlu0 %v5681_v21  ;;  %v5694_v8 = vmul.f32 %v7617_v18, %v7611_v15  ;;  %v5930_v62 = vpop.permute.xlu1 %5929 }
0x1ce4   :  { %v7619_v17 = vpop.eup %7618  ;;  %7407 = vmatmul.mubr.msk.f32.vlgmr.msra.gmra.mxu0 %vm2937_vm8, %v5694_v8 }
0x1ce5   :  { %v7621_v28 = vpop.eup %7620  ;;  %7415 = vmatpush3.msk.msra.mxu0 %vm855_vm4, %v5853_v12  ;;  %7416 = vmatprep.mubr.msk.f32.mxu0 %vm7671_vm1, %v7670_v40  ;;  %v5687_v53 = vsel %vm2890_vm7, %v7619_v17, 0.0 }
0x1ce6   :  { %5688 = vadd.xlane.f32.xlu0 %v5687_v53  ;;  %v5696_v54 = vmul.f32 %v7621_v28, %v7613_v34  ;;  %7424 = vmatprep.subr.mxu0 %v6619_v7 }
0x1ce8   :  { %7417 = vmatmul.mubr.msk.f32.vlgmr.msra.gmra.mxu0 %vm2937_vm8, %v5696_v54 }
0x1ce9   :  { %7425 = vmatpush3.msra.mxu0 %v6619_v7  ;;  %v6637_v7 = vld [vmem:[%s8998_s6 + $0x168] sm:$0xff] }
0x1cea   :  { %7426 = vmatprep.subr.mxu0 %v6618_v29 }
0x1ceb   :  { %7427 = vmatpush3.msra.mxu0 %v6618_v29  ;;  %v6636_v29 = vld [vmem:[%s8998_s6 + $0x160] sm:$0xff] }
0x1cfc   :  { %5775 = vrot.lane.b32.xlu0 %v8701_v63, %s7676_s17 }
0x1d6b   :  { %v5683_v52 = vpop.xlane.xlu0 %5682 }
0x1d6c   :  { %7622 = vrcp.f32 %v5683_v52 }
0x1d6f   :  { %v5689_v60 = vpop.xlane.xlu0 %5688 }
0x1d70   :  { %7624 = vrcp.f32 %v5689_v60 }
0x1d73   :  { %v5776_v58 = vpop.permute.xlu0 %5775 }
0x1d74   :  { %7410 = vmatpush3.msk.msra.mxu1 %vm855_vm4, %v5776_v58 }
0x1d75   :  { %7419 = vmatprep.subr.mxu1 %v7670_v40 }
0x1d79   :  { %v7623_v61 = vpop.eup %7622 }
0x1d7a   :  { %v5695_v45 = vmul.f32 %v7623_v61, %v7615_v14 }
0x1d7c   :  { %7412 = vmatmul.mubr.msk.f32.vlgmr.msra.gmra.mxu1 %vm2937_vm8, %v5695_v45 }
0x1d7d   :  { %v7625_v0 = vpop.eup %7624  ;;  %7420 = vmatpush3.msk.msra.mxu1 %vm855_vm4, %v5930_v62  ;;  %7421 = vmatprep.mubr.msk.f32.mxu1 %vm7671_vm1, %v7670_v40 }
0x1d7e   :  { %v5697_v63 = vmul.f32 %v7625_v0, %v7619_v17  ;;  %v6623_v0 = vld [vmem:[%s8997_s5 + $0x58] sm:$0xff] }
0x1d7f   :  { %7431 = vmatprep.subr.mxu1 %v6623_v0 }
0x1d80   :  { %7422 = vmatmul.mubr.msk.f32.vlgmr.msra.gmra.mxu1 %vm2937_vm8, %v5697_v63  ;;  %v6622_v63 = vld [vmem:[%s8997_s5 + $0x50] sm:$0xff] }
0x1d81   :  { %7432 = vmatpush3.msra.mxu1 %v6623_v0 }
0x1d82   :  { %7433 = vmatprep.subr.mxu1 %v6622_v63 }
0x1d83   :  { %7434 = vmatpush3.msra.mxu1 %v6622_v63 }
0x1da4   :  { %v5771_v51 = vpop.f32.mrf.mxu0 }
0x1da6   :  { %v7408_v1 = vpop.f32.mrf.mxu0 }
0x1da7   :  { %v6620_v1 = vld [vmem:[%s8997_s5 + $0x40] sm:$0xff] }
0x1da8   :  { %v5925_v4 = vpop.f32.mrf.mxu0 }
0x1daa   :  { %v7418_v55 = vpop.f32.mrf.mxu0 }
0x1dab   :  { %v6638_v55 = vld [vmem:[%s8998_s6 + $0x170] sm:$0xff] }
0x1e3c   :  { %v5848_v40 = vpop.f32.mrf.mxu1 }
0x1e3d   :  { %v6010_v59 = vcombine.low %v5771_v51, %v5848_v40  ;;  %v6621_v51 = vld [vmem:[%s8997_s5 + $0x48] sm:$0xff]  ;;  %v6635_v40 = vld [vmem:[%s8998_s6 + $0x158] sm:$0xff] }
0x1e3e   :  { %v7413_v11 = vpop.f32.mrf.mxu1  ;;  %7435 = vmatprep.subr.mxu1 %v6621_v51 }
0x1e3f   :  { %7428 = vmatprep.mubr.msk.f32.mxu0 %vm410_vm2, %v6010_v59  ;;  %7436 = vmatpush3.msra.mxu1 %v6621_v51  ;;  %v6634_v59 = vld [vmem:[%s8998_s6 + $0x150] sm:$0xff]  ;;  %v6633_v11 = vld [vmem:[%s8998_s6 + $0x148] sm:$0xff] }
0x1e40   :  { %v6002_v20 = vpop.f32.mrf.mxu1  ;;  %7437 = vmatprep.subr.mxu1 %v6620_v1 }
0x1e41   :  { %v6011_v13 = vcombine.low %v5925_v4, %v6002_v20  ;;  %7438 = vmatpush3.msra.mxu1 %v6620_v1  ;;  %v6639_v4 = vld [vmem:[%s8998_s6 + $0x178] sm:$0xff]  ;;  %v6632_v20 = vld [vmem:[%s8998_s6 + $0x140] sm:$0xff] }
0x1e42   :  { %v7423_v30 = vpop.f32.mrf.mxu1  ;;  %7442 = vmatprep.subr.mxu0 %v6639_v4 }
0x1e43   :  { %7429 = vmatmul.mubr.msk.f32.vlgmr.msra.gmra.mxu0 %vm410_vm2, %v6011_v13  ;;  %v6631_v13 = vld [vmem:[%s8998_s6 + $0x138] sm:$0xff]  ;;  %v6630_v30 = vld [vmem:[%s8998_s6 + $0x130] sm:$0xff] }
0x1e44   :  { %7443 = vmatpush3.msra.mxu0 %v6639_v4 }
0x1e45   :  { %7444 = vmatprep.subr.mxu0 %v6638_v55 }
0x1e46   :  { %7445 = vmatpush3.msra.mxu0 %v6638_v55 }
0x1e47   :  { %7446 = vmatprep.subr.mxu0 %v6637_v7 }
0x1e48   :  { %7447 = vmatpush3.msra.mxu0 %v6637_v7 }
0x1e49   :  { %7448 = vmatprep.subr.mxu0 %v6636_v29 }
0x1e4a   :  { %7449 = vmatpush3.msra.mxu0 %v6636_v29 }
0x1e4b   :  { %7450 = vmatprep.subr.mxu0 %v6635_v40 }
0x1e4c   :  { %7451 = vmatpush3.msra.mxu0 %v6635_v40  ;;  %v6376_v40 = vrot.slane %v8695_v47, %v8317_v25 }
0x1e4d   :  { %7452 = vmatprep.subr.mxu0 %v6634_v59 }
0x1e4e   :  { %7453 = vmatpush3.msra.mxu0 %v6634_v59 }
0x1e4f   :  { %7454 = vmatprep.subr.mxu0 %v6633_v11 }
0x1e50   :  { %7455 = vmatpush3.msra.mxu0 %v6633_v11 }
0x1e51   :  { %7456 = vmatprep.subr.mxu0 %v6632_v20 }
0x1e52   :  { %7457 = vmatpush3.msra.mxu0 %v6632_v20 }
0x1e53   :  { %7458 = vmatprep.subr.mxu0 %v6631_v13 }
0x1e54   :  { %7459 = vmatpush3.msra.mxu0 %v6631_v13 }
0x1e55   :  { %7460 = vmatprep.subr.mxu0 %v6630_v30 }
0x1e56   :  { %7461 = vmatpush3.msra.mxu0 %v6630_v30 }
0x1f03   :  { %v7430_v49 = vpop.f32.mrf.mxu0 }
0x1f04   :  { %v6094_v10 = vcombine.high %v7430_v49, %v7430_v49  ;;  %v6099_v43 = vadd.f32 %v7430_v49, %v8821_v48 }
0x1f05   :  { %v6082_v15 = vpop.f32.mrf.mxu0 }
0x1f06   :  { %v6093_v32 = vcombine.high %v6082_v15, %v6082_v15  ;;  %v6097_v27 = vadd.f32 %v6082_v15, %v8823_v57  ;;  %v6100_v33 = vadd.f32 %v6094_v10, %v5335_v31  ;;  %v6107_v34 = vadd.f32 %v6104_v24, %v6099_v43 }
0x1f08   :  { %v6098_v35 = vadd.f32 %v6093_v32, %v5334_v16  ;;  %v6105_v36 = vadd.f32 %v6104_v24, %v6097_v27  ;;  %v6111_v41 = vadd.f32 %v6107_v34, %v8683_v50  ;;  %v6108_v48 = vadd.f32 %v6104_v24, %v6100_v33 }
0x1f0a   :  { %v6109_v37 = vadd.f32 %v6105_v36, %v8676_v38  ;;  %v6106_v46 = vadd.f32 %v6104_v24, %v6098_v35  ;;  %v6119_v57 = vsel %vm2103_vm6, %v6111_v41, 0.0  ;;  %v6112_v44 = vadd.f32 %v6108_v48, %v8685_v22 }
0x1f0b   :  { %v6168_v36 = vrot.slane %v8695_v47, %v8270_v5  ;;  %v6176_v48 = vrot.slane %v8695_v47, %v8280_v56  ;;  %v6629_v56 = vld [vmem:[%s8998_s6 + $0x128] sm:$0xff] }
0x1f0c   :  { %v6113_v39 = vsel %vm2103_vm6, %v6109_v37, 0.0  ;;  %v6110_v26 = vadd.f32 %v6106_v46, %v8678_v9  ;;  %v6122_v42 = vsel %vm2103_vm6, %v6112_v44, 0.0  ;;  %7462 = vmatprep.subr.mxu0 %v6629_v56 }
0x1f0d   :  { %6114 = vadd.xlane.f32.xlu0 %v6113_v39  ;;  %7463 = vmatpush3.msra.mxu0 %v6629_v56 }
0x1f0e   :  { %v6116_v3 = vsel %vm2103_vm6, %v6110_v26, 0.0 }
0x1f0f   :  { %6117 = vadd.xlane.f32.xlu1 %v6116_v3 }
0x1f11   :  { %6120 = vadd.xlane.f32.xlu0 %v6119_v57 }
0x1f15   :  { %6123 = vadd.xlane.f32.xlu0 %v6122_v42 }
0x1f96   :  { %v6115_v38 = vpop.xlane.xlu0 %6114 }
0x1f97   :  { %v6125_v23 = vmul.f32 0.03125, %v6115_v38 }
0x1f98   :  { %v6118_v14 = vpop.xlane.xlu1 %6117 }
0x1f99   :  { %v8877_v18 = vsub.f32 %v6109_v37, %v6125_v23  ;;  %v6126_v9 = vmul.f32 0.03125, %v6118_v14 }
0x1f9a   :  { %v6121_v50 = vpop.xlane.xlu0 %6120 }
0x1f9b   :  { %v8879_v21 = vsub.f32 %v6110_v26, %v6126_v9  ;;  %v6127_v8 = vmul.f32 0.03125, %v6121_v50  ;;  %v6133_v17 = vmul.f32 %v8877_v18, %v8877_v18 }
0x1f9d   :  { %v8883_v12 = vsub.f32 %v6111_v41, %v6127_v8  ;;  %v6137_v22 = vsel %vm2103_vm6, %v6133_v17, 0.0  ;;  %v6134_v28 = vmul.f32 %v8879_v21, %v8879_v21  ;;  %v6628_v17 = vld [vmem:[%s8998_s6 + $0x120] sm:$0xff] }
0x1f9e   :  { %v6124_v53 = vpop.xlane.xlu0 %6123  ;;  %6138 = vadd.xlane.f32.xlu1 %v6137_v22  ;;  %7464 = vmatprep.subr.mxu0 %v6628_v17  ;;  %v6626_v22 = vld [vmem:[%s8998_s6 + $0x110] sm:$0xff] }
0x1f9f   :  { %v6128_v54 = vmul.f32 0.03125, %v6124_v53  ;;  %v6140_v52 = vsel %vm2103_vm6, %v6134_v28, 0.0  ;;  %v6135_v60 = vmul.f32 %v8883_v12, %v8883_v12  ;;  %7465 = vmatpush3.msra.mxu0 %v6628_v17  ;;  %v6625_v28 = vld [vmem:[%s8998_s6 + $0x108] sm:$0xff]  ;;  %v6624_v53 = vld [vmem:[%s8998_s6 + $0x100] sm:$0xff] }
0x1fa0   :  { %6141 = vadd.xlane.f32.xlu0 %v6140_v52  ;;  %v6275_v52 = vrot.slane %v8695_v47, %v8310_v6 }
0x1fa1   :  { %v8891_v58 = vsub.f32 %v6112_v44, %v6128_v54  ;;  %v6143_v61 = vsel %vm2103_vm6, %v6135_v60, 0.0 }
0x1fa2   :  { %6144 = vadd.xlane.f32.xlu1 %v6143_v61 }
0x1fa3   :  { %v6136_v45 = vmul.f32 %v8891_v58, %v8891_v58 }
0x1fa5   :  { %v6146_v62 = vsel %vm2103_vm6, %v6136_v45, 0.0 }
0x1fa6   :  { %6147 = vadd.xlane.f32.xlu0 %v6146_v62 }
0x2027   :  { %v6139_v49 = vpop.xlane.xlu1 %6138 }
0x2028   :  { %v6149_v10 = vmul.f32 0.03125, %v6139_v49 }
0x2029   :  { %v6142_v43 = vpop.xlane.xlu0 %6141 }
0x202a   :  { %v6153_v24 = vadd.f32 1e-05, %v6149_v10  ;;  %v6150_v15 = vmul.f32 0.03125, %v6142_v43 }
0x202b   :  { %v6145_v31 = vpop.xlane.xlu1 %6144 }
0x202c   :  { %7626 = vrsqrt.f32 %v6153_v24  ;;  %v6154_v16 = vadd.f32 1e-05, %v6150_v15  ;;  %v6151_v32 = vmul.f32 0.03125, %v6145_v31 }
0x202e   :  { %7628 = vrsqrt.f32 %v6154_v16  ;;  %v6155_v27 = vadd.f32 1e-05, %v6151_v32 }
0x202f   :  { %v6148_v33 = vpop.xlane.xlu0 %6147 }
0x2030   :  { %7630 = vrsqrt.f32 %v6155_v27  ;;  %v6152_v34 = vmul.f32 0.03125, %v6148_v33 }
0x2032   :  { %v6156_v35 = vadd.f32 1e-05, %v6152_v34 }
0x2034   :  { %7632 = vrsqrt.f32 %v6156_v35 }
0x2039   :  { %v7627_v37 = vpop.eup %7626 }
0x203a   :  { %v6161_v46 = vmul.f32 %v7627_v37, %v8877_v18 }
0x203b   :  { %v7629_v39 = vpop.eup %7628 }
0x203c   :  { %v6162_v26 = vmul.f32 %v7629_v39, %v8879_v21  ;;  %v6169_v41 = vmul.f32 %v6168_v36, %v6161_v46 }
0x203d   :  { %v7631_v3 = vpop.eup %7630 }
0x203e   :  { %v6163_v57 = vmul.f32 %v7631_v3, %v8883_v12  ;;  %v6170_v44 = vmul.f32 %v6168_v36, %v6162_v26  ;;  %v6177_v42 = vadd.f32 %v6176_v48, %v6169_v41  ;;  %v6627_v12 = vld [vmem:[%s8998_s6 + $0x118] sm:$0xff]  ;;  %s7677_s6 = smov [#allocation2]  }
0x203f   :  { %7466 = vmatprep.subr.mxu0 %v6627_v12  ;;  %s6462_s14 = sshll.u32 %s7677_s6, 4  ;;  %s6463_s14 = int_to_ptr.vmem [resolvable:$true] %s6462_s14 }
0x2040   :  { %v6178_v38 = vadd.f32 %v6176_v48, %v6170_v44  ;;  %v6171_v9 = vmul.f32 %v6168_v36, %v6163_v57  ;;  %7467 = vmatpush3.msra.mxu0 %v6627_v12  ;;  %s7648_s15 = scalar_lea.vmem %s6463_s14, 256  ;;  %p7653_p1 = scmp.lt.s32.totalorder %s6463_s14, %s6463_s14 }
0x2041   :  { %v7633_v23 = vpop.eup %7632  ;;  %7468 = vmatprep.subr.mxu0 %v6626_v22  ;;  %p7649_p0 = scmp.ne.s32.totalorder %s6463_s14, %s7648_s15  ;;  %p7654_p2 = scmp.lt.s32.totalorder %s7648_s15, %s7648_s15 }
0x2042   :  { %v6164_v14 = vmul.f32 %v7633_v23, %v8891_v58  ;;  %v6185_v5 = vcombine.low %v6177_v42, %v6178_v38  ;;  %v6179_v50 = vadd.f32 %v6176_v48, %v6171_v9  ;;  %7469 = vmatpush3.msra.mxu0 %v6626_v22 }
0x2043   :  { %7470 = vmatprep.subr.mxu0 %v6625_v28  ;;  %p7655_p3 = por %p7654_p2, %p7653_p1 }
0x2044   :  { %7439 = vmatprep.mubr.msk.f32.mxu1 %vm85_vm0, %v6185_v5  ;;  %v6172_v18 = vmul.f32 %v6168_v36, %v6164_v14  ;;  %7471 = vmatpush3.msra.mxu0 %v6625_v28 }
0x2045   :  { %7472 = vmatprep.subr.mxu0 %v6624_v53  ;;  %p7656_p4 = pnand %p7655_p3, %p7649_p0 }
0x2046   :  { %v6180_v21 = vadd.f32 %v6176_v48, %v6172_v18  ;;  %7473 = vmatpush3.msra.mxu0 %v6624_v53 }
0x2048   :  { %v6186_v8 = vcombine.low %v6179_v50, %v6180_v21 }
0x204a   :  { %7440 = vmatmul.mubr.msk.f32.vlgmr.msra.gmra.mxu1 %vm85_vm0, %v6186_v8 }
0x210a   :  { %v7441_v54 = vpop.f32.mrf.mxu1 }
0x210b   :  { %v6269_v60 = vcombine.high %v7441_v54, %v7441_v54  ;;  %v6278_v0 = vadd.f32 %v7441_v54, %v6275_v52 }
0x210c   :  { %v6257_v58 = vpop.f32.mrf.mxu1 }
0x210d   :  { %v6279_v61 = vadd.f32 %v6275_v52, %v6269_v60  ;;  %v6268_v45 = vcombine.high %v6257_v58, %v6257_v58  ;;  %v6276_v62 = vadd.f32 %v6275_v52, %v6257_v58  ;;  %v6282_v55 = vmax.f32 %v6278_v0, 0.0 }
0x210e   :  { %v6440_v58 = vrot.slane %v8695_v47, %v8343_v19 }
0x210f   :  { %v6277_v63 = vadd.f32 %v6275_v52, %v6268_v45  ;;  %v6283_v51 = vmax.f32 %v6279_v61, 0.0  ;;  %v6280_v1 = vmax.f32 %v6276_v62, 0.0  ;;  %v6448_v62 = vrot.slane %v8695_v47, %v8348_v2 }
0x2111   :  { %v6281_v4 = vmax.f32 %v6277_v63, 0.0  ;;  %v6289_v29 = vcombine.low %v6282_v55, %v6283_v51 }
0x2113   :  { %v6288_v7 = vcombine.low %v6280_v1, %v6281_v4 }
0x2115   :  { %7474 = vmatprep.mubr.f32.mxu0 %v6288_v7 }
0x2116   :  { %7475 = vmatmul.mubr.f32.vlgmr.msra.gmra.mxu0 %v6289_v29 }
0x21d6   :  { %v7476_v59 = vpop.f32.mrf.mxu0 }
0x21d7   :  { %v6370_v6 = vcombine.high %v7476_v59, %v7476_v59  ;;  %v6379_v20 = vadd.f32 %v7476_v59, %v6376_v40 }
0x21d8   :  { %v6358_v11 = vpop.f32.mrf.mxu0 }
0x21d9   :  { %v6369_v13 = vcombine.high %v6358_v11, %v6358_v11  ;;  %v6377_v30 = vadd.f32 %v6376_v40, %v6358_v11  ;;  %v6380_v49 = vadd.f32 %v6376_v40, %v6370_v6  ;;  %v6383_v31 = vadd.f32 %v6379_v20, %v6179_v50 }
0x21db   :  { %v6378_v10 = vadd.f32 %v6376_v40, %v6369_v13  ;;  %v6381_v43 = vadd.f32 %v6377_v30, %v6177_v42  ;;  %v6384_v32 = vadd.f32 %v6380_v49, %v6180_v21  ;;  %v6391_v25 = vsel %vm2103_vm6, %v6383_v31, 0.0 }
0x21dd   :  { %v6385_v24 = vsel %vm2103_vm6, %v6381_v43, 0.0  ;;  %v6382_v15 = vadd.f32 %v6378_v10, %v6178_v38  ;;  %v6394_v27 = vsel %vm2103_vm6, %v6384_v32, 0.0 }
0x21de   :  { %6386 = vadd.xlane.f32.xlu1 %v6385_v24 }
0x21df   :  { %v6388_v16 = vsel %vm2103_vm6, %v6382_v15, 0.0 }
0x21e0   :  { %6389 = vadd.xlane.f32.xlu0 %v6388_v16 }
0x21e2   :  { %6392 = vadd.xlane.f32.xlu1 %v6391_v25 }
0x21e4   :  { %6395 = vadd.xlane.f32.xlu0 %v6394_v27 }
0x2267   :  { %v6387_v33 = vpop.xlane.xlu1 %6386 }
0x2268   :  { %v6397_v34 = vmul.f32 0.03125, %v6387_v33 }
0x2269   :  { %v6390_v35 = vpop.xlane.xlu0 %6389 }
0x226a   :  { %v6401_v36 = vsub.f32 %v6381_v43, %v6397_v34  ;;  %v6398_v37 = vmul.f32 0.03125, %v6390_v35 }
0x226b   :  { %v6393_v46 = vpop.xlane.xlu1 %6392 }
0x226c   :  { %v6402_v39 = vsub.f32 %v6382_v15, %v6398_v37  ;;  %v6399_v26 = vmul.f32 0.03125, %v6393_v46  ;;  %v6405_v41 = vmul.f32 %v6401_v36, %v6401_v36 }
0x226d   :  { %v6396_v48 = vpop.xlane.xlu0 %6395 }
0x226e   :  { %v6403_v3 = vsub.f32 %v6383_v31, %v6399_v26  ;;  %v6400_v57 = vmul.f32 0.03125, %v6396_v48  ;;  %v6409_v44 = vsel %vm2103_vm6, %v6405_v41, 0.0  ;;  %v6406_v42 = vmul.f32 %v6402_v39, %v6402_v39 }
0x226f   :  { %6410 = vadd.xlane.f32.xlu1 %v6409_v44 }
0x2270   :  { %v6404_v38 = vsub.f32 %v6384_v32, %v6400_v57  ;;  %v6412_v23 = vsel %vm2103_vm6, %v6406_v42, 0.0  ;;  %v6407_v14 = vmul.f32 %v6403_v3, %v6403_v3 }
0x2271   :  { %6413 = vadd.xlane.f32.xlu0 %v6412_v23 }
0x2272   :  { %v6415_v5 = vsel %vm2103_vm6, %v6407_v14, 0.0  ;;  %v6408_v9 = vmul.f32 %v6404_v38, %v6404_v38 }
0x2273   :  { %6416 = vadd.xlane.f32.xlu1 %v6415_v5 }
0x2274   :  { %v6418_v18 = vsel %vm2103_vm6, %v6408_v9, 0.0 }
0x2275   :  { %6419 = vadd.xlane.f32.xlu0 %v6418_v18 }
0x22f8   :  { %v6411_v50 = vpop.xlane.xlu1 %6410 }
0x22f9   :  { %v6421_v21 = vmul.f32 0.03125, %v6411_v50 }
0x22fa   :  { %v6414_v8 = vpop.xlane.xlu0 %6413 }
0x22fb   :  { %v6425_v56 = vadd.f32 1e-05, %v6421_v21  ;;  %v6422_v17 = vmul.f32 0.03125, %v6414_v8 }
0x22fc   :  { %v6417_v12 = vpop.xlane.xlu1 %6416 }
0x22fd   :  { %7634 = vrsqrt.f32 %v6425_v56  ;;  %v6426_v22 = vadd.f32 1e-05, %v6422_v17  ;;  %v6423_v28 = vmul.f32 0.03125, %v6417_v12 }
0x22fe   :  { %v6420_v53 = vpop.xlane.xlu0 %6419 }
0x22ff   :  { %7636 = vrsqrt.f32 %v6426_v22  ;;  %v6427_v54 = vadd.f32 1e-05, %v6423_v28  ;;  %v6424_v52 = vmul.f32 0.03125, %v6420_v53 }
0x2301   :  { %7638 = vrsqrt.f32 %v6427_v54  ;;  %v6428_v60 = vadd.f32 1e-05, %v6424_v52 }
0x2303   :  { %7640 = vrsqrt.f32 %v6428_v60 }
0x230a   :  { %v7635_v61 = vpop.eup %7634 }
0x230b   :  { %v6433_v45 = vmul.f32 %v7635_v61, %v6401_v36 }
0x230c   :  { %v7637_v0 = vpop.eup %7636 }
0x230d   :  { %v6441_v63 = vmul.f32 %v6440_v58, %v6433_v45  ;;  %v6434_v51 = vmul.f32 %v7637_v0, %v6402_v39 }
0x230e   :  { %v7639_v1 = vpop.eup %7638 }
0x230f   :  { %v6442_v4 = vmul.f32 %v6440_v58, %v6434_v51  ;;  %v6435_v55 = vmul.f32 %v7639_v1, %v6403_v3  ;;  %v6449_v7 = vadd.f32 %v6448_v62, %v6441_v63 }
0x2310   :  { %v7641_v29 = vpop.eup %7640 }
0x2311   :  { %v6443_v40 = vmul.f32 %v6440_v58, %v6435_v55  ;;  %v6436_v59 = vmul.f32 %v7641_v29, %v6404_v38  ;;  %v6450_v6 = vadd.f32 %v6448_v62, %v6442_v4  ;;  %6453 = vst.msk [vmem:[#allocation2] sm:$0xf] %vm2103_vm6, %v6449_v7 }
0x2313   :  { %v6444_v19 = vmul.f32 %v6440_v58, %v6436_v59  ;;  %v6451_v11 = vadd.f32 %v6448_v62, %v6443_v40  ;;  %6454 = vst.msk [vmem:[#allocation2 + $0x4] sm:$0xf] %vm2103_vm6, %v6450_v6 }
0x2315   :  { %v6452_v2 = vadd.f32 %v6448_v62, %v6444_v19  ;;  %6455 = vst.msk [vmem:[#allocation2 + $0x8] sm:$0xf] %vm2103_vm6, %v6451_v11 }
0x2317   :  { %6456 = vst.msk [vmem:[#allocation2 + $0xc] sm:$0xf] %vm2103_vm6, %v6452_v2 }
0x2318   :  { %7659 = shalt.err (!%p7656_p4)
}
0x2319   :  { %s7678_s5 = smov 4  }
0x231a   :  { %6468 = dma.vmem_to_hbm [thread:$0]  %s6463_s14, 256, %s9000_s8, [#allocation3], %s7673_s11, %s7673_s11, %s7678_s5  }
0x231b   :  { %7668 = dma.done.wait [#allocation3], 256  }
0x231c   :  { %7669 = vsyncadd [#allocation3], 4294967040 }
0x231d   :  { %6472 = vsyncpa [#allocation3], 1 }

</bundles_post_ra>
